<compile_context>
chip_gen: v5e
topology: v5e:2x2
jax: 0.10.0
libtpu: 0.0.40
codegen_flags: <defaults>
</compile_context>

<pallas_src>
import jax
import jax.numpy as jnp
from jax import lax
from jax.experimental import pallas as pl
from jax.experimental.pallas import tpu as pltpu

EPS = 1e-5


# ----------------------------- fused kernel -----------------------------
def _fused_kernel(x_ref, w1_ref, b1_ref, g1_ref, be1_ref,
                  w2_ref, b2_ref, g2_ref, be2_ref,
                  out_ref,
                  pad1_ref, pad2_ref, p1_ref, p2_ref):
    N, H, Wo, twoC = x_ref.shape          # x comes in as (N, H, Wo, 2*Cin)
    Cin = twoC // 2
    Ho = H // 2
    C1 = w1_ref.shape[1]                  # conv1 out channels
    C2 = w2_ref.shape[0]                  # conv2 out channels
    HW = Ho * Wo
    M = N * HW
    inv_count = 1.0 / float(M)

    # ---------------- 2x2 max-pool, fully in VMEM ----------------
    x = x_ref[...]                                            # (N, H, Wo, 2*Cin)
    xw = jnp.maximum(x[..., :Cin], x[..., Cin:])              # pool W pairs -> (N, H, Wo, Cin)
    xr = xw.reshape(N, Ho, 2, Wo, Cin)                        # split H (leading dims only)
    pooled = jnp.maximum(xr[:, :, 0, :, :], xr[:, :, 1, :, :])  # (N, Ho, Wo, Cin)

    # ---------------- conv1: zero-pad in VMEM + im2col + ONE matmul ----------------
    pad1_ref[...] = jnp.zeros(pad1_ref.shape, pad1_ref.dtype)
    pad1_ref[:, 1:Ho + 1, 1:Wo + 1, :] = pooled
    xp = pad1_ref[...]                                        # (N, Ho+2, Wo+2, Cin)
    for dy in range(3):
        for dx in range(3):
            k = dy * 3 + dx
            piece = xp[:, dy:dy + Ho, dx:dx + Wo, :].reshape(M, Cin)
            p1_ref[:, k * Cin:(k + 1) * Cin] = piece          # build (M, 9*Cin) im2col
    y1 = jnp.dot(p1_ref[...], w1_ref[...],                    # (M, 9*Cin) @ (9*Cin, C1)
                 preferred_element_type=jnp.float32)
    y1 = y1 + b1_ref[...]                                     # (M, C1) + (1, C1)

    # ---------------- BN1 (training-mode batch stats) + ReLU ----------------
    s1 = jnp.sum(y1, axis=0, keepdims=True)                   # (1, C1)
    q1 = jnp.sum(y1 * y1, axis=0, keepdims=True)
    mean1 = s1 * inv_count
    var1 = jnp.maximum(q1 * inv_count - mean1 * mean1, 0.0)   # clamp: one-pass formula
    scale1 = g1_ref[...] * lax.rsqrt(var1 + EPS)
    shift1 = be1_ref[...] - mean1 * scale1
    y1 = jnp.maximum(y1 * scale1 + shift1, 0.0)               # (M, C1)

    # ---------------- conv2: pad + im2col + ONE (C2, M) matmul ----------------
    pad2_ref[...] = jnp.zeros(pad2_ref.shape, pad2_ref.dtype)
    pad2_ref[:, 1:Ho + 1, 1:Wo + 1, :] = y1.reshape(N, Ho, Wo, C1)
    yp = pad2_ref[...]                                        # (N, Ho+2, Wo+2, C1)
    for dy in range(3):
        for dx in range(3):
            k = dy * 3 + dx
            piece = yp[:, dy:dy + Ho, dx:dx + Wo, :].reshape(M, C1)
            p2_ref[:, k * C1:(k + 1) * C1] = piece            # (M, 9*C1)
    # (C2, 9*C1) @ (M, 9*C1)^T -> (C2, M): channels on sublanes, pixels on lanes.
    y2 = lax.dot_general(w2_ref[...], p2_ref[...],
                         (((1,), (1,)), ((), ())),
                         preferred_element_type=jnp.float32)
    y2 = y2 + b2_ref[...]                                     # (C2, M) + (C2, 1)

    # ---------------- BN2 + ReLU ----------------
    s2 = jnp.sum(y2, axis=1, keepdims=True)                   # (C2, 1)
    q2 = jnp.sum(y2 * y2, axis=1, keepdims=True)
    mean2 = s2 * inv_count
    var2 = jnp.maximum(q2 * inv_count - mean2 * mean2, 0.0)
    scale2 = g2_ref[...] * lax.rsqrt(var2 + EPS)
    shift2 = be2_ref[...] - mean2 * scale2
    y2 = jnp.maximum(y2 * scale2 + shift2, 0.0)               # (C2, N*Ho*Wo)

    # ---------------- single lane-dense (C2, M) store (full, unmasked) ----------------
    out_ref[...] = y2


# ----------------------------- wrapper -----------------------------
def maxpool_double_conv(x_nchw, p):
    N, Cin, H, W = x_nchw.shape
    C1 = p["w1"].shape[-1]
    C2 = p["w2"].shape[-1]
    Ho, Wo = H // 2, W // 2
    M = N * Ho * Wo

    # NCHW -> NHWC, then fold the W pooling pair into the channel dim.
    # (One small input transpose + a metadata reshape; everything else is in-kernel.)
    x_nhwc = jnp.transpose(x_nchw, (0, 2, 3, 1)).astype(jnp.float32)
    x_in = x_nhwc.reshape(N, H, Wo, 2 * Cin)

    # Weight / param prep (tiny, one-time host-side glue).
    w1f = p["w1"].astype(jnp.float32).reshape(9 * Cin, C1)        # (dy,dx,ci) x cout
    w2t = p["w2"].astype(jnp.float32).reshape(9 * C1, C2).T       # cout x (dy,dx,ci)
    b1 = p["b1"].astype(jnp.float32).reshape(1, C1)
    g1 = p["g1"].astype(jnp.float32).reshape(1, C1)
    be1 = p["be1"].astype(jnp.float32).reshape(1, C1)
    b2 = p["b2"].astype(jnp.float32).reshape(C2, 1)
    g2 = p["g2"].astype(jnp.float32).reshape(C2, 1)
    be2 = p["be2"].astype(jnp.float32).reshape(C2, 1)

    def full(shape):
        return pl.BlockSpec(shape, lambda i: (0,) * len(shape))

    out = pl.pallas_call(
        _fused_kernel,
        out_shape=jax.ShapeDtypeStruct((C2, M), jnp.float32),     # lane-dense slab
        grid=(1,),
        in_specs=[full(tuple(x_in.shape)), full(tuple(w1f.shape)),
                  full(tuple(b1.shape)), full(tuple(g1.shape)), full(tuple(be1.shape)),
                  full(tuple(w2t.shape)), full(tuple(b2.shape)),
                  full(tuple(g2.shape)), full(tuple(be2.shape))],
        out_specs=full((C2, M)),
        scratch_shapes=[
            pltpu.VMEM((N, Ho + 2, Wo + 2, Cin), jnp.float32),   # padded pooled input
            pltpu.VMEM((N, Ho + 2, Wo + 2, C1), jnp.float32),    # padded conv1 output
            pltpu.VMEM((M, 9 * Cin), jnp.float32),               # im2col for conv1
            pltpu.VMEM((M, 9 * C1), jnp.float32),                # im2col for conv2
        ],
        compiler_params=pltpu.CompilerParams(
            dimension_semantics=("arbitrary",),
            vmem_limit_bytes=32 * 1024 * 1024),
    )(x_in, w1f, b1, g1, be1, w2t, b2, g2, be2)

    # Layout plumbing on ~4 KiB: (C2, N*Ho*Wo) -> NCHW.
    return jnp.transpose(out.reshape(C2, N, Ho, Wo), (1, 0, 2, 3))


# ----------------------------- params -----------------------------
def init_params(key, in_channels, out_channels):
    k1, k2, k3, k4 = jax.random.split(key, 4)
    return dict(
        w1=0.1 * jax.random.normal(k1, (3, 3, in_channels, out_channels), jnp.float32),
        b1=0.1 * jax.random.normal(k2, (out_channels,), jnp.float32),
        g1=jnp.ones((out_channels,), jnp.float32),
        be1=jnp.zeros((out_channels,), jnp.float32),
        w2=0.1 * jax.random.normal(k3, (3, 3, out_channels, out_channels), jnp.float32),
        b2=0.1 * jax.random.normal(k4, (out_channels,), jnp.float32),
        g2=jnp.ones((out_channels,), jnp.float32),
        be2=jnp.zeros((out_channels,), jnp.float32),
    )


# ----------------------------- pure-JAX reference -----------------------------
def reference(x_nchw, p):
    x = lax.reduce_window(x_nchw, -jnp.inf, lax.max, (1, 1, 2, 2), (1, 1, 2, 2), "VALID")

    def conv(x, w, b):
        out = lax.conv_general_dilated(x, w, (1, 1), ((1, 1), (1, 1)),
                                       dimension_numbers=("NCHW", "HWIO", "NCHW"))
        return out + b[None, :, None, None]

    def bn_relu(x, gamma, beta):
        mean = jnp.mean(x, axis=(0, 2, 3), keepdims=True)
        var = jnp.var(x, axis=(0, 2, 3), keepdims=True)
        y = (x - mean) / jnp.sqrt(var + EPS)
        y = y * gamma[None, :, None, None] + beta[None, :, None, None]
        return jnp.maximum(y, 0.0)

    y = conv(x, p["w1"], p["b1"])
    y = bn_relu(y, p["g1"], p["be1"])
    y = conv(y, p["w2"], p["b2"])
    y = bn_relu(y, p["g2"], p["be2"])
    return y


if __name__ == "__main__":
    key = jax.random.PRNGKey(0)
    kx, kp = jax.random.split(key)
    N, C_in, C_out, H, W = 2, 4, 8, 16, 16
    x = jax.random.normal(kx, (N, C_in, H, W), jnp.float32)
    params = init_params(kp, C_in, C_out)

    fwd = jax.jit(maxpool_double_conv)
    out = fwd(x, params)
    out = jax.block_until_ready(out)

    ref = reference(x, params)
    assert out.shape == (N, C_out, H // 2, W // 2), out.shape
    assert jnp.allclose(out, ref, atol=2e-3, rtol=2e-3), float(jnp.max(jnp.abs(out - ref)))

    print("KERNEL_OK")
</pallas_src>

<mosaic_0001>
module attributes {stable_mosaic.version = 11 : i64} {
  func.func @_fused_kernel(%arg0: i32, %arg1: memref<2x16x8x8xf32, #tpu.memory_space<vmem>>, %arg2: memref<36x8xf32, #tpu.memory_space<vmem>>, %arg3: memref<1x8xf32, #tpu.memory_space<vmem>>, %arg4: memref<1x8xf32, #tpu.memory_space<vmem>>, %arg5: memref<1x8xf32, #tpu.memory_space<vmem>>, %arg6: memref<8x72xf32, #tpu.memory_space<vmem>>, %arg7: memref<8x1xf32, #tpu.memory_space<vmem>>, %arg8: memref<8x1xf32, #tpu.memory_space<vmem>>, %arg9: memref<8x1xf32, #tpu.memory_space<vmem>>, %arg10: memref<8x128xf32, #tpu.memory_space<vmem>>, %arg11: memref<2x10x10x4xf32, #tpu.memory_space<vmem>>, %arg12: memref<2x10x10x8xf32, #tpu.memory_space<vmem>>, %arg13: memref<128x36xf32, #tpu.memory_space<vmem>>, %arg14: memref<128x72xf32, #tpu.memory_space<vmem>>) attributes {dimension_semantics = [#tpu.dimension_semantics<arbitrary>], iteration_bounds = array<i64: 1>, scalar_prefetch = 0 : i64, scratch_operands = 4 : i64, tpu.core_type = #tpu.core_type<tc>, window_params = [{pipeline_mode = #tpu.pipeline_mode<synchronous>, transform_indices = @transform_0, window_bounds = array<i64: 2, 16, 8, 8>}, {pipeline_mode = #tpu.pipeline_mode<synchronous>, transform_indices = @transform_1, window_bounds = array<i64: 36, 8>}, {pipeline_mode = #tpu.pipeline_mode<synchronous>, transform_indices = @transform_2, window_bounds = array<i64: 1, 8>}, {pipeline_mode = #tpu.pipeline_mode<synchronous>, transform_indices = @transform_3, window_bounds = array<i64: 1, 8>}, {pipeline_mode = #tpu.pipeline_mode<synchronous>, transform_indices = @transform_4, window_bounds = array<i64: 1, 8>}, {pipeline_mode = #tpu.pipeline_mode<synchronous>, transform_indices = @transform_5, window_bounds = array<i64: 8, 72>}, {pipeline_mode = #tpu.pipeline_mode<synchronous>, transform_indices = @transform_6, window_bounds = array<i64: 8, 1>}, {pipeline_mode = #tpu.pipeline_mode<synchronous>, transform_indices = @transform_7, window_bounds = array<i64: 8, 1>}, {pipeline_mode = #tpu.pipeline_mode<synchronous>, transform_indices = @transform_8, window_bounds = array<i64: 8, 1>}, {pipeline_mode = #tpu.pipeline_mode<synchronous>, transform_indices = @transform_9, window_bounds = array<i64: 8, 128>}]} {
    %c0 = arith.constant 0 : index
    %c0_0 = arith.constant 0 : index
    %c0_1 = arith.constant 0 : index
    %c0_2 = arith.constant 0 : index
    %0 = vector.load %arg1[%c0, %c0_0, %c0_1, %c0_2] : memref<2x16x8x8xf32, #tpu.memory_space<vmem>>, vector<2x16x8x8xf32>
    %1 = vector.extract_strided_slice %0 {offsets = [0, 0, 0, 0], sizes = [2, 16, 8, 4], strides = [1, 1, 1, 1]} : vector<2x16x8x8xf32> to vector<2x16x8x4xf32>
    %2 = vector.extract_strided_slice %0 {offsets = [0, 0, 0, 4], sizes = [2, 16, 8, 4], strides = [1, 1, 1, 1]} : vector<2x16x8x8xf32> to vector<2x16x8x4xf32>
    %3 = arith.maximumf %1, %2 : vector<2x16x8x4xf32>
    %4 = vector.shape_cast %3 : vector<2x16x8x4xf32> to vector<2x8x2x8x4xf32>
    %5 = vector.extract_strided_slice %4 {offsets = [0, 0, 0, 0, 0], sizes = [2, 8, 1, 8, 4], strides = [1, 1, 1, 1, 1]} : vector<2x8x2x8x4xf32> to vector<2x8x1x8x4xf32>
    %6 = vector.shape_cast %5 : vector<2x8x1x8x4xf32> to vector<2x8x8x4xf32>
    %7 = vector.extract_strided_slice %4 {offsets = [0, 0, 1, 0, 0], sizes = [2, 8, 1, 8, 4], strides = [1, 1, 1, 1, 1]} : vector<2x8x2x8x4xf32> to vector<2x8x1x8x4xf32>
    %8 = vector.shape_cast %7 : vector<2x8x1x8x4xf32> to vector<2x8x8x4xf32>
    %9 = arith.maximumf %6, %8 : vector<2x8x8x4xf32>
    %cst = arith.constant 0.000000e+00 : f32
    %10 = vector.broadcast %cst : f32 to vector<2x10x10x4xf32>
    %c0_3 = arith.constant 0 : index
    %c0_4 = arith.constant 0 : index
    %c0_5 = arith.constant 0 : index
    %c0_6 = arith.constant 0 : index
    %11 = vector.load %arg11[%c0_3, %c0_4, %c0_5, %c0_6] : memref<2x10x10x4xf32, #tpu.memory_space<vmem>>, vector<2x10x10x4xf32>
    tpu.vector_store %arg11[%c0_3, %c0_4, %c0_5, %c0_6], %10 {strides = array<i32>} : memref<2x10x10x4xf32, #tpu.memory_space<vmem>>, vector<2x10x10x4xf32>,
    %c0_7 = arith.constant 0 : index
    %c1 = arith.constant 1 : index
    %c1_8 = arith.constant 1 : index
    %c0_9 = arith.constant 0 : index
    %12 = vector.load %arg11[%c0_7, %c1, %c1_8, %c0_9] : memref<2x10x10x4xf32, #tpu.memory_space<vmem>>, vector<2x8x8x4xf32>
    tpu.vector_store %arg11[%c0_7, %c1, %c1_8, %c0_9], %9 {strides = array<i32>} : memref<2x10x10x4xf32, #tpu.memory_space<vmem>>, vector<2x8x8x4xf32>,
    %c0_10 = arith.constant 0 : index
    %c0_11 = arith.constant 0 : index
    %c0_12 = arith.constant 0 : index
    %c0_13 = arith.constant 0 : index
    %13 = vector.load %arg11[%c0_10, %c0_11, %c0_12, %c0_13] : memref<2x10x10x4xf32, #tpu.memory_space<vmem>>, vector<2x10x10x4xf32>
    %14 = vector.extract_strided_slice %13 {offsets = [0, 0, 0, 0], sizes = [2, 8, 8, 4], strides = [1, 1, 1, 1]} : vector<2x10x10x4xf32> to vector<2x8x8x4xf32>
    %15 = vector.shape_cast %14 : vector<2x8x8x4xf32> to vector<128x4xf32>
    %c0_14 = arith.constant 0 : index
    %c0_15 = arith.constant 0 : index
    %16 = vector.load %arg13[%c0_14, %c0_15] : memref<128x36xf32, #tpu.memory_space<vmem>>, vector<128x4xf32>
    tpu.vector_store %arg13[%c0_14, %c0_15], %15 {strides = array<i32>} : memref<128x36xf32, #tpu.memory_space<vmem>>, vector<128x4xf32>,
    %17 = vector.extract_strided_slice %13 {offsets = [0, 0, 1, 0], sizes = [2, 8, 8, 4], strides = [1, 1, 1, 1]} : vector<2x10x10x4xf32> to vector<2x8x8x4xf32>
    %18 = vector.shape_cast %17 : vector<2x8x8x4xf32> to vector<128x4xf32>
    %c0_16 = arith.constant 0 : index
    %c4 = arith.constant 4 : index
    %19 = vector.load %arg13[%c0_16, %c4] : memref<128x36xf32, #tpu.memory_space<vmem>>, vector<128x4xf32>
    tpu.vector_store %arg13[%c0_16, %c4], %18 {strides = array<i32>} : memref<128x36xf32, #tpu.memory_space<vmem>>, vector<128x4xf32>,
    %20 = vector.extract_strided_slice %13 {offsets = [0, 0, 2, 0], sizes = [2, 8, 8, 4], strides = [1, 1, 1, 1]} : vector<2x10x10x4xf32> to vector<2x8x8x4xf32>
    %21 = vector.shape_cast %20 : vector<2x8x8x4xf32> to vector<128x4xf32>
    %c0_17 = arith.constant 0 : index
    %c8 = arith.constant 8 : index
    %22 = vector.load %arg13[%c0_17, %c8] : memref<128x36xf32, #tpu.memory_space<vmem>>, vector<128x4xf32>
    tpu.vector_store %arg13[%c0_17, %c8], %21 {strides = array<i32>} : memref<128x36xf32, #tpu.memory_space<vmem>>, vector<128x4xf32>,
    %23 = vector.extract_strided_slice %13 {offsets = [0, 1, 0, 0], sizes = [2, 8, 8, 4], strides = [1, 1, 1, 1]} : vector<2x10x10x4xf32> to vector<2x8x8x4xf32>
    %24 = vector.shape_cast %23 : vector<2x8x8x4xf32> to vector<128x4xf32>
    %c0_18 = arith.constant 0 : index
    %c12 = arith.constant 12 : index
    %25 = vector.load %arg13[%c0_18, %c12] : memref<128x36xf32, #tpu.memory_space<vmem>>, vector<128x4xf32>
    tpu.vector_store %arg13[%c0_18, %c12], %24 {strides = array<i32>} : memref<128x36xf32, #tpu.memory_space<vmem>>, vector<128x4xf32>,
    %26 = vector.extract_strided_slice %13 {offsets = [0, 1, 1, 0], sizes = [2, 8, 8, 4], strides = [1, 1, 1, 1]} : vector<2x10x10x4xf32> to vector<2x8x8x4xf32>
    %27 = vector.shape_cast %26 : vector<2x8x8x4xf32> to vector<128x4xf32>
    %c0_19 = arith.constant 0 : index
    %c16 = arith.constant 16 : index
    %28 = vector.load %arg13[%c0_19, %c16] : memref<128x36xf32, #tpu.memory_space<vmem>>, vector<128x4xf32>
    tpu.vector_store %arg13[%c0_19, %c16], %27 {strides = array<i32>} : memref<128x36xf32, #tpu.memory_space<vmem>>, vector<128x4xf32>,
    %29 = vector.extract_strided_slice %13 {offsets = [0, 1, 2, 0], sizes = [2, 8, 8, 4], strides = [1, 1, 1, 1]} : vector<2x10x10x4xf32> to vector<2x8x8x4xf32>
    %30 = vector.shape_cast %29 : vector<2x8x8x4xf32> to vector<128x4xf32>
    %c0_20 = arith.constant 0 : index
    %c20 = arith.constant 20 : index
    %31 = vector.load %arg13[%c0_20, %c20] : memref<128x36xf32, #tpu.memory_space<vmem>>, vector<128x4xf32>
    tpu.vector_store %arg13[%c0_20, %c20], %30 {strides = array<i32>} : memref<128x36xf32, #tpu.memory_space<vmem>>, vector<128x4xf32>,
    %32 = vector.extract_strided_slice %13 {offsets = [0, 2, 0, 0], sizes = [2, 8, 8, 4], strides = [1, 1, 1, 1]} : vector<2x10x10x4xf32> to vector<2x8x8x4xf32>
    %33 = vector.shape_cast %32 : vector<2x8x8x4xf32> to vector<128x4xf32>
    %c0_21 = arith.constant 0 : index
    %c24 = arith.constant 24 : index
    %34 = vector.load %arg13[%c0_21, %c24] : memref<128x36xf32, #tpu.memory_space<vmem>>, vector<128x4xf32>
    tpu.vector_store %arg13[%c0_21, %c24], %33 {strides = array<i32>} : memref<128x36xf32, #tpu.memory_space<vmem>>, vector<128x4xf32>,
    %35 = vector.extract_strided_slice %13 {offsets = [0, 2, 1, 0], sizes = [2, 8, 8, 4], strides = [1, 1, 1, 1]} : vector<2x10x10x4xf32> to vector<2x8x8x4xf32>
    %36 = vector.shape_cast %35 : vector<2x8x8x4xf32> to vector<128x4xf32>
    %c0_22 = arith.constant 0 : index
    %c28 = arith.constant 28 : index
    %37 = vector.load %arg13[%c0_22, %c28] : memref<128x36xf32, #tpu.memory_space<vmem>>, vector<128x4xf32>
    tpu.vector_store %arg13[%c0_22, %c28], %36 {strides = array<i32>} : memref<128x36xf32, #tpu.memory_space<vmem>>, vector<128x4xf32>,
    %38 = vector.extract_strided_slice %13 {offsets = [0, 2, 2, 0], sizes = [2, 8, 8, 4], strides = [1, 1, 1, 1]} : vector<2x10x10x4xf32> to vector<2x8x8x4xf32>
    %39 = vector.shape_cast %38 : vector<2x8x8x4xf32> to vector<128x4xf32>
    %c0_23 = arith.constant 0 : index
    %c32 = arith.constant 32 : index
    %40 = vector.load %arg13[%c0_23, %c32] : memref<128x36xf32, #tpu.memory_space<vmem>>, vector<128x4xf32>
    tpu.vector_store %arg13[%c0_23, %c32], %39 {strides = array<i32>} : memref<128x36xf32, #tpu.memory_space<vmem>>, vector<128x4xf32>,
    %c0_24 = arith.constant 0 : index
    %c0_25 = arith.constant 0 : index
    %41 = vector.load %arg13[%c0_24, %c0_25] : memref<128x36xf32, #tpu.memory_space<vmem>>, vector<128x36xf32>
    %c0_26 = arith.constant 0 : index
    %c0_27 = arith.constant 0 : index
    %42 = vector.load %arg2[%c0_26, %c0_27] : memref<36x8xf32, #tpu.memory_space<vmem>>, vector<36x8xf32>
    %cst_28 = arith.constant dense<0.000000e+00> : vector<128x8xf32>
    %43 = tpu.matmul %41, %42, %cst_28 {dimension_numbers = #tpu.dot_dimension_numbers<[1], [0], [0], [1], [0, 0, 1, 1], [], []>} : vector<128x36xf32>, vector<36x8xf32>, vector<128x8xf32> -> vector<128x8xf32>
    %c0_29 = arith.constant 0 : index
    %c0_30 = arith.constant 0 : index
    %44 = vector.load %arg3[%c0_29, %c0_30] : memref<1x8xf32, #tpu.memory_space<vmem>>, vector<1x8xf32>
    %45 = vector.broadcast %44 : vector<1x8xf32> to vector<128x8xf32>
    %46 = arith.addf %43, %45 : vector<128x8xf32>
    %cst_31 = arith.constant dense<0.000000e+00> : vector<8xf32>
    %47 = vector.multi_reduction <add>, %46, %cst_31 [0] : vector<128x8xf32> to vector<8xf32>
    %48 = vector.shape_cast %47 : vector<8xf32> to vector<1x8xf32>
    %49 = arith.mulf %46, %46 : vector<128x8xf32>
    %cst_32 = arith.constant dense<0.000000e+00> : vector<8xf32>
    %50 = vector.multi_reduction <add>, %49, %cst_32 [0] : vector<128x8xf32> to vector<8xf32>
    %51 = vector.shape_cast %50 : vector<8xf32> to vector<1x8xf32>
    %cst_33 = arith.constant 7.812500e-03 : f32
    %52 = vector.broadcast %cst_33 : f32 to vector<1x8xf32>
    %53 = arith.mulf %48, %52 : vector<1x8xf32>
    %cst_34 = arith.constant 7.812500e-03 : f32
    %54 = vector.broadcast %cst_34 : f32 to vector<1x8xf32>
    %55 = arith.mulf %51, %54 : vector<1x8xf32>
    %56 = arith.mulf %53, %53 : vector<1x8xf32>
    %57 = arith.subf %55, %56 : vector<1x8xf32>
    %cst_35 = arith.constant 0.000000e+00 : f32
    %58 = vector.broadcast %cst_35 : f32 to vector<1x8xf32>
    %59 = arith.maximumf %57, %58 : vector<1x8xf32>
    %c0_36 = arith.constant 0 : index
    %c0_37 = arith.constant 0 : index
    %60 = vector.load %arg4[%c0_36, %c0_37] : memref<1x8xf32, #tpu.memory_space<vmem>>, vector<1x8xf32>
    %cst_38 = arith.constant 9.99999974E-6 : f32
    %61 = vector.broadcast %cst_38 : f32 to vector<1x8xf32>
    %62 = arith.addf %59, %61 : vector<1x8xf32>
    %63 = math.rsqrt %62 : vector<1x8xf32>
    %64 = arith.mulf %60, %63 : vector<1x8xf32>
    %c0_39 = arith.constant 0 : index
    %c0_40 = arith.constant 0 : index
    %65 = vector.load %arg5[%c0_39, %c0_40] : memref<1x8xf32, #tpu.memory_space<vmem>>, vector<1x8xf32>
    %66 = arith.mulf %53, %64 : vector<1x8xf32>
    %67 = arith.subf %65, %66 : vector<1x8xf32>
    %68 = vector.broadcast %64 : vector<1x8xf32> to vector<128x8xf32>
    %69 = arith.mulf %46, %68 : vector<128x8xf32>
    %70 = vector.broadcast %67 : vector<1x8xf32> to vector<128x8xf32>
    %71 = arith.addf %69, %70 : vector<128x8xf32>
    %cst_41 = arith.constant 0.000000e+00 : f32
    %72 = vector.broadcast %cst_41 : f32 to vector<128x8xf32>
    %73 = arith.maximumf %71, %72 : vector<128x8xf32>
    %cst_42 = arith.constant 0.000000e+00 : f32
    %74 = vector.broadcast %cst_42 : f32 to vector<2x10x10x8xf32>
    %c0_43 = arith.constant 0 : index
    %c0_44 = arith.constant 0 : index
    %c0_45 = arith.constant 0 : index
    %c0_46 = arith.constant 0 : index
    %75 = vector.load %arg12[%c0_43, %c0_44, %c0_45, %c0_46] : memref<2x10x10x8xf32, #tpu.memory_space<vmem>>, vector<2x10x10x8xf32>
    tpu.vector_store %arg12[%c0_43, %c0_44, %c0_45, %c0_46], %74 {strides = array<i32>} : memref<2x10x10x8xf32, #tpu.memory_space<vmem>>, vector<2x10x10x8xf32>,
    %76 = vector.shape_cast %73 : vector<128x8xf32> to vector<2x8x8x8xf32>
    %c0_47 = arith.constant 0 : index
    %c1_48 = arith.constant 1 : index
    %c1_49 = arith.constant 1 : index
    %c0_50 = arith.constant 0 : index
    %77 = vector.load %arg12[%c0_47, %c1_48, %c1_49, %c0_50] : memref<2x10x10x8xf32, #tpu.memory_space<vmem>>, vector<2x8x8x8xf32>
    tpu.vector_store %arg12[%c0_47, %c1_48, %c1_49, %c0_50], %76 {strides = array<i32>} : memref<2x10x10x8xf32, #tpu.memory_space<vmem>>, vector<2x8x8x8xf32>,
    %c0_51 = arith.constant 0 : index
    %c0_52 = arith.constant 0 : index
    %c0_53 = arith.constant 0 : index
    %c0_54 = arith.constant 0 : index
    %78 = vector.load %arg12[%c0_51, %c0_52, %c0_53, %c0_54] : memref<2x10x10x8xf32, #tpu.memory_space<vmem>>, vector<2x10x10x8xf32>
    %79 = vector.extract_strided_slice %78 {offsets = [0, 0, 0, 0], sizes = [2, 8, 8, 8], strides = [1, 1, 1, 1]} : vector<2x10x10x8xf32> to vector<2x8x8x8xf32>
    %80 = vector.shape_cast %79 : vector<2x8x8x8xf32> to vector<128x8xf32>
    %c0_55 = arith.constant 0 : index
    %c0_56 = arith.constant 0 : index
    %81 = vector.load %arg14[%c0_55, %c0_56] : memref<128x72xf32, #tpu.memory_space<vmem>>, vector<128x8xf32>
    tpu.vector_store %arg14[%c0_55, %c0_56], %80 {strides = array<i32>} : memref<128x72xf32, #tpu.memory_space<vmem>>, vector<128x8xf32>,
    %82 = vector.extract_strided_slice %78 {offsets = [0, 0, 1, 0], sizes = [2, 8, 8, 8], strides = [1, 1, 1, 1]} : vector<2x10x10x8xf32> to vector<2x8x8x8xf32>
    %83 = vector.shape_cast %82 : vector<2x8x8x8xf32> to vector<128x8xf32>
    %c0_57 = arith.constant 0 : index
    %c8_58 = arith.constant 8 : index
    %84 = vector.load %arg14[%c0_57, %c8_58] : memref<128x72xf32, #tpu.memory_space<vmem>>, vector<128x8xf32>
    tpu.vector_store %arg14[%c0_57, %c8_58], %83 {strides = array<i32>} : memref<128x72xf32, #tpu.memory_space<vmem>>, vector<128x8xf32>,
    %85 = vector.extract_strided_slice %78 {offsets = [0, 0, 2, 0], sizes = [2, 8, 8, 8], strides = [1, 1, 1, 1]} : vector<2x10x10x8xf32> to vector<2x8x8x8xf32>
    %86 = vector.shape_cast %85 : vector<2x8x8x8xf32> to vector<128x8xf32>
    %c0_59 = arith.constant 0 : index
    %c16_60 = arith.constant 16 : index
    %87 = vector.load %arg14[%c0_59, %c16_60] : memref<128x72xf32, #tpu.memory_space<vmem>>, vector<128x8xf32>
    tpu.vector_store %arg14[%c0_59, %c16_60], %86 {strides = array<i32>} : memref<128x72xf32, #tpu.memory_space<vmem>>, vector<128x8xf32>,
    %88 = vector.extract_strided_slice %78 {offsets = [0, 1, 0, 0], sizes = [2, 8, 8, 8], strides = [1, 1, 1, 1]} : vector<2x10x10x8xf32> to vector<2x8x8x8xf32>
    %89 = vector.shape_cast %88 : vector<2x8x8x8xf32> to vector<128x8xf32>
    %c0_61 = arith.constant 0 : index
    %c24_62 = arith.constant 24 : index
    %90 = vector.load %arg14[%c0_61, %c24_62] : memref<128x72xf32, #tpu.memory_space<vmem>>, vector<128x8xf32>
    tpu.vector_store %arg14[%c0_61, %c24_62], %89 {strides = array<i32>} : memref<128x72xf32, #tpu.memory_space<vmem>>, vector<128x8xf32>,
    %91 = vector.extract_strided_slice %78 {offsets = [0, 1, 1, 0], sizes = [2, 8, 8, 8], strides = [1, 1, 1, 1]} : vector<2x10x10x8xf32> to vector<2x8x8x8xf32>
    %92 = vector.shape_cast %91 : vector<2x8x8x8xf32> to vector<128x8xf32>
    %c0_63 = arith.constant 0 : index
    %c32_64 = arith.constant 32 : index
    %93 = vector.load %arg14[%c0_63, %c32_64] : memref<128x72xf32, #tpu.memory_space<vmem>>, vector<128x8xf32>
    tpu.vector_store %arg14[%c0_63, %c32_64], %92 {strides = array<i32>} : memref<128x72xf32, #tpu.memory_space<vmem>>, vector<128x8xf32>,
    %94 = vector.extract_strided_slice %78 {offsets = [0, 1, 2, 0], sizes = [2, 8, 8, 8], strides = [1, 1, 1, 1]} : vector<2x10x10x8xf32> to vector<2x8x8x8xf32>
    %95 = vector.shape_cast %94 : vector<2x8x8x8xf32> to vector<128x8xf32>
    %c0_65 = arith.constant 0 : index
    %c40 = arith.constant 40 : index
    %96 = vector.load %arg14[%c0_65, %c40] : memref<128x72xf32, #tpu.memory_space<vmem>>, vector<128x8xf32>
    tpu.vector_store %arg14[%c0_65, %c40], %95 {strides = array<i32>} : memref<128x72xf32, #tpu.memory_space<vmem>>, vector<128x8xf32>,
    %97 = vector.extract_strided_slice %78 {offsets = [0, 2, 0, 0], sizes = [2, 8, 8, 8], strides = [1, 1, 1, 1]} : vector<2x10x10x8xf32> to vector<2x8x8x8xf32>
    %98 = vector.shape_cast %97 : vector<2x8x8x8xf32> to vector<128x8xf32>
    %c0_66 = arith.constant 0 : index
    %c48 = arith.constant 48 : index
    %99 = vector.load %arg14[%c0_66, %c48] : memref<128x72xf32, #tpu.memory_space<vmem>>, vector<128x8xf32>
    tpu.vector_store %arg14[%c0_66, %c48], %98 {strides = array<i32>} : memref<128x72xf32, #tpu.memory_space<vmem>>, vector<128x8xf32>,
    %100 = vector.extract_strided_slice %78 {offsets = [0, 2, 1, 0], sizes = [2, 8, 8, 8], strides = [1, 1, 1, 1]} : vector<2x10x10x8xf32> to vector<2x8x8x8xf32>
    %101 = vector.shape_cast %100 : vector<2x8x8x8xf32> to vector<128x8xf32>
    %c0_67 = arith.constant 0 : index
    %c56 = arith.constant 56 : index
    %102 = vector.load %arg14[%c0_67, %c56] : memref<128x72xf32, #tpu.memory_space<vmem>>, vector<128x8xf32>
    tpu.vector_store %arg14[%c0_67, %c56], %101 {strides = array<i32>} : memref<128x72xf32, #tpu.memory_space<vmem>>, vector<128x8xf32>,
    %103 = vector.extract_strided_slice %78 {offsets = [0, 2, 2, 0], sizes = [2, 8, 8, 8], strides = [1, 1, 1, 1]} : vector<2x10x10x8xf32> to vector<2x8x8x8xf32>
    %104 = vector.shape_cast %103 : vector<2x8x8x8xf32> to vector<128x8xf32>
    %c0_68 = arith.constant 0 : index
    %c64 = arith.constant 64 : index
    %105 = vector.load %arg14[%c0_68, %c64] : memref<128x72xf32, #tpu.memory_space<vmem>>, vector<128x8xf32>
    tpu.vector_store %arg14[%c0_68, %c64], %104 {strides = array<i32>} : memref<128x72xf32, #tpu.memory_space<vmem>>, vector<128x8xf32>,
    %c0_69 = arith.constant 0 : index
    %c0_70 = arith.constant 0 : index
    %106 = vector.load %arg6[%c0_69, %c0_70] : memref<8x72xf32, #tpu.memory_space<vmem>>, vector<8x72xf32>
    %c0_71 = arith.constant 0 : index
    %c0_72 = arith.constant 0 : index
    %107 = vector.load %arg14[%c0_71, %c0_72] : memref<128x72xf32, #tpu.memory_space<vmem>>, vector<128x72xf32>
    %cst_73 = arith.constant dense<0.000000e+00> : vector<8x128xf32>
    %108 = tpu.matmul %106, %107, %cst_73 {dimension_numbers = #tpu.dot_dimension_numbers<[1], [1], [0], [0], [0, 0, 1, 0], [], []>} : vector<8x72xf32>, vector<128x72xf32>, vector<8x128xf32> -> vector<8x128xf32>
    %c0_74 = arith.constant 0 : index
    %c0_75 = arith.constant 0 : index
    %109 = vector.load %arg7[%c0_74, %c0_75] : memref<8x1xf32, #tpu.memory_space<vmem>>, vector<8x1xf32>
    %110 = vector.broadcast %109 : vector<8x1xf32> to vector<8x128xf32>
    %111 = arith.addf %108, %110 : vector<8x128xf32>
    %cst_76 = arith.constant dense<0.000000e+00> : vector<8xf32>
    %112 = vector.multi_reduction <add>, %111, %cst_76 [1] : vector<8x128xf32> to vector<8xf32>
    %113 = vector.shape_cast %112 : vector<8xf32> to vector<8x1xf32>
    %114 = arith.mulf %111, %111 : vector<8x128xf32>
    %cst_77 = arith.constant dense<0.000000e+00> : vector<8xf32>
    %115 = vector.multi_reduction <add>, %114, %cst_77 [1] : vector<8x128xf32> to vector<8xf32>
    %116 = vector.shape_cast %115 : vector<8xf32> to vector<8x1xf32>
    %cst_78 = arith.constant 7.812500e-03 : f32
    %117 = vector.broadcast %cst_78 : f32 to vector<8x1xf32>
    %118 = arith.mulf %113, %117 : vector<8x1xf32>
    %cst_79 = arith.constant 7.812500e-03 : f32
    %119 = vector.broadcast %cst_79 : f32 to vector<8x1xf32>
    %120 = arith.mulf %116, %119 : vector<8x1xf32>
    %121 = arith.mulf %118, %118 : vector<8x1xf32>
    %122 = arith.subf %120, %121 : vector<8x1xf32>
    %cst_80 = arith.constant 0.000000e+00 : f32
    %123 = vector.broadcast %cst_80 : f32 to vector<8x1xf32>
    %124 = arith.maximumf %122, %123 : vector<8x1xf32>
    %c0_81 = arith.constant 0 : index
    %c0_82 = arith.constant 0 : index
    %125 = vector.load %arg8[%c0_81, %c0_82] : memref<8x1xf32, #tpu.memory_space<vmem>>, vector<8x1xf32>
    %cst_83 = arith.constant 9.99999974E-6 : f32
    %126 = vector.broadcast %cst_83 : f32 to vector<8x1xf32>
    %127 = arith.addf %124, %126 : vector<8x1xf32>
    %128 = math.rsqrt %127 : vector<8x1xf32>
    %129 = arith.mulf %125, %128 : vector<8x1xf32>
    %c0_84 = arith.constant 0 : index
    %c0_85 = arith.constant 0 : index
    %130 = vector.load %arg9[%c0_84, %c0_85] : memref<8x1xf32, #tpu.memory_space<vmem>>, vector<8x1xf32>
    %131 = arith.mulf %118, %129 : vector<8x1xf32>
    %132 = arith.subf %130, %131 : vector<8x1xf32>
    %133 = vector.broadcast %129 : vector<8x1xf32> to vector<8x128xf32>
    %134 = arith.mulf %111, %133 : vector<8x128xf32>
    %135 = vector.broadcast %132 : vector<8x1xf32> to vector<8x128xf32>
    %136 = arith.addf %134, %135 : vector<8x128xf32>
    %cst_86 = arith.constant 0.000000e+00 : f32
    %137 = vector.broadcast %cst_86 : f32 to vector<8x128xf32>
    %138 = arith.maximumf %136, %137 : vector<8x128xf32>
    %c0_87 = arith.constant 0 : index
    %c0_88 = arith.constant 0 : index
    %139 = vector.load %arg10[%c0_87, %c0_88] : memref<8x128xf32, #tpu.memory_space<vmem>>, vector<8x128xf32>
    tpu.vector_store %arg10[%c0_87, %c0_88], %138 {strides = array<i32>} : memref<8x128xf32, #tpu.memory_space<vmem>>, vector<8x128xf32>,
    return
  }
  func.func @transform_0(%arg0: i32) -> (i32, i32, i32, i32) {
    %c0_i32 = arith.constant 0 : i32
    %c0_i32_0 = arith.constant 0 : i32
    %c0_i32_1 = arith.constant 0 : i32
    %c0_i32_2 = arith.constant 0 : i32
    %c0_i32_3 = arith.constant 0 : i32
    return %c0_i32, %c0_i32_0, %c0_i32_1, %c0_i32_2 : i32, i32, i32, i32
  }
  func.func @transform_1(%arg0: i32) -> (i32, i32) {
    %c0_i32 = arith.constant 0 : i32
    %c0_i32_0 = arith.constant 0 : i32
    %c0_i32_1 = arith.constant 0 : i32
    return %c0_i32, %c0_i32_0 : i32, i32
  }
  func.func @transform_2(%arg0: i32) -> (i32, i32) {
    %c0_i32 = arith.constant 0 : i32
    %c0_i32_0 = arith.constant 0 : i32
    %c0_i32_1 = arith.constant 0 : i32
    return %c0_i32, %c0_i32_0 : i32, i32
  }
  func.func @transform_3(%arg0: i32) -> (i32, i32) {
    %c0_i32 = arith.constant 0 : i32
    %c0_i32_0 = arith.constant 0 : i32
    %c0_i32_1 = arith.constant 0 : i32
    return %c0_i32, %c0_i32_0 : i32, i32
  }
  func.func @transform_4(%arg0: i32) -> (i32, i32) {
    %c0_i32 = arith.constant 0 : i32
    %c0_i32_0 = arith.constant 0 : i32
    %c0_i32_1 = arith.constant 0 : i32
    return %c0_i32, %c0_i32_0 : i32, i32
  }
  func.func @transform_5(%arg0: i32) -> (i32, i32) {
    %c0_i32 = arith.constant 0 : i32
    %c0_i32_0 = arith.constant 0 : i32
    %c0_i32_1 = arith.constant 0 : i32
    return %c0_i32, %c0_i32_0 : i32, i32
  }
  func.func @transform_6(%arg0: i32) -> (i32, i32) {
    %c0_i32 = arith.constant 0 : i32
    %c0_i32_0 = arith.constant 0 : i32
    %c0_i32_1 = arith.constant 0 : i32
    return %c0_i32, %c0_i32_0 : i32, i32
  }
  func.func @transform_7(%arg0: i32) -> (i32, i32) {
    %c0_i32 = arith.constant 0 : i32
    %c0_i32_0 = arith.constant 0 : i32
    %c0_i32_1 = arith.constant 0 : i32
    return %c0_i32, %c0_i32_0 : i32, i32
  }
  func.func @transform_8(%arg0: i32) -> (i32, i32) {
    %c0_i32 = arith.constant 0 : i32
    %c0_i32_0 = arith.constant 0 : i32
    %c0_i32_1 = arith.constant 0 : i32
    return %c0_i32, %c0_i32_0 : i32, i32
  }
  func.func @transform_9(%arg0: i32) -> (i32, i32) {
    %c0_i32 = arith.constant 0 : i32
    %c0_i32_0 = arith.constant 0 : i32
    %c0_i32_1 = arith.constant 0 : i32
    return %c0_i32, %c0_i32_0 : i32, i32
  }
}

</mosaic_0001>

<bundles_post_ra>
// kernel: maxpool_double_conv.1
= control target key start
LH: loop header
LB: loop body
LE: loop exit
PB: predicated region body
PF: predicated region fallthrough
CT: control target
= control target key end

     0   :  { %s2344_s13 = smov 124   ;;  %vm240_vm0 = vcmask 31744   ;;  %vm242_vm1 = vcmask 25600   ;;  %v2345_v30 = vmov 0.0   ;;  %vm387_vm2 = vcmask 1046528   ;;  %s2348_s14 = smov 12   ;;  %s4337_s0 = inlined_call_operand.vmem [shape: f32[2,16,8,8], index: 0, kind: input, shape index: {}]   ;;  %s4338_s1 = inlined_call_operand.vmem [shape: f32[36,8], index: 1, kind: input, shape index: {}]   ;;  %s4339_s2 = inlined_call_operand.vmem [shape: f32[1,8], index: 2, kind: input, shape index: {}]   ;;  %s4340_s3 = inlined_call_operand.vmem [shape: f32[1,8], index: 3, kind: input, shape index: {}]   ;;  %s4341_s4 = inlined_call_operand.vmem [shape: f32[1,8], index: 4, kind: input, shape index: {}]   ;;  %s4342_s6 = inlined_call_operand.vmem [shape: f32[8,1], index: 6, kind: input, shape index: {}]   ;;  %s4343_s5 = inlined_call_operand.vmem [shape: f32[8,72], index: 5, kind: input, shape index: {}]   ;;  %s4344_s7 = inlined_call_operand.vmem [shape: f32[8,1], index: 7, kind: input, shape index: {}]   ;;  %s4345_s8 = inlined_call_operand.vmem [shape: f32[8,1], index: 8, kind: input, shape index: {}]   ;;  %s4346_s9 = inlined_call_operand.vmem [shape: f32[8,128], index: 9, kind: output, shape index: {}]  }
   0x1   :  { %v2412_v0 = vld [vmem:[%s4337_s0 + $0x10] sm:$0xff]  ;;  %v2417_v1 = vld [vmem:[%s4337_s0] sm:$0xff]  ;;  %v2433_v3 = vld [vmem:[%s4337_s0 + $0x18] sm:$0xff]  ;;  %248 = vst.msk [vmem:[#allocation2 + $0x30] sm:$0xff] %vm240_vm0, %v2345_v30  ;;  %vm501_vm3 = vcmask 1045504   ;;  %vm484_vm4 = vcmask 64544  }
   0x2   :  { %100 = vrot.lane.b32.xlu1 %v2412_v0, %s2344_s13  ;;  %96 = vrot.lane.b32.xlu0 %v2417_v1, %s2344_s13  ;;  %v2426_v2 = vld [vmem:[%s4337_s0 + $0x20] sm:$0xff]  ;;  %v2438_v4 = vld [vmem:[%s4337_s0 + $0x8] sm:$0xff]  ;;  %249 = vst.msk [vmem:[#allocation2 + $0x38] sm:$0x3] %vm242_vm1, %v2345_v30  ;;  %vm598_vm5 = vcmask 97344   ;;  %s2349_s15 = smov 20  }
   0x3   :  { %104 = vrot.lane.b32.xlu2 %v2426_v2, %s2344_s13  ;;  %v2443_v5 = vld [vmem:[%s4337_s0 + $0x28] sm:$0xff]  ;;  %v2454_v6 = vld [vmem:[%s4337_s0 + $0x38] sm:$0xff]  ;;  %v2459_v7 = vld [vmem:[%s4337_s0 + $0x30] sm:$0xff]  ;;  %241 = vst.msk [vmem:[#allocation2] sm:$0xff] %vm240_vm0, %v2345_v30  ;;  %s2350_s16 = smov 32   ;;  %s2351_s17 = smov 16  }
   0x4   :  { %v2464_v8 = vld [vmem:[%s4337_s0 + $0x40] sm:$0xff]  ;;  %v2475_v9 = vld [vmem:[%s4337_s0 + $0x50] sm:$0xff]  ;;  %v2480_v10 = vld [vmem:[%s4337_s0 + $0x48] sm:$0xff]  ;;  %243 = vst.msk [vmem:[#allocation2 + $0x8] sm:$0x3] %vm242_vm1, %v2345_v30  ;;  %s2352_s18 = smov 28  }
   0x5   :  { %v2485_v11 = vld [vmem:[%s4337_s0 + $0x58] sm:$0xff]  ;;  %v2496_v12 = vld [vmem:[%s4337_s0 + $0x68] sm:$0xff]  ;;  %v2501_v13 = vld [vmem:[%s4337_s0 + $0x60] sm:$0xff]  ;;  %244 = vst.msk [vmem:[#allocation2 + $0x10] sm:$0xff] %vm240_vm0, %v2345_v30  ;;  %s2353_s19 = smov 24   ;;  %vm665_vm6 = vcmask 130144  }
   0x6   :  { %v2506_v14 = vld [vmem:[%s4337_s0 + $0x70] sm:$0xff]  ;;  %v2517_v15 = vld [vmem:[%s4337_s0 + $0x80] sm:$0xff]  ;;  %v2522_v16 = vld [vmem:[%s4337_s0 + $0x78] sm:$0xff]  ;;  %245 = vst.msk [vmem:[#allocation2 + $0x18] sm:$0x3] %vm242_vm1, %v2345_v30  ;;  %vm738_vm7 = vcmask 162944  }
   0x7   :  { %v2527_v17 = vld [vmem:[%s4337_s0 + $0x88] sm:$0xff]  ;;  %v2538_v18 = vld [vmem:[%s4337_s0 + $0x98] sm:$0xff]  ;;  %v2543_v19 = vld [vmem:[%s4337_s0 + $0x90] sm:$0xff]  ;;  %246 = vst.msk [vmem:[#allocation2 + $0x20] sm:$0xff] %vm240_vm0, %v2345_v30  ;;  %vm1111_vm8 = vcmask 1043456   ;;  %vm809_vm9 = vcmask 195744  }
   0x8   :  { %v2548_v20 = vld [vmem:[%s4337_s0 + $0xa0] sm:$0xff]  ;;  %v2559_v21 = vld [vmem:[%s4337_s0 + $0xb0] sm:$0xff]  ;;  %v2564_v22 = vld [vmem:[%s4337_s0 + $0xa8] sm:$0xff]  ;;  %247 = vst.msk [vmem:[#allocation2 + $0x28] sm:$0x3] %vm242_vm1, %v2345_v30  ;;  %vm876_vm10 = vcmask 228544  }
   0x9   :  { %v2569_v23 = vld [vmem:[%s4337_s0 + $0xb8] sm:$0xff]  ;;  %v2580_v24 = vld [vmem:[%s4337_s0 + $0xc8] sm:$0xff]  ;;  %v2585_v25 = vld [vmem:[%s4337_s0 + $0xc0] sm:$0xff]  ;;  %250 = vst.msk [vmem:[#allocation2 + $0x40] sm:$0xff] %vm240_vm0, %v2345_v30  ;;  %vm949_vm11 = vcmask 261344   ;;  %vm1020_vm12 = vcmask 294144  }
   0xa   :  { %102 = vrot.lane.b32.xlu1 %v2433_v3, %s2344_s13  ;;  %98 = vrot.lane.b32.xlu0 %v2438_v4, %s2344_s13  ;;  %v2590_v26 = vld [vmem:[%s4337_s0 + $0xd0] sm:$0xff]  ;;  %v2601_v27 = vld [vmem:[%s4337_s0 + $0xe0] sm:$0xff]  ;;  %251 = vst.msk [vmem:[#allocation2 + $0x48] sm:$0x3] %vm242_vm1, %v2345_v30  ;;  %vm1062_vm13 = vcmask 293888   ;;  %vm1180_vm14 = vcmask 64512  }
   0xb   :  { %106 = vrot.lane.b32.xlu2 %v2443_v5, %s2344_s13  ;;  %v2606_v28 = vld [vmem:[%s4337_s0 + $0xd8] sm:$0xff]  ;;  %v2611_v29 = vld [vmem:[%s4337_s0 + $0xe8] sm:$0xff]  ;;  %v2634_v31 = vld [vmem:[%s4337_s0 + $0xf0] sm:$0xff]  ;;  %252 = vst.msk [vmem:[#allocation2 + $0x50] sm:$0xff] %vm240_vm0, %v2345_v30  ;;  %vm1347_vm15 = vcmask 58368   ;;  %s2355_s10 = smov 56  }
   0xc   :  { %v2647_v33 = vld [vmem:[%s4337_s0 + $0xf8] sm:$0xff]  ;;  %253 = vst.msk [vmem:[#allocation2 + $0x58] sm:$0x3] %vm242_vm1, %v2345_v30  ;;  %v2657_v34 = vld [vmem:[#allocation2] sm:$0xff]  ;;  %v300_v35 = vld [vmem:[#allocation2 + $0x8] sm:$0x3] }
   0xd   :  { %254 = vst.msk [vmem:[#allocation2 + $0x60] sm:$0xff] %vm240_vm0, %v2345_v30  ;;  %v388_v36 = vrot.slane %v2657_v34, 1  ;;  %v389_v37 = vrot.slane %v300_v35, 1  ;;  %v502_v38 = vrot.slane %v2657_v34, 2  ;;  %v503_v39 = vrot.slane %v300_v35, 2  ;;  %s2346_s0 = smov 4  }
   0xe   :  { %255 = vst.msk [vmem:[#allocation2 + $0x68] sm:$0x3] %vm242_vm1, %v2345_v30  ;;  %s2356_s11 = smov 64  }
   0xf   :  { %256 = vst.msk [vmem:[#allocation2 + $0x70] sm:$0xff] %vm240_vm0, %v2345_v30  ;;  %v390_v40 = vsel %vm387_vm2, %v388_v36, %v389_v37  ;;  %v504_v42 = vsel %vm501_vm3, %v502_v38, %v503_v39 }
  0x10   :  { %257 = vst.msk [vmem:[#allocation2 + $0x78] sm:$0x3] %vm242_vm1, %v2345_v30 }
  0x11   :  { %258 = vst.msk [vmem:[#allocation2 + $0x80] sm:$0xff] %vm240_vm0, %v2345_v30 }
  0x12   :  { %110 = vrot.lane.b32.xlu1 %v2454_v6, %s2344_s13  ;;  %108 = vrot.lane.b32.xlu0 %v2459_v7, %s2344_s13  ;;  %259 = vst.msk [vmem:[#allocation2 + $0x88] sm:$0x3] %vm242_vm1, %v2345_v30 }
  0x13   :  { %112 = vrot.lane.b32.xlu2 %v2464_v8, %s2344_s13  ;;  %260 = vst.msk [vmem:[#allocation2 + $0x90] sm:$0xff] %vm240_vm0, %v2345_v30 }
  0x14   :  { %261 = vst.msk [vmem:[#allocation2 + $0x98] sm:$0x3] %vm242_vm1, %v2345_v30 }
  0x15   :  { %262 = vst.msk [vmem:[#allocation2 + $0xa0] sm:$0xff] %vm240_vm0, %v2345_v30 }
  0x16   :  { %263 = vst.msk [vmem:[#allocation2 + $0xa8] sm:$0x3] %vm242_vm1, %v2345_v30 }
  0x17   :  { %264 = vst.msk [vmem:[#allocation2 + $0xb0] sm:$0xff] %vm240_vm0, %v2345_v30 }
  0x18   :  { %265 = vst.msk [vmem:[#allocation2 + $0xb8] sm:$0x3] %vm242_vm1, %v2345_v30 }
  0x19   :  { %266 = vst.msk [vmem:[#allocation2 + $0xc0] sm:$0xff] %vm240_vm0, %v2345_v30 }
  0x1a   :  { %116 = vrot.lane.b32.xlu1 %v2475_v9, %s2344_s13  ;;  %114 = vrot.lane.b32.xlu0 %v2480_v10, %s2344_s13  ;;  %267 = vst.msk [vmem:[#allocation2 + $0xc8] sm:$0x3] %vm242_vm1, %v2345_v30 }
  0x1b   :  { %118 = vrot.lane.b32.xlu2 %v2485_v11, %s2344_s13  ;;  %268 = vst.msk [vmem:[#allocation2 + $0xd0] sm:$0xff] %vm240_vm0, %v2345_v30 }
  0x1c   :  { %v2700_v47 = vld [vmem:[#allocation2 + $0xa0] sm:$0xff]  ;;  %269 = vst.msk [vmem:[#allocation2 + $0xd8] sm:$0x3] %vm242_vm1, %v2345_v30 }
  0x1d   :  { %v412_v48 = vrot.slane %v2700_v47, 1  ;;  %270 = vst.msk [vmem:[#allocation2 + $0xe0] sm:$0xff] %vm240_vm0, %v2345_v30  ;;  %v2711_v51 = vld [vmem:[#allocation2 + $0xa8] sm:$0x3] }
  0x1e   :  { %271 = vst.msk [vmem:[#allocation2 + $0xe8] sm:$0x3] %vm242_vm1, %v2345_v30  ;;  %v413_v56 = vrot.slane %v2711_v51, 1 }
  0x1f   :  { %272 = vst.msk [vmem:[#allocation2 + $0xf0] sm:$0xff] %vm240_vm0, %v2345_v30 }
  0x20   :  { %273 = vst.msk [vmem:[#allocation2 + $0xf8] sm:$0x3] %vm242_vm1, %v2345_v30  ;;  %v414_v58 = vsel %vm387_vm2, %v412_v48, %v413_v56 }
  0x21   :  { %274 = vst.msk [vmem:[#allocation2 + $0x100] sm:$0xff] %vm240_vm0, %v2345_v30 }
  0x22   :  { %122 = vrot.lane.b32.xlu1 %v2496_v12, %s2344_s13  ;;  %120 = vrot.lane.b32.xlu0 %v2501_v13, %s2344_s13  ;;  %275 = vst.msk [vmem:[#allocation2 + $0x108] sm:$0x3] %vm242_vm1, %v2345_v30 }
  0x23   :  { %124 = vrot.lane.b32.xlu2 %v2506_v14, %s2344_s13  ;;  %276 = vst.msk [vmem:[#allocation2 + $0x110] sm:$0xff] %vm240_vm0, %v2345_v30 }
  0x24   :  { %277 = vst.msk [vmem:[#allocation2 + $0x118] sm:$0x3] %vm242_vm1, %v2345_v30 }
  0x25   :  { %278 = vst.msk [vmem:[#allocation2 + $0x120] sm:$0xff] %vm240_vm0, %v2345_v30 }
  0x26   :  { %279 = vst.msk [vmem:[#allocation2 + $0x128] sm:$0x3] %vm242_vm1, %v2345_v30 }
  0x27   :  { %280 = vst.msk [vmem:[#allocation2 + $0x130] sm:$0xff] %vm240_vm0, %v2345_v30 }
  0x28   :  { %281 = vst.msk [vmem:[#allocation2 + $0x138] sm:$0x3] %vm242_vm1, %v2345_v30 }
  0x29   :  { %339 = vst.msk [vmem:[#allocation4] sm:$0xff] %vm240_vm0, %v2657_v34 }
  0x2a   :  { %128 = vrot.lane.b32.xlu1 %v2517_v15, %s2344_s13  ;;  %126 = vrot.lane.b32.xlu0 %v2522_v16, %s2344_s13  ;;  %347 = vst.msk [vmem:[#allocation4 + $0x40] sm:$0xff] %vm240_vm0, %v2700_v47 }
  0x2b   :  { %130 = vrot.lane.b32.xlu2 %v2527_v17, %s2344_s13  ;;  %1346 = vst.msk [vmem:[#allocation3] sm:$0xff] %vm1180_vm14, %v2345_v30 }
  0x2c   :  { %1349 = vst.msk [vmem:[#allocation3 + $0x10] sm:$0xff] %vm1180_vm14, %v2345_v30 }
  0x2d   :  { %1351 = vst.msk [vmem:[#allocation3 + $0x20] sm:$0xff] %vm1180_vm14, %v2345_v30 }
  0x2e   :  { %1353 = vst.msk [vmem:[#allocation3 + $0x30] sm:$0xff] %vm1180_vm14, %v2345_v30 }
  0x2f   :  { %1355 = vst.msk [vmem:[#allocation3 + $0x40] sm:$0xff] %vm1180_vm14, %v2345_v30 }
  0x30   :  { %1357 = vst.msk [vmem:[#allocation3 + $0x50] sm:$0xff] %vm1180_vm14, %v2345_v30 }
  0x31   :  { %1359 = vst.msk [vmem:[#allocation3 + $0x60] sm:$0xff] %vm1180_vm14, %v2345_v30 }
  0x32   :  { %134 = vrot.lane.b32.xlu1 %v2538_v18, %s2344_s13  ;;  %132 = vrot.lane.b32.xlu0 %v2543_v19, %s2344_s13  ;;  %1361 = vst.msk [vmem:[#allocation3 + $0x70] sm:$0xff] %vm1180_vm14, %v2345_v30 }
  0x33   :  { %136 = vrot.lane.b32.xlu2 %v2548_v20, %s2344_s13  ;;  %1363 = vst.msk [vmem:[#allocation3 + $0x80] sm:$0xff] %vm1180_vm14, %v2345_v30 }
  0x34   :  { %1365 = vst.msk [vmem:[#allocation3 + $0x90] sm:$0xff] %vm1180_vm14, %v2345_v30 }
  0x35   :  { %1367 = vst.msk [vmem:[#allocation3 + $0xa0] sm:$0xff] %vm1180_vm14, %v2345_v30 }
  0x36   :  { %1369 = vst.msk [vmem:[#allocation3 + $0xb0] sm:$0xff] %vm1180_vm14, %v2345_v30 }
  0x37   :  { %1371 = vst.msk [vmem:[#allocation3 + $0xc0] sm:$0xff] %vm1180_vm14, %v2345_v30 }
  0x38   :  { %1373 = vst.msk [vmem:[#allocation3 + $0xd0] sm:$0xff] %vm1180_vm14, %v2345_v30 }
  0x39   :  { %1375 = vst.msk [vmem:[#allocation3 + $0xe0] sm:$0xff] %vm1180_vm14, %v2345_v30 }
  0x3a   :  { %140 = vrot.lane.b32.xlu1 %v2559_v21, %s2344_s13  ;;  %138 = vrot.lane.b32.xlu0 %v2564_v22, %s2344_s13  ;;  %1377 = vst.msk [vmem:[#allocation3 + $0xf0] sm:$0xff] %vm1180_vm14, %v2345_v30 }
  0x3b   :  { %142 = vrot.lane.b32.xlu2 %v2569_v23, %s2344_s13  ;;  %1379 = vst.msk [vmem:[#allocation3 + $0x100] sm:$0xff] %vm1180_vm14, %v2345_v30 }
  0x3c   :  { %1381 = vst.msk [vmem:[#allocation3 + $0x110] sm:$0xff] %vm1180_vm14, %v2345_v30 }
  0x3d   :  { %1383 = vst.msk [vmem:[#allocation3 + $0x120] sm:$0xff] %vm1180_vm14, %v2345_v30 }
  0x3e   :  { %1385 = vst.msk [vmem:[#allocation3 + $0x130] sm:$0xff] %vm1180_vm14, %v2345_v30 }
  0x3f   :  { %1384 = vst.msk [vmem:[#allocation3 + $0x128] sm:$0x3] %vm1347_vm15, %v2345_v30 }
  0x40   :  { %1348 = vst.msk [vmem:[#allocation3 + $0x8] sm:$0x3] %vm1347_vm15, %v2345_v30 }
  0x41   :  { %1350 = vst.msk [vmem:[#allocation3 + $0x18] sm:$0x3] %vm1347_vm15, %v2345_v30 }
  0x42   :  { %146 = vrot.lane.b32.xlu1 %v2580_v24, %s2344_s13  ;;  %144 = vrot.lane.b32.xlu0 %v2585_v25, %s2344_s13  ;;  %1352 = vst.msk [vmem:[#allocation3 + $0x28] sm:$0x3] %vm1347_vm15, %v2345_v30 }
  0x43   :  { %148 = vrot.lane.b32.xlu2 %v2590_v26, %s2344_s13  ;;  %1354 = vst.msk [vmem:[#allocation3 + $0x38] sm:$0x3] %vm1347_vm15, %v2345_v30 }
  0x44   :  { %1356 = vst.msk [vmem:[#allocation3 + $0x48] sm:$0x3] %vm1347_vm15, %v2345_v30 }
  0x45   :  { %1358 = vst.msk [vmem:[#allocation3 + $0x58] sm:$0x3] %vm1347_vm15, %v2345_v30 }
  0x46   :  { %1360 = vst.msk [vmem:[#allocation3 + $0x68] sm:$0x3] %vm1347_vm15, %v2345_v30 }
  0x47   :  { %1362 = vst.msk [vmem:[#allocation3 + $0x78] sm:$0x3] %vm1347_vm15, %v2345_v30 }
  0x48   :  { %1364 = vst.msk [vmem:[#allocation3 + $0x88] sm:$0x3] %vm1347_vm15, %v2345_v30 }
  0x49   :  { %1366 = vst.msk [vmem:[#allocation3 + $0x98] sm:$0x3] %vm1347_vm15, %v2345_v30 }
  0x4a   :  { %152 = vrot.lane.b32.xlu1 %v2601_v27, %s2344_s13  ;;  %150 = vrot.lane.b32.xlu0 %v2606_v28, %s2344_s13  ;;  %1368 = vst.msk [vmem:[#allocation3 + $0xa8] sm:$0x3] %vm1347_vm15, %v2345_v30 }
  0x4b   :  { %154 = vrot.lane.b32.xlu2 %v2611_v29, %s2344_s13  ;;  %1370 = vst.msk [vmem:[#allocation3 + $0xb8] sm:$0x3] %vm1347_vm15, %v2345_v30 }
  0x4c   :  { %1372 = vst.msk [vmem:[#allocation3 + $0xc8] sm:$0x3] %vm1347_vm15, %v2345_v30 }
  0x4d   :  { %1374 = vst.msk [vmem:[#allocation3 + $0xd8] sm:$0x3] %vm1347_vm15, %v2345_v30 }
  0x4e   :  { %1376 = vst.msk [vmem:[#allocation3 + $0xe8] sm:$0x3] %vm1347_vm15, %v2345_v30 }
  0x4f   :  { %1378 = vst.msk [vmem:[#allocation3 + $0xf8] sm:$0x3] %vm1347_vm15, %v2345_v30 }
  0x50   :  { %1380 = vst.msk [vmem:[#allocation3 + $0x108] sm:$0x3] %vm1347_vm15, %v2345_v30 }
  0x51   :  { %1382 = vst.msk [vmem:[#allocation3 + $0x118] sm:$0x3] %vm1347_vm15, %v2345_v30 }
  0x52   :  { %156 = vrot.lane.b32.xlu0 %v2634_v31, %s2344_s13  ;;  %158 = vrot.lane.b32.xlu1 %v2647_v33, %s2344_s13  ;;  %s2347_s13 = smov 8   ;;  %1386 = vst.msk [vmem:[#allocation3 + $0x138] sm:$0x3] %vm1347_vm15, %v2345_v30 }
  0x53   :  { %436 = vrot.lane.b32.xlu2 %v390_v40, %s2346_s0 }
  0x59   :  { %v1443_v30 = vld [vmem:[#allocation3 + $0x138] sm:$0x3] }
  0x5a   :  { %550 = vrot.lane.b32.xlu0 %v504_v42, %s2347_s13  ;;  %452 = vrot.lane.b32.xlu1 %v414_v58, %s2346_s0 }
  0x5d   :  { %v105_v32 = vpop.permute.xlu2 %104 }
  0x5e   :  { %v196_v41 = vmax.f32 %v2426_v2, %v105_v32 }
  0x65   :  { %v107_v43 = vpop.permute.xlu2 %106 }
  0x66   :  { %v197_v44 = vmax.f32 %v2443_v5, %v107_v43 }
  0x68   :  { %v226_v45 = vmax.f32 %v196_v41, %v197_v44 }
  0x6a   :  { %285 = vst.msk [vmem:[#allocation2 + $0x31] sm:$0xff] %vm240_vm0, %v226_v45 }
  0x6d   :  { %v2698_v46 = vpop.permute.xlu2 %112 }
  0x6e   :  { %v200_v43 = vmax.f32 %v2464_v8, %v2698_v46 }
  0x71   :  { %v2705_v49 = vld [vmem:[#allocation2 + $0x30] sm:$0xff]  ;;  %v2707_v50 = vld [vmem:[#allocation2 + $0x38] sm:$0x3] }
  0x72   :  { %v397_v52 = vrot.slane %v2705_v49, 1  ;;  %v398_v53 = vrot.slane %v2707_v50, 1  ;;  %342 = vst.msk [vmem:[#allocation4 + $0x18] sm:$0xff] %vm240_vm0, %v2705_v49 }
  0x74   :  { %v101_v54 = vpop.permute.xlu1 %100  ;;  %v97_v55 = vpop.permute.xlu0 %96  ;;  %v2721_v57 = vsel %vm387_vm2, %v397_v52, %v398_v53 }
  0x75   :  { %442 = vrot.lane.b32.xlu2 %v2721_v57, %s2346_s0  ;;  %v194_v59 = vmax.f32 %v2412_v0, %v101_v54  ;;  %v119_v60 = vpop.permute.xlu2 %118  ;;  %v192_v63 = vmax.f32 %v2417_v1, %v97_v55 }
  0x76   :  { %v203_v44 = vmax.f32 %v2485_v11, %v119_v60 }
  0x7c   :  { %v103_v61 = vpop.permute.xlu1 %102  ;;  %v99_v62 = vpop.permute.xlu0 %98 }
  0x7d   :  { %v195_v2 = vmax.f32 %v2433_v3, %v103_v61  ;;  %v193_v5 = vmax.f32 %v2438_v4, %v99_v62  ;;  %v2759_v36 = vpop.permute.xlu2 %124 }
  0x7f   :  { %v225_v0 = vmax.f32 %v194_v59, %v195_v2  ;;  %v224_v32 = vmax.f32 %v192_v63, %v193_v5 }
  0x81   :  { %284 = vst.msk [vmem:[#allocation2 + $0x21] sm:$0xff] %vm240_vm0, %v225_v0 }
  0x82   :  { %283 = vst.msk [vmem:[#allocation2 + $0x11] sm:$0xff] %vm240_vm0, %v224_v32 }
  0x84   :  { %v111_v1 = vpop.permute.xlu1 %110  ;;  %v109_v3 = vpop.permute.xlu0 %108 }
  0x85   :  { %v199_v4 = vmax.f32 %v2454_v6, %v111_v1  ;;  %v198_v35 = vmax.f32 %v2459_v7, %v109_v3  ;;  %v131_v55 = vpop.permute.xlu2 %130 }
  0x87   :  { %v227_v37 = vmax.f32 %v198_v35, %v199_v4 }
  0x88   :  { %v2761_v34 = vld [vmem:[#allocation2 + $0x20] sm:$0xff]  ;;  %v2763_v38 = vld [vmem:[#allocation2 + $0x28] sm:$0x3] }
  0x89   :  { %286 = vst.msk [vmem:[#allocation2 + $0x41] sm:$0xff] %vm240_vm0, %v227_v37  ;;  %v2766_v39 = vld [vmem:[#allocation2 + $0x10] sm:$0xff]  ;;  %v2768_v40 = vld [vmem:[#allocation2 + $0x18] sm:$0x3]  ;;  %v394_v41 = vrot.slane %v2761_v34, 1  ;;  %v395_v42 = vrot.slane %v2763_v38, 1  ;;  %v206_v37 = vmax.f32 %v2506_v14, %v2759_v36 }
  0x8a   :  { %v391_v6 = vrot.slane %v2766_v39, 1  ;;  %v392_v7 = vrot.slane %v2768_v40, 1  ;;  %340 = vst.msk [vmem:[#allocation4 + $0x8] sm:$0xff] %vm240_vm0, %v2766_v39 }
  0x8b   :  { %v2780_v45 = vsel %vm387_vm2, %v394_v41, %v395_v42  ;;  %341 = vst.msk [vmem:[#allocation4 + $0x10] sm:$0xff] %vm240_vm0, %v2761_v34  ;;  %v209_v41 = vmax.f32 %v2527_v17, %v131_v55 }
  0x8c   :  { %v117_v48 = vpop.permute.xlu1 %116  ;;  %v2785_v52 = vsel %vm387_vm2, %v391_v6, %v392_v7  ;;  %v115_v53 = vpop.permute.xlu0 %114  ;;  %440 = vrot.lane.b32.xlu1 %v2780_v45, %s2346_s0 }
  0x8d   :  { %v202_v54 = vmax.f32 %v2475_v9, %v117_v48  ;;  %438 = vrot.lane.b32.xlu0 %v2785_v52, %s2346_s0  ;;  %v201_v8 = vmax.f32 %v2480_v10, %v115_v53  ;;  %v137_v3 = vpop.permute.xlu2 %136 }
  0x8f   :  { %v229_v11 = vmax.f32 %v202_v54, %v203_v44  ;;  %v228_v46 = vmax.f32 %v200_v43, %v201_v8 }
  0x90   :  { %v2793_v56 = vld [vmem:[#allocation2 + $0x40] sm:$0xff]  ;;  %v2795_v58 = vld [vmem:[#allocation2 + $0x48] sm:$0x3] }
  0x91   :  { %288 = vst.msk [vmem:[#allocation2 + $0x61] sm:$0xff] %vm240_vm0, %v229_v11  ;;  %v400_v59 = vrot.slane %v2793_v56, 1  ;;  %v401_v60 = vrot.slane %v2795_v58, 1 }
  0x92   :  { %287 = vst.msk [vmem:[#allocation2 + $0x51] sm:$0xff] %vm240_vm0, %v228_v46 }
  0x93   :  { %v2802_v9 = vsel %vm387_vm2, %v400_v59, %v401_v60  ;;  %343 = vst.msk [vmem:[#allocation4 + $0x20] sm:$0xff] %vm240_vm0, %v2793_v56 }
  0x94   :  { %v123_v10 = vpop.permute.xlu1 %122  ;;  %v121_v61 = vpop.permute.xlu0 %120 }
  0x95   :  { %v205_v62 = vmax.f32 %v2496_v12, %v123_v10  ;;  %444 = vrot.lane.b32.xlu0 %v2802_v9, %s2346_s0  ;;  %v204_v63 = vmax.f32 %v2501_v13, %v121_v61 }
  0x97   :  { %v230_v2 = vmax.f32 %v204_v63, %v205_v62 }
  0x98   :  { %v2810_v5 = vld [vmem:[#allocation2 + $0x60] sm:$0xff]  ;;  %v2812_v0 = vld [vmem:[#allocation2 + $0x68] sm:$0x3] }
  0x99   :  { %289 = vst.msk [vmem:[#allocation2 + $0x71] sm:$0xff] %vm240_vm0, %v230_v2  ;;  %v2815_v32 = vld [vmem:[#allocation2 + $0x50] sm:$0xff]  ;;  %v2817_v1 = vld [vmem:[#allocation2 + $0x58] sm:$0x3]  ;;  %v406_v4 = vrot.slane %v2810_v5, 1  ;;  %v407_v12 = vrot.slane %v2812_v0, 1  ;;  %v212_v2 = vmax.f32 %v2548_v20, %v137_v3 }
  0x9a   :  { %v403_v35 = vrot.slane %v2815_v32, 1  ;;  %v404_v13 = vrot.slane %v2817_v1, 1  ;;  %344 = vst.msk [vmem:[#allocation4 + $0x28] sm:$0xff] %vm240_vm0, %v2815_v32 }
  0x9b   :  { %v2829_v42 = vsel %vm387_vm2, %v406_v4, %v407_v12  ;;  %345 = vst.msk [vmem:[#allocation4 + $0x30] sm:$0xff] %vm240_vm0, %v2810_v5 }
  0x9c   :  { %v129_v6 = vpop.permute.xlu1 %128  ;;  %v2834_v7 = vsel %vm387_vm2, %v403_v35, %v404_v13  ;;  %v127_v43 = vpop.permute.xlu0 %126  ;;  %448 = vrot.lane.b32.xlu2 %v2829_v42, %s2346_s0 }
  0x9d   :  { %v208_v44 = vmax.f32 %v2517_v15, %v129_v6  ;;  %446 = vrot.lane.b32.xlu1 %v2834_v7, %s2346_s0  ;;  %v207_v14 = vmax.f32 %v2522_v16, %v127_v43  ;;  %v143_v16 = vpop.permute.xlu2 %142 }
  0x9f   :  { %v232_v17 = vmax.f32 %v208_v44, %v209_v41  ;;  %v231_v36 = vmax.f32 %v206_v37, %v207_v14 }
  0xa0   :  { %v2842_v48 = vld [vmem:[#allocation2 + $0x70] sm:$0xff]  ;;  %v2844_v53 = vld [vmem:[#allocation2 + $0x78] sm:$0x3] }
  0xa1   :  { %291 = vst.msk [vmem:[#allocation2 + $0xb1] sm:$0xff] %vm240_vm0, %v232_v17  ;;  %v409_v54 = vrot.slane %v2842_v48, 1  ;;  %v410_v8 = vrot.slane %v2844_v53, 1 }
  0xa2   :  { %290 = vst.msk [vmem:[#allocation2 + $0x81] sm:$0xff] %vm240_vm0, %v231_v36 }
  0xa3   :  { %v2851_v15 = vsel %vm387_vm2, %v409_v54, %v410_v8  ;;  %346 = vst.msk [vmem:[#allocation4 + $0x38] sm:$0xff] %vm240_vm0, %v2842_v48 }
  0xa4   :  { %v135_v11 = vpop.permute.xlu1 %134  ;;  %450 = vrot.lane.b32.xlu0 %v2851_v15, %s2346_s0  ;;  %v133_v46 = vpop.permute.xlu0 %132 }
  0xa5   :  { %v211_v55 = vmax.f32 %v2538_v18, %v135_v11  ;;  %v210_v59 = vmax.f32 %v2543_v19, %v133_v46  ;;  %v215_v18 = vmax.f32 %v2569_v23, %v143_v16  ;;  %v149_v37 = vpop.permute.xlu2 %148 }
  0xa7   :  { %v233_v60 = vmax.f32 %v210_v59, %v211_v55 }
  0xa8   :  { %v2859_v10 = vld [vmem:[#allocation2 + $0xb0] sm:$0xff]  ;;  %v2861_v61 = vld [vmem:[#allocation2 + $0xb8] sm:$0x3] }
  0xa9   :  { %292 = vst.msk [vmem:[#allocation2 + $0xc1] sm:$0xff] %vm240_vm0, %v233_v60  ;;  %v415_v62 = vrot.slane %v2859_v10, 1  ;;  %v416_v63 = vrot.slane %v2861_v61, 1  ;;  %v218_v60 = vmax.f32 %v2590_v26, %v149_v37 }
  0xaa   :  { %348 = vst.msk [vmem:[#allocation4 + $0x48] sm:$0xff] %vm240_vm0, %v2859_v10 }
  0xab   :  { %v2871_v19 = vsel %vm387_vm2, %v415_v62, %v416_v63 }
  0xac   :  { %v141_v4 = vpop.permute.xlu1 %140  ;;  %v139_v12 = vpop.permute.xlu0 %138  ;;  %454 = vrot.lane.b32.xlu2 %v2871_v19, %s2346_s0 }
  0xad   :  { %v214_v35 = vmax.f32 %v2559_v21, %v141_v4  ;;  %v213_v13 = vmax.f32 %v2564_v22, %v139_v12  ;;  %v155_v54 = vpop.permute.xlu2 %154 }
  0xae   :  { %v221_v62 = vmax.f32 %v2611_v29, %v155_v54 }
  0xaf   :  { %v235_v41 = vmax.f32 %v214_v35, %v215_v18  ;;  %v234_v6 = vmax.f32 %v212_v2, %v213_v13 }
  0xb0   :  { %v2877_v43 = vld [vmem:[#allocation2 + $0xc0] sm:$0xff]  ;;  %v2879_v20 = vld [vmem:[#allocation2 + $0xc8] sm:$0x3] }
  0xb1   :  { %294 = vst.msk [vmem:[#allocation2 + $0xe1] sm:$0xff] %vm240_vm0, %v235_v41  ;;  %v418_v23 = vrot.slane %v2877_v43, 1  ;;  %v419_v3 = vrot.slane %v2879_v20, 1 }
  0xb2   :  { %293 = vst.msk [vmem:[#allocation2 + $0xd1] sm:$0xff] %vm240_vm0, %v234_v6 }
  0xb3   :  { %v2886_v44 = vsel %vm387_vm2, %v418_v23, %v419_v3  ;;  %349 = vst.msk [vmem:[#allocation4 + $0x50] sm:$0xff] %vm240_vm0, %v2877_v43  ;;  %v511_v23 = vrot.slane %v2705_v49, 2  ;;  %v512_v3 = vrot.slane %v2707_v50, 2 }
  0xb4   :  { %v147_v21 = vpop.permute.xlu1 %146  ;;  %456 = vrot.lane.b32.xlu0 %v2886_v44, %s2346_s0  ;;  %v145_v22 = vpop.permute.xlu0 %144 }
  0xb5   :  { %v217_v14 = vmax.f32 %v2580_v24, %v147_v21  ;;  %v216_v17 = vmax.f32 %v2585_v25, %v145_v22  ;;  %v437_v13 = vpop.permute.xlu2 %436 }
  0xb6   :  { %485 = vst.msk [vmem:[#allocation4] sm:$0xff] %vm484_vm4, %v437_v13 }
  0xb7   :  { %v236_v36 = vmax.f32 %v216_v17, %v217_v14 }
  0xb8   :  { %v2894_v8 = vld [vmem:[#allocation2 + $0xe0] sm:$0xff]  ;;  %v2896_v16 = vld [vmem:[#allocation2 + $0xe8] sm:$0x3] }
  0xb9   :  { %295 = vst.msk [vmem:[#allocation2 + $0xf1] sm:$0xff] %vm240_vm0, %v236_v36  ;;  %v2899_v11 = vld [vmem:[#allocation2 + $0xd0] sm:$0xff]  ;;  %v2901_v46 = vld [vmem:[#allocation2 + $0xd8] sm:$0x3]  ;;  %v424_v55 = vrot.slane %v2894_v8, 1  ;;  %v425_v59 = vrot.slane %v2896_v16, 1 }
  0xba   :  { %v421_v24 = vrot.slane %v2899_v11, 1  ;;  %v422_v25 = vrot.slane %v2901_v46, 1  ;;  %350 = vst.msk [vmem:[#allocation4 + $0x58] sm:$0xff] %vm240_vm0, %v2899_v11 }
  0xbb   :  { %v2912_v63 = vsel %vm387_vm2, %v424_v55, %v425_v59  ;;  %351 = vst.msk [vmem:[#allocation4 + $0x60] sm:$0xff] %vm240_vm0, %v2894_v8 }
  0xbc   :  { %v153_v2 = vpop.permute.xlu1 %152  ;;  %v2917_v18 = vsel %vm387_vm2, %v421_v24, %v422_v25  ;;  %v151_v4 = vpop.permute.xlu0 %150  ;;  %460 = vrot.lane.b32.xlu2 %v2912_v63, %s2346_s0  ;;  %v2963_v24 = vsel %vm501_vm3, %v511_v23, %v512_v3  ;;  %v529_v3 = vrot.slane %v2859_v10, 2 }
  0xbd   :  { %v220_v12 = vmax.f32 %v2601_v27, %v153_v2  ;;  %458 = vrot.lane.b32.xlu1 %v2917_v18, %s2346_s0  ;;  %v219_v26 = vmax.f32 %v2606_v28, %v151_v4  ;;  %v509_v2 = vrot.slane %v2763_v38, 2  ;;  %v520_v4 = vrot.slane %v2810_v5, 2 }
  0xbf   :  { %v238_v29 = vmax.f32 %v220_v12, %v221_v62  ;;  %v237_v35 = vmax.f32 %v218_v60, %v219_v26  ;;  %v508_v62 = vrot.slane %v2761_v34, 2  ;;  %v521_v12 = vrot.slane %v2812_v0, 2 }
  0xc0   :  { %v2925_v37 = vld [vmem:[#allocation2 + $0xf0] sm:$0xff]  ;;  %v2927_v41 = vld [vmem:[#allocation2 + $0xf8] sm:$0x3]  ;;  %v505_v26 = vrot.slane %v2766_v39, 2  ;;  %v518_v0 = vrot.slane %v2817_v1, 2 }
  0xc1   :  { %297 = vst.msk [vmem:[#allocation2 + $0x111] sm:$0xff] %vm240_vm0, %v238_v29  ;;  %v427_v6 = vrot.slane %v2925_v37, 1  ;;  %v428_v27 = vrot.slane %v2927_v41, 1  ;;  %v506_v29 = vrot.slane %v2768_v40, 2  ;;  %v2984_v23 = vsel %vm501_vm3, %v508_v62, %v509_v2 }
  0xc2   :  { %296 = vst.msk [vmem:[#allocation2 + $0x101] sm:$0xff] %vm240_vm0, %v237_v35  ;;  %v2987_v38 = vsel %vm501_vm3, %v520_v4, %v521_v12  ;;  %v538_v2 = vrot.slane %v2894_v8, 2  ;;  %v539_v4 = vrot.slane %v2896_v16, 2  ;;  %v523_v12 = vrot.slane %v2842_v48, 2 }
  0xc3   :  { %v2935_v28 = vsel %vm387_vm2, %v427_v6, %v428_v27  ;;  %352 = vst.msk [vmem:[#allocation4 + $0x68] sm:$0xff] %vm240_vm0, %v2925_v37  ;;  %v2994_v40 = vsel %vm501_vm3, %v505_v26, %v506_v29  ;;  %v524_v26 = vrot.slane %v2844_v53, 2  ;;  %v536_v53 = vrot.slane %v2901_v46, 2 }
  0xc4   :  { %462 = vrot.lane.b32.xlu0 %v2935_v28, %s2346_s0  ;;  %v157_v60 = vpop.permute.xlu0 %156  ;;  %v159_v6 = vpop.permute.xlu1 %158 }
  0xc5   :  { %v222_v13 = vmax.f32 %v2634_v31, %v157_v60  ;;  %v223_v27 = vmax.f32 %v2647_v33, %v159_v6  ;;  %v517_v33 = vrot.slane %v2815_v32, 2  ;;  %v532_v6 = vrot.slane %v2877_v43, 2 }
  0xc7   :  { %v239_v31 = vmax.f32 %v222_v13, %v223_v27  ;;  %v3007_v60 = vsel %vm501_vm3, %v517_v33, %v518_v0  ;;  %v533_v27 = vrot.slane %v2879_v20, 2 }
  0xc8   :  { %v2943_v21 = vld [vmem:[#allocation2 + $0x110] sm:$0xff]  ;;  %v2945_v22 = vld [vmem:[#allocation2 + $0x118] sm:$0x3] }
  0xc9   :  { %v433_v14 = vrot.slane %v2943_v21, 1  ;;  %v434_v17 = vrot.slane %v2945_v22, 1  ;;  %354 = vst.msk [vmem:[#allocation4 + $0x78] sm:$0xff] %vm240_vm0, %v2943_v21  ;;  %v2951_v36 = vld [vmem:[#allocation2 + $0x100] sm:$0xff]  ;;  %v2953_v54 = vld [vmem:[#allocation2 + $0x108] sm:$0x3]  ;;  %v3057_v46 = vsel %vm501_vm3, %v532_v6, %v533_v27 }
  0xca   :  { %v430_v55 = vrot.slane %v2951_v36, 1  ;;  %v431_v59 = vrot.slane %v2953_v54, 1  ;;  %353 = vst.msk [vmem:[#allocation4 + $0x70] sm:$0xff] %vm240_vm0, %v2951_v36  ;;  %v547_v16 = vrot.slane %v2943_v21, 2  ;;  %v548_v13 = vrot.slane %v2945_v22, 2 }
  0xcb   :  { %v2960_v50 = vsel %vm387_vm2, %v433_v14, %v434_v17  ;;  %298 = vst.msk [vmem:[#allocation2 + $0x121] sm:$0xff] %vm240_vm0, %v239_v31  ;;  %v530_v14 = vrot.slane %v2861_v61, 2  ;;  %v514_v17 = vrot.slane %v2793_v56, 2  ;;  %v527_v61 = vrot.slane %v2711_v51, 2 }
  0xcc   :  { %466 = vrot.lane.b32.xlu2 %v2960_v50, %s2346_s0  ;;  %556 = vrot.lane.b32.xlu0 %v2963_v24, %s2347_s13  ;;  %v2970_v25 = vsel %vm387_vm2, %v430_v55, %v431_v59  ;;  %v515_v55 = vrot.slane %v2795_v58, 2  ;;  %v551_v59 = vpop.permute.xlu0 %550  ;;  %v526_v58 = vrot.slane %v2700_v47, 2  ;;  %v3035_v47 = vsel %vm501_vm3, %v523_v12, %v524_v26  ;;  %v453_v31 = vpop.permute.xlu1 %452 }
  0xcd   :  { %464 = vrot.lane.b32.xlu1 %v2970_v25, %s2346_s0  ;;  %599 = vst.msk [vmem:[#allocation4] sm:$0xff] %vm598_vm5, %v551_v59  ;;  %v3010_v62 = vsel %vm501_vm3, %v529_v3, %v530_v14  ;;  %v535_v51 = vrot.slane %v2899_v11, 2  ;;  %v3050_v0 = vsel %vm501_vm3, %v547_v16, %v548_v13  ;;  %v544_v20 = vrot.slane %v2951_v36, 2 }
  0xce   :  { %v3017_v1 = vsel %vm501_vm3, %v514_v17, %v515_v55  ;;  %v528_v29 = vsel %vm501_vm3, %v526_v58, %v527_v61  ;;  %493 = vst.msk [vmem:[#allocation4 + $0x40] sm:$0xff] %vm484_vm4, %v453_v31  ;;  %v545_v22 = vrot.slane %v2953_v54, 2  ;;  %v541_v3 = vrot.slane %v2925_v37, 2 }
  0xcf   :  { %v443_v35 = vpop.permute.xlu2 %442  ;;  %v3047_v33 = vsel %vm501_vm3, %v535_v51, %v536_v53  ;;  %v542_v14 = vrot.slane %v2927_v41, 2 }
  0xd0   :  { %488 = vst.msk [vmem:[#allocation4 + $0x18] sm:$0xff] %vm484_vm4, %v443_v35  ;;  %v3029_v35 = vsel %vm501_vm3, %v538_v2, %v539_v4  ;;  %v3066_v17 = vsel %vm501_vm3, %v544_v20, %v545_v22 }
  0xd1   :  { %v3073_v55 = vsel %vm501_vm3, %v541_v3, %v542_v14 }
  0xd2   :  { %v3118_v12 = vld [vmem:[#allocation2 + $0x120] sm:$0xff] }
  0xd4   :  { %554 = vrot.lane.b32.xlu2 %v2984_v23, %s2347_s13  ;;  %562 = vrot.lane.b32.xlu0 %v2987_v38, %s2347_s13 }
  0xd5   :  { %552 = vrot.lane.b32.xlu1 %v2994_v40, %s2347_s13 }
  0xdc   :  { %560 = vrot.lane.b32.xlu2 %v3007_v60, %s2347_s13  ;;  %568 = vrot.lane.b32.xlu0 %v3010_v62, %s2347_s13 }
  0xdd   :  { %558 = vrot.lane.b32.xlu1 %v3017_v1, %s2347_s13 }
  0xe4   :  { %566 = vrot.lane.b32.xlu2 %v528_v29, %s2347_s13  ;;  %574 = vrot.lane.b32.xlu0 %v3029_v35, %s2347_s13  ;;  %v316_v29 = vld [vmem:[#allocation2 + $0x88] sm:$0x3] }
  0xe5   :  { %564 = vrot.lane.b32.xlu1 %v3035_v47, %s2347_s13  ;;  %v685_v16 = vrot.slane %v316_v29, 1  ;;  %v756_v22 = vrot.slane %v316_v29, 2 }
  0xec   :  { %572 = vrot.lane.b32.xlu2 %v3047_v33, %s2347_s13  ;;  %580 = vrot.lane.b32.xlu0 %v3050_v0, %s2347_s13 }
  0xed   :  { %570 = vrot.lane.b32.xlu1 %v3057_v46, %s2347_s13 }
  0xf4   :  { %621 = vrot.lane.b32.xlu0 %v2705_v49, %s2348_s14  ;;  %578 = vrot.lane.b32.xlu2 %v3066_v17, %s2347_s13 }
  0xf5   :  { %576 = vrot.lane.b32.xlu1 %v3073_v55, %s2347_s13 }
  0xf6   :  { %v449_v54 = vpop.permute.xlu2 %448 }
  0xf7   :  { %491 = vst.msk [vmem:[#allocation4 + $0x30] sm:$0xff] %vm484_vm4, %v449_v54 }
  0xfc   :  { %627 = vrot.lane.b32.xlu0 %v2810_v5, %s2348_s14  ;;  %619 = vrot.lane.b32.xlu2 %v2761_v34, %s2348_s14 }
  0xfd   :  { %617 = vrot.lane.b32.xlu1 %v2766_v39, %s2348_s14  ;;  %v315_v39 = vld [vmem:[#allocation2 + $0x80] sm:$0xff] }
  0xfe   :  { %v441_v41 = vpop.permute.xlu1 %440  ;;  %v684_v53 = vrot.slane %v315_v39, 1  ;;  %v755_v20 = vrot.slane %v315_v39, 2 }
  0xff   :  { %v439_v59 = vpop.permute.xlu0 %438  ;;  %487 = vst.msk [vmem:[#allocation4 + $0x10] sm:$0xff] %vm484_vm4, %v441_v41  ;;  %v317_v41 = vld [vmem:[#allocation2 + $0x90] sm:$0xff] }
 0x100   :  { %486 = vst.msk [vmem:[#allocation4 + $0x8] sm:$0xff] %vm484_vm4, %v439_v59  ;;  %v686_v13 = vsel %vm387_vm2, %v684_v53, %v685_v16  ;;  %v757_v3 = vsel %vm501_vm3, %v755_v20, %v756_v22  ;;  %v318_v59 = vld [vmem:[#allocation2 + $0x98] sm:$0x3] }
 0x104   :  { %633 = vrot.lane.b32.xlu0 %v2859_v10, %s2348_s14  ;;  %625 = vrot.lane.b32.xlu2 %v2815_v32, %s2348_s14 }
 0x105   :  { %623 = vrot.lane.b32.xlu1 %v2793_v56, %s2348_s14 }
 0x106   :  { %v455_v58 = vpop.permute.xlu2 %454 }
 0x107   :  { %v445_v61 = vpop.permute.xlu0 %444  ;;  %494 = vst.msk [vmem:[#allocation4 + $0x48] sm:$0xff] %vm484_vm4, %v455_v58  ;;  %v967_v58 = vrot.slane %v318_v59, 2 }
 0x108   :  { %489 = vst.msk [vmem:[#allocation4 + $0x20] sm:$0xff] %vm484_vm4, %v445_v61 }
 0x10c   :  { %639 = vrot.lane.b32.xlu0 %v2894_v8, %s2348_s14  ;;  %631 = vrot.lane.b32.xlu2 %v315_v39, %s2348_s14 }
 0x10d   :  { %629 = vrot.lane.b32.xlu1 %v2842_v48, %s2348_s14 }
 0x10f   :  { %v447_v10 = vpop.permute.xlu1 %446 }
 0x110   :  { %490 = vst.msk [vmem:[#allocation4 + $0x28] sm:$0xff] %vm484_vm4, %v447_v10 }
 0x114   :  { %645 = vrot.lane.b32.xlu0 %v2943_v21, %s2348_s14  ;;  %637 = vrot.lane.b32.xlu2 %v2899_v11, %s2348_s14 }
 0x115   :  { %635 = vrot.lane.b32.xlu1 %v2877_v43, %s2348_s14 }
 0x116   :  { %v451_v2 = vpop.permute.xlu0 %450  ;;  %v461_v4 = vpop.permute.xlu2 %460 }
 0x117   :  { %492 = vst.msk [vmem:[#allocation4 + $0x38] sm:$0xff] %vm484_vm4, %v451_v2 }
 0x118   :  { %497 = vst.msk [vmem:[#allocation4 + $0x60] sm:$0xff] %vm484_vm4, %v461_v4 }
 0x11c   :  { %761 = vrot.lane.b32.xlu0 %v2994_v40, %s2349_s15  ;;  %643 = vrot.lane.b32.xlu2 %v2951_v36, %s2348_s14 }
 0x11d   :  { %641 = vrot.lane.b32.xlu1 %v2925_v37, %s2348_s14 }
 0x124   :  { %972 = vrot.lane.b32.xlu0 %v2984_v23, %s2350_s16  ;;  %690 = vrot.lane.b32.xlu2 %v2785_v52, %s2351_s17 }
 0x125   :  { %647 = vrot.lane.b32.xlu1 %v3118_v12, %s2348_s14 }
 0x126   :  { %v467_v40 = vpop.permute.xlu2 %466  ;;  %v457_v26 = vpop.permute.xlu0 %456 }
 0x127   :  { %500 = vst.msk [vmem:[#allocation4 + $0x78] sm:$0xff] %vm484_vm4, %v467_v40  ;;  %v895_v40 = vrot.slane %v317_v41, 1 }
 0x128   :  { %495 = vst.msk [vmem:[#allocation4 + $0x50] sm:$0xff] %vm484_vm4, %v457_v26  ;;  %v896_v26 = vrot.slane %v318_v59, 1 }
 0x12c   :  { %692 = vrot.lane.b32.xlu0 %v2780_v45, %s2351_s17  ;;  %901 = vrot.lane.b32.xlu2 %v2780_v45, %s2352_s18 }
 0x12d   :  { %828 = vrot.lane.b32.xlu1 %v2761_v34, %s2353_s19 }
 0x12e   :  { %v555_v52 = vpop.permute.xlu2 %554 }
 0x12f   :  { %601 = vst.msk [vmem:[#allocation4 + $0x10] sm:$0xff] %vm598_vm5, %v555_v52  ;;  %v459_v51 = vpop.permute.xlu1 %458  ;;  %v897_v52 = vsel %vm387_vm2, %v895_v40, %v896_v26 }
 0x130   :  { %496 = vst.msk [vmem:[#allocation4 + $0x58] sm:$0xff] %vm484_vm4, %v459_v51 }
 0x134   :  { %913 = vrot.lane.b32.xlu0 %v686_v13, %s2352_s18  ;;  %773 = vrot.lane.b32.xlu2 %v3035_v47, %s2349_s15 }
 0x135   :  { %702 = vrot.lane.b32.xlu1 %v2851_v15, %s2351_s17 }
 0x136   :  { %v561_v45 = vpop.permute.xlu2 %560  ;;  %v463_v34 = vpop.permute.xlu0 %462 }
 0x137   :  { %604 = vst.msk [vmem:[#allocation4 + $0x28] sm:$0xff] %vm598_vm5, %v561_v45 }
 0x138   :  { %498 = vst.msk [vmem:[#allocation4 + $0x68] sm:$0xff] %vm484_vm4, %v463_v34 }
 0x13c   :  { %903 = vrot.lane.b32.xlu0 %v2721_v57, %s2352_s18  ;;  %763 = vrot.lane.b32.xlu2 %v2984_v23, %s2349_s15 }
 0x13d   :  { %840 = vrot.lane.b32.xlu1 %v315_v39, %s2353_s19 }
 0x13e   :  { %v567_v6 = vpop.permute.xlu2 %566  ;;  %v557_v27 = vpop.permute.xlu0 %556 }
 0x13f   :  { %607 = vst.msk [vmem:[#allocation4 + $0x40] sm:$0xff] %vm598_vm5, %v567_v6  ;;  %v465_v31 = vpop.permute.xlu1 %464 }
 0x140   :  { %499 = vst.msk [vmem:[#allocation4 + $0x70] sm:$0xff] %vm484_vm4, %v465_v31  ;;  %v1056_v31 = vld [vmem:[%s4338_s1 + $0x18] sm:$0xff] }
 0x141   :  { %602 = vst.msk [vmem:[#allocation4 + $0x18] sm:$0xff] %vm598_vm5, %v557_v27  ;;  %v1057_v27 = vld [vmem:[%s4338_s1 + $0x20] sm:$0xf] }
 0x142   :  { %2279 = vmatpush.msk.msra.mxu0 %vm1111_vm8, %v1057_v27  ;;  %2313 = vmatpush.msk.msra.mxu2 %vm1111_vm8, %v1057_v27 }
 0x143   :  { %2314 = vmatpush.msk.msra.mxu3 %vm1111_vm8, %v1057_v27  ;;  %vm1841_vm8 = vcmask 326912  }
 0x144   :  { %775 = vrot.lane.b32.xlu0 %v757_v3, %s2349_s15  ;;  %984 = vrot.lane.b32.xlu2 %v757_v3, %s2350_s16  ;;  %v1054_v3 = vld [vmem:[%s4338_s1 + $0x8] sm:$0xff] }
 0x145   :  { %830 = vrot.lane.b32.xlu1 %v2705_v49, %s2353_s19  ;;  %v966_v49 = vrot.slane %v317_v41, 2  ;;  %1127 = vmatpush.msra.mxu0 %v1056_v31 }
 0x146   :  { %v573_v23 = vpop.permute.xlu2 %572  ;;  %v563_v14 = vpop.permute.xlu0 %562  ;;  %2315 = vmatpush.msra.mxu2 %v1056_v31  ;;  %2316 = vmatpush.msra.mxu3 %v1056_v31 }
 0x147   :  { %610 = vst.msk [vmem:[#allocation4 + $0x58] sm:$0xff] %vm598_vm5, %v573_v23  ;;  %v553_v54 = vpop.permute.xlu1 %552  ;;  %v968_v2 = vsel %vm501_vm3, %v966_v49, %v967_v58 }
 0x148   :  { %600 = vst.msk [vmem:[#allocation4 + $0x8] sm:$0xff] %vm598_vm5, %v553_v54 }
 0x149   :  { %605 = vst.msk [vmem:[#allocation4 + $0x30] sm:$0xff] %vm598_vm5, %v563_v14 }
 0x14c   :  { %765 = vrot.lane.b32.xlu0 %v2963_v24, %s2349_s15  ;;  %704 = vrot.lane.b32.xlu2 %v686_v13, %s2351_s17 }
 0x14d   :  { %974 = vrot.lane.b32.xlu1 %v2963_v24, %s2350_s16 }
 0x14e   :  { %v579_v61 = vpop.permute.xlu2 %578  ;;  %v569_v39 = vpop.permute.xlu0 %568 }
 0x14f   :  { %613 = vst.msk [vmem:[#allocation4 + $0x70] sm:$0xff] %vm598_vm5, %v579_v61  ;;  %v559_v10 = vpop.permute.xlu1 %558 }
 0x150   :  { %603 = vst.msk [vmem:[#allocation4 + $0x20] sm:$0xff] %vm598_vm5, %v559_v10 }
 0x151   :  { %608 = vst.msk [vmem:[#allocation4 + $0x48] sm:$0xff] %vm598_vm5, %v569_v39 }
 0x154   :  { %986 = vrot.lane.b32.xlu0 %v968_v2, %s2350_s16  ;;  %842 = vrot.lane.b32.xlu2 %v317_v41, %s2353_s19 }
 0x155   :  { %694 = vrot.lane.b32.xlu1 %v2721_v57, %s2351_s17 }
 0x156   :  { %v620_v24 = vpop.permute.xlu2 %619  ;;  %v575_v4 = vpop.permute.xlu0 %574 }
 0x157   :  { %667 = vst.msk [vmem:[#allocation4 + $0x8] sm:$0xff] %vm665_vm6, %v620_v24  ;;  %v565_v29 = vpop.permute.xlu1 %564 }
 0x158   :  { %606 = vst.msk [vmem:[#allocation4 + $0x38] sm:$0xff] %vm598_vm5, %v565_v29 }
 0x159   :  { %611 = vst.msk [vmem:[#allocation4 + $0x60] sm:$0xff] %vm598_vm5, %v575_v4 }
 0x15c   :  { %706 = vrot.lane.b32.xlu0 %v2871_v19, %s2351_s17  ;;  %832 = vrot.lane.b32.xlu2 %v2793_v56, %s2353_s19 }
 0x15d   :  { %915 = vrot.lane.b32.xlu1 %v897_v52, %s2352_s18 }
 0x15e   :  { %v626_v57 = vpop.permute.xlu2 %625  ;;  %v581_v51 = vpop.permute.xlu0 %580 }
 0x15f   :  { %670 = vst.msk [vmem:[#allocation4 + $0x20] sm:$0xff] %vm665_vm6, %v626_v57  ;;  %v571_v53 = vpop.permute.xlu1 %570 }
 0x160   :  { %609 = vst.msk [vmem:[#allocation4 + $0x50] sm:$0xff] %vm598_vm5, %v571_v53  ;;  %v687_v53 = vrot.slane %v3118_v12, 1 }
 0x161   :  { %614 = vst.msk [vmem:[#allocation4 + $0x78] sm:$0xff] %vm598_vm5, %v581_v51 }
 0x164   :  { %844 = vrot.lane.b32.xlu0 %v2877_v43, %s2353_s19  ;;  %976 = vrot.lane.b32.xlu2 %v3017_v1, %s2350_s16 }
 0x165   :  { %905 = vrot.lane.b32.xlu1 %v2802_v9, %s2352_s18 }
 0x166   :  { %v632_v56 = vpop.permute.xlu2 %631  ;;  %v622_v19 = vpop.permute.xlu0 %621 }
 0x167   :  { %673 = vst.msk [vmem:[#allocation4 + $0x38] sm:$0xff] %vm665_vm6, %v632_v56  ;;  %v577_v16 = vpop.permute.xlu1 %576  ;;  %v758_v56 = vrot.slane %v3118_v12, 2 }
 0x168   :  { %612 = vst.msk [vmem:[#allocation4 + $0x68] sm:$0xff] %vm598_vm5, %v577_v16  ;;  %vm1588_vm5 = vcmask 130112  }
 0x169   :  { %668 = vst.msk [vmem:[#allocation4 + $0x10] sm:$0xff] %vm665_vm6, %v622_v19 }
 0x16c   :  { %834 = vrot.lane.b32.xlu0 %v2815_v32, %s2353_s19  ;;  %696 = vrot.lane.b32.xlu2 %v2802_v9, %s2351_s17 }
 0x16d   :  { %777 = vrot.lane.b32.xlu1 %v3010_v62, %s2349_s15 }
 0x16e   :  { %v638_v43 = vpop.permute.xlu2 %637  ;;  %v628_v13 = vpop.permute.xlu0 %627 }
 0x16f   :  { %676 = vst.msk [vmem:[#allocation4 + $0x50] sm:$0xff] %vm665_vm6, %v638_v43  ;;  %v618_v45 = vpop.permute.xlu1 %617 }
 0x170   :  { %666 = vst.msk [vmem:[#allocation4] sm:$0xff] %vm665_vm6, %v618_v45 }
 0x171   :  { %671 = vst.msk [vmem:[#allocation4 + $0x28] sm:$0xff] %vm665_vm6, %v628_v13 }
 0x174   :  { %978 = vrot.lane.b32.xlu0 %v3007_v60, %s2350_s16  ;;  %917 = vrot.lane.b32.xlu2 %v2886_v44, %s2352_s18 }
 0x175   :  { %767 = vrot.lane.b32.xlu1 %v3017_v1, %s2349_s15 }
 0x176   :  { %v644_v9 = vpop.permute.xlu2 %643  ;;  %v634_v32 = vpop.permute.xlu0 %633 }
 0x177   :  { %679 = vst.msk [vmem:[#allocation4 + $0x68] sm:$0xff] %vm665_vm6, %v644_v9  ;;  %v624_v62 = vpop.permute.xlu1 %623 }
 0x178   :  { %669 = vst.msk [vmem:[#allocation4 + $0x18] sm:$0xff] %vm665_vm6, %v624_v62 }
 0x179   :  { %674 = vst.msk [vmem:[#allocation4 + $0x40] sm:$0xff] %vm665_vm6, %v634_v32 }
 0x17c   :  { %779 = vrot.lane.b32.xlu0 %v3057_v46, %s2349_s15  ;;  %907 = vrot.lane.b32.xlu2 %v2834_v7, %s2352_s18 }
 0x17d   :  { %988 = vrot.lane.b32.xlu1 %v3057_v46, %s2350_s16  ;;  %v1055_v46 = vld [vmem:[%s4338_s1 + $0x10] sm:$0xff] }
 0x17e   :  { %v691_v1 = vpop.permute.xlu2 %690  ;;  %v640_v34 = vpop.permute.xlu0 %639  ;;  %1128 = vmatpush.msra.mxu0 %v1055_v46  ;;  %2317 = vmatpush.msra.mxu2 %v1055_v46 }
 0x17f   :  { %739 = vst.msk [vmem:[#allocation4] sm:$0xff] %vm738_vm7, %v691_v1  ;;  %v630_v6 = vpop.permute.xlu1 %629  ;;  %2318 = vmatpush.msra.mxu3 %v1055_v46 }
 0x180   :  { %672 = vst.msk [vmem:[#allocation4 + $0x30] sm:$0xff] %vm665_vm6, %v630_v6  ;;  %1129 = vmatpush.msra.mxu0 %v1054_v3  ;;  %2319 = vmatpush.msra.mxu2 %v1054_v3 }
 0x181   :  { %677 = vst.msk [vmem:[#allocation4 + $0x58] sm:$0xff] %vm665_vm6, %v640_v34  ;;  %2320 = vmatpush.msra.mxu3 %v1054_v3 }
 0x184   :  { %846 = vrot.lane.b32.xlu0 %v2899_v11, %s2353_s19  ;;  %714 = vrot.lane.b32.xlu2 %v2935_v28, %s2351_s17 }
 0x185   :  { %708 = vrot.lane.b32.xlu1 %v2886_v44, %s2351_s17  ;;  %v1053_v44 = vld [vmem:[%s4338_s1] sm:$0xff] }
 0x186   :  { %v902_v20 = vpop.permute.xlu2 %901  ;;  %v646_v22 = vpop.permute.xlu0 %645  ;;  %1130 = vmatpush.msra.mxu0 %v1053_v44  ;;  %2321 = vmatpush.msra.mxu2 %v1053_v44 }
 0x187   :  { %v636_v11 = vpop.permute.xlu1 %635  ;;  %680 = vst.msk [vmem:[#allocation4 + $0x70] sm:$0xff] %vm665_vm6, %v646_v22  ;;  %2322 = vmatpush.msra.mxu3 %v1053_v44 }
 0x188   :  { %675 = vst.msk [vmem:[#allocation4 + $0x48] sm:$0xff] %vm665_vm6, %v636_v11 }
 0x18c   :  { %919 = vrot.lane.b32.xlu0 %v2917_v18, %s2352_s18  ;;  %698 = vrot.lane.b32.xlu2 %v2834_v7, %s2351_s17 }
 0x18d   :  { %785 = vrot.lane.b32.xlu1 %v3073_v55, %s2349_s15 }
 0x18e   :  { %v774_v23 = vpop.permute.xlu2 %773  ;;  %v762_v14 = vpop.permute.xlu0 %761 }
 0x18f   :  { %v642_v54 = vpop.permute.xlu1 %641  ;;  %810 = vst.msk [vmem:[#allocation4] sm:$0xff] %vm809_vm9, %v762_v14 }
 0x190   :  { %678 = vst.msk [vmem:[#allocation4 + $0x60] sm:$0xff] %vm665_vm6, %v642_v54 }
 0x194   :  { %990 = vrot.lane.b32.xlu0 %v3047_v33, %s2350_s16  ;;  %769 = vrot.lane.b32.xlu2 %v3007_v60, %s2349_s15 }
 0x195   :  { %852 = vrot.lane.b32.xlu1 %v2951_v36, %s2353_s19 }
 0x196   :  { %v764_v7 = vpop.permute.xlu2 %763  ;;  %v973_v41 = vpop.permute.xlu0 %972 }
 0x197   :  { %v648_v59 = vpop.permute.xlu1 %647 }
 0x198   :  { %681 = vst.msk [vmem:[#allocation4 + $0x78] sm:$0xff] %vm665_vm6, %v648_v59  ;;  %vm1701_vm6 = vcmask 195712  }
 0x19c   :  { %980 = vrot.lane.b32.xlu0 %v2987_v38, %s2350_s16  ;;  %836 = vrot.lane.b32.xlu2 %v2810_v5, %s2353_s19 }
 0x19d   :  { %925 = vrot.lane.b32.xlu1 %v2970_v25, %s2352_s18 }
 0x19e   :  { %v985_v49 = vpop.permute.xlu2 %984  ;;  %v693_v60 = vpop.permute.xlu0 %692 }
 0x19f   :  { %v829_v36 = vpop.permute.xlu1 %828  ;;  %740 = vst.msk [vmem:[#allocation4 + $0x8] sm:$0xff] %vm738_vm7, %v693_v60 }
 0x1a0   :  { %877 = vst.msk [vmem:[#allocation4] sm:$0xff] %vm876_vm10, %v829_v36 }
 0x1a1   :  { %950 = vst.msk [vmem:[#allocation4] sm:$0xff] %vm949_vm11, %v902_v20 }
 0x1a2   :  { %1021 = vst.msk [vmem:[#allocation4] sm:$0xff] %vm1020_vm12, %v973_v41 }
 0x1a3   :  { %811 = vst.msk [vmem:[#allocation4 + $0x8] sm:$0xff] %vm809_vm9, %v764_v7 }
 0x1a4   :  { %781 = vrot.lane.b32.xlu0 %v3047_v33, %s2349_s15  ;;  %909 = vrot.lane.b32.xlu2 %v2829_v42, %s2352_s18 }
 0x1a5   :  { %996 = vrot.lane.b32.xlu1 %v3066_v17, %s2350_s16 }
 0x1a6   :  { %v705_v5 = vpop.permute.xlu2 %704  ;;  %v914_v58 = vpop.permute.xlu0 %913 }
 0x1a7   :  { %746 = vst.msk [vmem:[#allocation4 + $0x38] sm:$0xff] %vm738_vm7, %v705_v5  ;;  %v703_v61 = vpop.permute.xlu1 %702 }
 0x1a8   :  { %745 = vst.msk [vmem:[#allocation4 + $0x30] sm:$0xff] %vm738_vm7, %v703_v61 }
 0x1a9   :  { %816 = vst.msk [vmem:[#allocation4 + $0x30] sm:$0xff] %vm809_vm9, %v774_v23  ;;  %v1037_v39 = vld [vmem:[#allocation4] sm:$0xff] }
 0x1aa   :  { %2280 = vmatmul.msk.f32.vlgmr.msra.gmra.mxu0 %vm1062_vm13, %v1037_v39 }
 0x1ac   :  { %848 = vrot.lane.b32.xlu0 %v2894_v8, %s2353_s19  ;;  %716 = vrot.lane.b32.xlu2 %v2970_v25, %s2351_s17 }
 0x1ad   :  { %710 = vrot.lane.b32.xlu1 %v2917_v18, %s2351_s17 }
 0x1ae   :  { %v843_v33 = vpop.permute.xlu2 %842  ;;  %v904_v10 = vpop.permute.xlu0 %903 }
 0x1af   :  { %v841_v2 = vpop.permute.xlu1 %840 }
 0x1b0   :  { %883 = vst.msk [vmem:[#allocation4 + $0x30] sm:$0xff] %vm876_vm10, %v841_v2 }
 0x1b1   :  { %956 = vst.msk [vmem:[#allocation4 + $0x30] sm:$0xff] %vm949_vm11, %v914_v58 }
 0x1b2   :  { %1027 = vst.msk [vmem:[#allocation4 + $0x30] sm:$0xff] %vm1020_vm12, %v985_v49 }
 0x1b4   :  { %921 = vrot.lane.b32.xlu0 %v2912_v63, %s2352_s18  ;;  %700 = vrot.lane.b32.xlu2 %v2829_v42, %s2351_s17 }
 0x1b5   :  { %787 = vrot.lane.b32.xlu1 %v3066_v17, %s2349_s15 }
 0x1b6   :  { %v833_v8 = vpop.permute.xlu2 %832  ;;  %v776_v18 = vpop.permute.xlu0 %775 }
 0x1b7   :  { %v831_v25 = vpop.permute.xlu1 %830  ;;  %817 = vst.msk [vmem:[#allocation4 + $0x38] sm:$0xff] %vm809_vm9, %v776_v18 }
 0x1b8   :  { %878 = vst.msk [vmem:[#allocation4 + $0x8] sm:$0xff] %vm876_vm10, %v831_v25 }
 0x1b9   :  { %951 = vst.msk [vmem:[#allocation4 + $0x8] sm:$0xff] %vm949_vm11, %v904_v10  ;;  %v1043_v24 = vld [vmem:[#allocation4 + $0x30] sm:$0xff] }
 0x1ba   :  { %884 = vst.msk [vmem:[#allocation4 + $0x38] sm:$0xff] %vm876_vm10, %v843_v33  ;;  %2286 = vmatmul.msk.f32.vlgmr.msra.gmra.mxu2 %vm1062_vm13, %v1043_v24 }
 0x1bc   :  { %992 = vrot.lane.b32.xlu0 %v3029_v35, %s2350_s16  ;;  %771 = vrot.lane.b32.xlu2 %v2987_v38, %s2349_s15 }
 0x1bd   :  { %854 = vrot.lane.b32.xlu1 %v2943_v21, %s2353_s19 }
 0x1be   :  { %v977_v42 = vpop.permute.xlu2 %976  ;;  %v766_v17 = vpop.permute.xlu0 %765 }
 0x1bf   :  { %v975_v4 = vpop.permute.xlu1 %974 }
 0x1c0   :  { %1022 = vst.msk [vmem:[#allocation4 + $0x8] sm:$0xff] %vm1020_vm12, %v975_v4 }
 0x1c4   :  { %982 = vrot.lane.b32.xlu0 %v3035_v47, %s2350_s16  ;;  %838 = vrot.lane.b32.xlu2 %v2842_v48, %s2353_s19 }
 0x1c5   :  { %927 = vrot.lane.b32.xlu1 %v2960_v50, %s2352_s18 }
 0x1c6   :  { %v697_v40 = vpop.permute.xlu2 %696  ;;  %v987_v26 = vpop.permute.xlu0 %986 }
 0x1c7   :  { %742 = vst.msk [vmem:[#allocation4 + $0x18] sm:$0xff] %vm738_vm7, %v697_v40  ;;  %v695_v38 = vpop.permute.xlu1 %694  ;;  %v1038_v21 = vld [vmem:[#allocation4 + $0x8] sm:$0xff] }
 0x1c8   :  { %741 = vst.msk [vmem:[#allocation4 + $0x10] sm:$0xff] %vm738_vm7, %v695_v38  ;;  %2281 = vmatmul.msk.f32.gmra.mxu0 %vm1062_vm13, %v1038_v21 }
 0x1c9   :  { %812 = vst.msk [vmem:[#allocation4 + $0x10] sm:$0xff] %vm809_vm9, %v766_v17 }
 0x1ca   :  { %879 = vst.msk [vmem:[#allocation4 + $0x10] sm:$0xff] %vm876_vm10, %v833_v8 }
 0x1cc   :  { %783 = vrot.lane.b32.xlu0 %v3029_v35, %s2349_s15  ;;  %911 = vrot.lane.b32.xlu2 %v2851_v15, %s2352_s18 }
 0x1cd   :  { %998 = vrot.lane.b32.xlu1 %v3050_v0, %s2350_s16 }
 0x1ce   :  { %v918_v48 = vpop.permute.xlu2 %917  ;;  %v707_v47 = vpop.permute.xlu0 %706 }
 0x1cf   :  { %v916_v29 = vpop.permute.xlu1 %915  ;;  %747 = vst.msk [vmem:[#allocation4 + $0x40] sm:$0xff] %vm738_vm7, %v707_v47 }
 0x1d0   :  { %957 = vst.msk [vmem:[#allocation4 + $0x38] sm:$0xff] %vm949_vm11, %v916_v29 }
 0x1d1   :  { %1028 = vst.msk [vmem:[#allocation4 + $0x38] sm:$0xff] %vm1020_vm12, %v987_v26 }
 0x1d4   :  { %718 = vrot.lane.b32.xlu2 %v2960_v50, %s2351_s17  ;;  %856 = vrot.lane.b32.xlu0 %v3118_v12, %s2353_s19  ;;  %v336_v50 = vld [vmem:[#allocation2 + $0x128] sm:$0x3] }
 0x1d5   :  { %712 = vrot.lane.b32.xlu1 %v2912_v63, %s2351_s17  ;;  %v759_v16 = vrot.slane %v336_v50, 2  ;;  %v688_v43 = vrot.slane %v336_v50, 1 }
 0x1d6   :  { %v908_v15 = vpop.permute.xlu2 %907  ;;  %v845_v35 = vpop.permute.xlu0 %844 }
 0x1d7   :  { %v906_v52 = vpop.permute.xlu1 %905  ;;  %v760_v13 = vsel %vm501_vm3, %v758_v56, %v759_v16  ;;  %v689_v12 = vsel %vm387_vm2, %v687_v53, %v688_v43 }
 0x1d8   :  { %952 = vst.msk [vmem:[#allocation4 + $0x10] sm:$0xff] %vm949_vm11, %v906_v52  ;;  %v1044_v57 = vld [vmem:[#allocation4 + $0x38] sm:$0xff] }
 0x1d9   :  { %1023 = vst.msk [vmem:[#allocation4 + $0x10] sm:$0xff] %vm1020_vm12, %v977_v42  ;;  %2287 = vmatmul.msk.f32.gmra.mxu2 %vm1062_vm13, %v1044_v57 }
 0x1dc   :  { %850 = vrot.lane.b32.xlu2 %v2925_v37, %s2353_s19  ;;  %994 = vrot.lane.b32.xlu0 %v3073_v55, %s2350_s16  ;;  %v338_v55 = vld [vmem:[#allocation2 + $0x138] sm:$0x3] }
 0x1dd   :  { %789 = vrot.lane.b32.xlu1 %v3050_v0, %s2349_s15  ;;  %v337_v0 = vld [vmem:[#allocation2 + $0x130] sm:$0xff]  ;;  %v970_v9 = vrot.slane %v338_v55, 2  ;;  %v899_v6 = vrot.slane %v338_v55, 1 }
 0x1de   :  { %v715_v63 = vpop.permute.xlu2 %714  ;;  %v835_v51 = vpop.permute.xlu0 %834  ;;  %v969_v45 = vrot.slane %v337_v0, 2 }
 0x1df   :  { %751 = vst.msk [vmem:[#allocation4 + $0x60] sm:$0xff] %vm738_vm7, %v715_v63  ;;  %v778_v19 = vpop.permute.xlu1 %777 }
 0x1e0   :  { %818 = vst.msk [vmem:[#allocation4 + $0x40] sm:$0xff] %vm809_vm9, %v778_v19  ;;  %v1039_v37 = vld [vmem:[#allocation4 + $0x10] sm:$0xff]  ;;  %v971_v34 = vsel %vm501_vm3, %v969_v45, %v970_v9 }
 0x1e1   :  { %885 = vst.msk [vmem:[#allocation4 + $0x40] sm:$0xff] %vm876_vm10, %v845_v35  ;;  %2282 = vmatmul.msk.f32.gmra.mxu0 %vm1062_vm13, %v1039_v37 }
 0x1e2   :  { %958 = vst.msk [vmem:[#allocation4 + $0x40] sm:$0xff] %vm949_vm11, %v918_v48 }
 0x1e4   :  { %791 = vrot.lane.b32.xlu0 %v760_v13, %s2349_s15  ;;  %929 = vrot.lane.b32.xlu2 %v689_v12, %s2352_s18 }
 0x1e5   :  { %923 = vrot.lane.b32.xlu1 %v2935_v28, %s2352_s18  ;;  %v898_v28 = vrot.slane %v337_v0, 1 }
 0x1e6   :  { %v699_v32 = vpop.permute.xlu2 %698  ;;  %v979_v62 = vpop.permute.xlu0 %978 }
 0x1e7   :  { %743 = vst.msk [vmem:[#allocation4 + $0x20] sm:$0xff] %vm738_vm7, %v699_v32  ;;  %v768_v1 = vpop.permute.xlu1 %767  ;;  %v900_v20 = vsel %vm387_vm2, %v898_v28, %v899_v6  ;;  %v3461_v6 = vld [vmem:[%s4339_s2] ss:$0 sm:$0xff]  ;;  %s2354_s2 = smov 48  }
 0x1e8   :  { %813 = vst.msk [vmem:[#allocation4 + $0x18] sm:$0xff] %vm809_vm9, %v768_v1 }
 0x1e9   :  { %880 = vst.msk [vmem:[#allocation4 + $0x18] sm:$0xff] %vm876_vm10, %v835_v51 }
 0x1ea   :  { %953 = vst.msk [vmem:[#allocation4 + $0x18] sm:$0xff] %vm949_vm11, %v908_v15 }
 0x1eb   :  { %1024 = vst.msk [vmem:[#allocation4 + $0x18] sm:$0xff] %vm1020_vm12, %v979_v62 }
 0x1ec   :  { %720 = vrot.lane.b32.xlu2 %v689_v12, %s2351_s17  ;;  %1002 = vrot.lane.b32.xlu0 %v971_v34, %s2350_s16 }
 0x1ed   :  { %1000 = vrot.lane.b32.xlu1 %v760_v13, %s2350_s16 }
 0x1ee   :  { %v770_v27 = vpop.permute.xlu2 %769  ;;  %v780_v31 = vpop.permute.xlu0 %779 }
 0x1ef   :  { %814 = vst.msk [vmem:[#allocation4 + $0x20] sm:$0xff] %vm809_vm9, %v770_v27  ;;  %v989_v46 = vpop.permute.xlu1 %988 }
 0x1f0   :  { %1029 = vst.msk [vmem:[#allocation4 + $0x40] sm:$0xff] %vm1020_vm12, %v989_v46 }
 0x1f2   :  { %v1040_v22 = vld [vmem:[#allocation4 + $0x18] sm:$0xff] }
 0x1f3   :  { %2283 = vmatmul.msk.f32.gmra.mxu0 %vm1062_vm13, %v1040_v22 }
 0x1f4   :  { %931 = vrot.lane.b32.xlu2 %v900_v20, %s2352_s18 }
 0x1f5   :  { %858 = vrot.lane.b32.xlu1 %v337_v0, %s2353_s19 }
 0x1f6   :  { %v837_v3 = vpop.permute.xlu2 %836  ;;  %v847_v11 = vpop.permute.xlu0 %846 }
 0x1f7   :  { %881 = vst.msk [vmem:[#allocation4 + $0x20] sm:$0xff] %vm876_vm10, %v837_v3  ;;  %v709_v44 = vpop.permute.xlu1 %708  ;;  %v1045_v23 = vld [vmem:[#allocation4 + $0x40] sm:$0xff] }
 0x1f8   :  { %748 = vst.msk [vmem:[#allocation4 + $0x48] sm:$0xff] %vm738_vm7, %v709_v44  ;;  %2288 = vmatmul.msk.f32.gmra.mxu2 %vm1062_vm13, %v1045_v23 }
 0x1f9   :  { %819 = vst.msk [vmem:[#allocation4 + $0x48] sm:$0xff] %vm809_vm9, %v780_v31 }
 0x1fa   :  { %886 = vst.msk [vmem:[#allocation4 + $0x48] sm:$0xff] %vm876_vm10, %v847_v11 }
 0x1fe   :  { %v910_v14 = vpop.permute.xlu2 %909  ;;  %v920_v54 = vpop.permute.xlu0 %919 }
 0x1ff   :  { %954 = vst.msk [vmem:[#allocation4 + $0x20] sm:$0xff] %vm949_vm11, %v910_v14  ;;  %v786_v7 = vpop.permute.xlu1 %785 }
 0x200   :  { %822 = vst.msk [vmem:[#allocation4 + $0x60] sm:$0xff] %vm809_vm9, %v786_v7 }
 0x201   :  { %959 = vst.msk [vmem:[#allocation4 + $0x48] sm:$0xff] %vm949_vm11, %v920_v54 }
 0x206   :  { %v717_v41 = vpop.permute.xlu2 %716  ;;  %v991_v59 = vpop.permute.xlu0 %990 }
 0x207   :  { %752 = vst.msk [vmem:[#allocation4 + $0x68] sm:$0xff] %vm738_vm7, %v717_v41  ;;  %v853_v49 = vpop.permute.xlu1 %852 }
 0x208   :  { %889 = vst.msk [vmem:[#allocation4 + $0x60] sm:$0xff] %vm876_vm10, %v853_v49 }
 0x209   :  { %1030 = vst.msk [vmem:[#allocation4 + $0x48] sm:$0xff] %vm1020_vm12, %v991_v59 }
 0x20e   :  { %v701_v60 = vpop.permute.xlu2 %700  ;;  %v981_v36 = vpop.permute.xlu0 %980 }
 0x20f   :  { %744 = vst.msk [vmem:[#allocation4 + $0x28] sm:$0xff] %vm738_vm7, %v701_v60  ;;  %v926_v5 = vpop.permute.xlu1 %925 }
 0x210   :  { %962 = vst.msk [vmem:[#allocation4 + $0x60] sm:$0xff] %vm949_vm11, %v926_v5  ;;  %v1046_v58 = vld [vmem:[#allocation4 + $0x48] sm:$0xff] }
 0x211   :  { %1025 = vst.msk [vmem:[#allocation4 + $0x20] sm:$0xff] %vm1020_vm12, %v981_v36  ;;  %2289 = vmatmul.msk.f32.gmra.mxu2 %vm1062_vm13, %v1046_v58 }
 0x216   :  { %v772_v61 = vpop.permute.xlu2 %771  ;;  %v782_v39 = vpop.permute.xlu0 %781 }
 0x217   :  { %815 = vst.msk [vmem:[#allocation4 + $0x28] sm:$0xff] %vm809_vm9, %v772_v61  ;;  %v997_v33 = vpop.permute.xlu1 %996 }
 0x218   :  { %1033 = vst.msk [vmem:[#allocation4 + $0x60] sm:$0xff] %vm1020_vm12, %v997_v33  ;;  %v1041_v10 = vld [vmem:[#allocation4 + $0x20] sm:$0xff] }
 0x219   :  { %2284 = vmatmul.msk.f32.gmra.mxu0 %vm1062_vm13, %v1041_v10 }
 0x21e   :  { %v839_v2 = vpop.permute.xlu2 %838  ;;  %v849_v8 = vpop.permute.xlu0 %848 }
 0x21f   :  { %882 = vst.msk [vmem:[#allocation4 + $0x28] sm:$0xff] %vm876_vm10, %v839_v2  ;;  %v711_v18 = vpop.permute.xlu1 %710  ;;  %v1049_v25 = vld [vmem:[#allocation4 + $0x60] sm:$0xff] }
 0x220   :  { %749 = vst.msk [vmem:[#allocation4 + $0x50] sm:$0xff] %vm738_vm7, %v711_v18  ;;  %2292 = vmatmul.msk.f32.vlgmr.msra.gmra.mxu3 %vm1062_vm13, %v1049_v25 }
 0x221   :  { %820 = vst.msk [vmem:[#allocation4 + $0x50] sm:$0xff] %vm809_vm9, %v782_v39 }
 0x222   :  { %887 = vst.msk [vmem:[#allocation4 + $0x50] sm:$0xff] %vm876_vm10, %v849_v8 }
 0x226   :  { %v912_v24 = vpop.permute.xlu2 %911  ;;  %v922_v42 = vpop.permute.xlu0 %921 }
 0x227   :  { %955 = vst.msk [vmem:[#allocation4 + $0x28] sm:$0xff] %vm949_vm11, %v912_v24  ;;  %v788_v17 = vpop.permute.xlu1 %787  ;;  %v1132_v9 = vpop.f32.mrf.mxu0 }
 0x228   :  { %823 = vst.msk [vmem:[#allocation4 + $0x68] sm:$0xff] %vm809_vm9, %v788_v17  ;;  %v3467_v46 = vadd.f32 %v3461_v6, %v1132_v9 }
 0x229   :  { %960 = vst.msk [vmem:[#allocation4 + $0x50] sm:$0xff] %vm949_vm11, %v922_v42 }
 0x22a   :  { %v1218_v44 = vmul.f32 %v3467_v46, %v3467_v46  ;;  %v1181_v7 = vsel %vm1180_vm14, %v3467_v46, 0.0 }
 0x22c   :  { %v1234_v58 = vsel %vm1180_vm14, %v1218_v44, 0.0 }
 0x22e   :  { %v719_v4 = vpop.permute.xlu2 %718  ;;  %v993_v40 = vpop.permute.xlu0 %992 }
 0x22f   :  { %753 = vst.msk [vmem:[#allocation4 + $0x70] sm:$0xff] %vm738_vm7, %v719_v4  ;;  %v855_v26 = vpop.permute.xlu1 %854 }
 0x230   :  { %890 = vst.msk [vmem:[#allocation4 + $0x68] sm:$0xff] %vm876_vm10, %v855_v26 }
 0x231   :  { %1031 = vst.msk [vmem:[#allocation4 + $0x50] sm:$0xff] %vm1020_vm12, %v993_v40 }
 0x236   :  { %v851_v38 = vpop.permute.xlu2 %850  ;;  %v983_v21 = vpop.permute.xlu0 %982 }
 0x237   :  { %v928_v48 = vpop.permute.xlu1 %927  ;;  %1026 = vst.msk [vmem:[#allocation4 + $0x28] sm:$0xff] %vm1020_vm12, %v983_v21 }
 0x238   :  { %963 = vst.msk [vmem:[#allocation4 + $0x68] sm:$0xff] %vm949_vm11, %v928_v48  ;;  %v1047_v47 = vld [vmem:[#allocation4 + $0x50] sm:$0xff] }
 0x239   :  { %2290 = vmatmul.msk.f32.gmra.mxu2 %vm1062_vm13, %v1047_v47 }
 0x23d   :  { %v1150_v34 = vpop.f32.mrf.mxu2 }
 0x23e   :  { %v930_v29 = vpop.permute.xlu2 %929  ;;  %v784_v15 = vpop.permute.xlu0 %783  ;;  %v1042_v35 = vld [vmem:[#allocation4 + $0x28] sm:$0xff]  ;;  %v3508_v17 = vadd.f32 %v3461_v6, %v1150_v34 }
 0x23f   :  { %v999_v52 = vpop.permute.xlu1 %998  ;;  %2285 = vmatmul.msk.f32.gmra.mxu0 %vm1062_vm13, %v1042_v35 }
 0x240   :  { %1034 = vst.msk [vmem:[#allocation4 + $0x68] sm:$0xff] %vm1020_vm12, %v999_v52 }
 0x245   :  { %v1135_v32 = vpop.f32.mrf.mxu0 }
 0x246   :  { %v721_v57 = vpop.permute.xlu2 %720  ;;  %v857_v50 = vpop.permute.xlu0 %856  ;;  %v3464_v27 = vadd.f32 %v3461_v6, %v1135_v32 }
 0x247   :  { %v713_v63 = vpop.permute.xlu1 %712  ;;  %754 = vst.msk [vmem:[#allocation4 + $0x78] sm:$0xff] %vm738_vm7, %v721_v57  ;;  %v1050_v51 = vld [vmem:[#allocation4 + $0x68] sm:$0xff]  ;;  %v1192_v57 = vsel %vm1180_vm14, %v3508_v17, 0.0 }
 0x248   :  { %750 = vst.msk [vmem:[#allocation4 + $0x58] sm:$0xff] %vm738_vm7, %v713_v63  ;;  %2293 = vmatmul.msk.f32.gmra.mxu3 %vm1062_vm13, %v1050_v51  ;;  %v1219_v22 = vmul.f32 %v3464_v27, %v3464_v27  ;;  %v1182_v23 = vsel %vm1180_vm14, %v3464_v27, 0.0  ;;  %vm1768_vm7 = vcmask 261312  }
 0x249   :  { %821 = vst.msk [vmem:[#allocation4 + $0x58] sm:$0xff] %vm809_vm9, %v784_v15  ;;  %v1183_v5 = vadd.f32 %v1182_v23, %v1181_v7  ;;  %v1224_v15 = vmul.f32 %v3508_v17, %v3508_v17 }
 0x24a   :  { %888 = vst.msk [vmem:[#allocation4 + $0x58] sm:$0xff] %vm876_vm10, %v851_v38  ;;  %v1235_v41 = vsel %vm1180_vm14, %v1219_v22, 0.0 }
 0x24b   :  { %v1236_v10 = vadd.f32 %v1235_v41, %v1234_v58  ;;  %v1245_v63 = vsel %vm1180_vm14, %v1224_v15, 0.0 }
 0x24e   :  { %v995_v53 = vpop.permute.xlu0 %994  ;;  %v932_v0 = vpop.permute.xlu2 %931 }
 0x24f   :  { %v790_v56 = vpop.permute.xlu1 %789 }
 0x250   :  { %824 = vst.msk [vmem:[#allocation4 + $0x70] sm:$0xff] %vm809_vm9, %v790_v56 }
 0x251   :  { %891 = vst.msk [vmem:[#allocation4 + $0x70] sm:$0xff] %vm876_vm10, %v857_v50 }
 0x252   :  { %964 = vst.msk [vmem:[#allocation4 + $0x70] sm:$0xff] %vm949_vm11, %v930_v29 }
 0x256   :  { %v792_v19 = vpop.permute.xlu0 %791 }
 0x257   :  { %v924_v16 = vpop.permute.xlu1 %923  ;;  %825 = vst.msk [vmem:[#allocation4 + $0x78] sm:$0xff] %vm809_vm9, %v792_v19  ;;  %vm1912_vm9 = vcmask 392512  }
 0x258   :  { %961 = vst.msk [vmem:[#allocation4 + $0x58] sm:$0xff] %vm949_vm11, %v924_v16 }
 0x259   :  { %1032 = vst.msk [vmem:[#allocation4 + $0x58] sm:$0xff] %vm1020_vm12, %v995_v53 }
 0x25c   :  { %v1153_v31 = vpop.f32.mrf.mxu2 }
 0x25d   :  { %v3517_v35 = vadd.f32 %v3461_v6, %v1153_v31 }
 0x25e   :  { %v1003_v12 = vpop.permute.xlu0 %1002  ;;  %v1138_v62 = vpop.f32.mrf.mxu0 }
 0x25f   :  { %v1001_v43 = vpop.permute.xlu1 %1000  ;;  %v3470_v20 = vadd.f32 %v3461_v6, %v1138_v62  ;;  %v1225_v51 = vmul.f32 %v3517_v35, %v3517_v35  ;;  %v1194_v16 = vsel %vm1180_vm14, %v3517_v35, 0.0 }
 0x260   :  { %1035 = vst.msk [vmem:[#allocation4 + $0x70] sm:$0xff] %vm1020_vm12, %v1001_v43  ;;  %v1048_v37 = vld [vmem:[#allocation4 + $0x58] sm:$0xff] }
 0x261   :  { %2291 = vmatmul.msk.f32.gmra.mxu2 %vm1062_vm13, %v1048_v37  ;;  %v1220_v14 = vmul.f32 %v3470_v20, %v3470_v20  ;;  %v1184_v59 = vsel %vm1180_vm14, %v3470_v20, 0.0 }
 0x262   :  { %v1185_v2 = vadd.f32 %v1184_v59, %v1183_v5 }
 0x263   :  { %v1237_v61 = vsel %vm1180_vm14, %v1220_v14, 0.0 }
 0x264   :  { %v1238_v24 = vadd.f32 %v1237_v61, %v1236_v10 }
 0x267   :  { %v859_v55 = vpop.permute.xlu1 %858  ;;  %v1051_v13 = vld [vmem:[#allocation4 + $0x70] sm:$0xff] }
 0x268   :  { %892 = vst.msk [vmem:[#allocation4 + $0x78] sm:$0xff] %vm876_vm10, %v859_v55  ;;  %2294 = vmatmul.msk.f32.gmra.mxu3 %vm1062_vm13, %v1051_v13  ;;  %vm1979_vm10 = vcmask 458112  }
 0x269   :  { %965 = vst.msk [vmem:[#allocation4 + $0x78] sm:$0xff] %vm949_vm11, %v932_v0  ;;  %v1247_v0 = vsel %vm1180_vm14, %v1225_v51, 0.0  ;;  %vm2052_vm11 = vcmask 523712  }
 0x26a   :  { %1036 = vst.msk [vmem:[#allocation4 + $0x78] sm:$0xff] %vm1020_vm12, %v1003_v12  ;;  %vm2123_vm12 = vcmask 589312  }
 0x270   :  { %v1141_v1 = vpop.f32.mrf.mxu0 }
 0x271   :  { %v1052_v45 = vld [vmem:[#allocation4 + $0x78] sm:$0xff]  ;;  %v3475_v3 = vadd.f32 %v3461_v6, %v1141_v1 }
 0x272   :  { %2295 = vmatmul.msk.f32.gmra.mxu3 %vm1062_vm13, %v1052_v45  ;;  %vm2163_vm13 = vcmask 588800  }
 0x273   :  { %v1221_v49 = vmul.f32 %v3475_v3, %v3475_v3  ;;  %v1186_v39 = vsel %vm1180_vm14, %v3475_v3, 0.0 }
 0x274   :  { %v1187_v42 = vadd.f32 %v1186_v39, %v1185_v2 }
 0x275   :  { %v1239_v8 = vsel %vm1180_vm14, %v1221_v49, 0.0 }
 0x276   :  { %v1240_v26 = vadd.f32 %v1239_v8, %v1238_v24 }
 0x27b   :  { %v1156_v60 = vpop.f32.mrf.mxu2 }
 0x27c   :  { %v3525_v53 = vadd.f32 %v3461_v6, %v1156_v60 }
 0x27e   :  { %v1226_v55 = vmul.f32 %v3525_v53, %v3525_v53  ;;  %v1196_v45 = vsel %vm1180_vm14, %v3525_v53, 0.0 }
 0x280   :  { %v1249_v32 = vsel %vm1180_vm14, %v1226_v55, 0.0 }
 0x294   :  { %v1159_v21 = vpop.f32.mrf.mxu2 }
 0x295   :  { %v3533_v13 = vadd.f32 %v3461_v6, %v1159_v21 }
 0x296   :  { %v1144_v28 = vpop.f32.mrf.mxu0 }
 0x297   :  { %v3484_v54 = vadd.f32 %v3461_v6, %v1144_v28  ;;  %v1227_v62 = vmul.f32 %v3533_v13, %v3533_v13  ;;  %v1198_v31 = vsel %vm1180_vm14, %v3533_v13, 0.0 }
 0x299   :  { %v1222_v33 = vmul.f32 %v3484_v54, %v3484_v54  ;;  %v1188_v18 = vsel %vm1180_vm14, %v3484_v54, 0.0  ;;  %v1251_v23 = vsel %vm1180_vm14, %v1227_v62, 0.0 }
 0x29a   :  { %v1189_v38 = vadd.f32 %v1188_v18, %v1187_v42 }
 0x29b   :  { %v1241_v4 = vsel %vm1180_vm14, %v1222_v33, 0.0 }
 0x29c   :  { %v1242_v47 = vadd.f32 %v1241_v4, %v1240_v26 }
 0x2a3   :  { %v1168_v56 = vpop.f32.mrf.mxu3 }
 0x2a4   :  { %v3554_v59 = vadd.f32 %v3461_v6, %v1168_v56 }
 0x2a6   :  { %v1230_v2 = vmul.f32 %v3554_v59, %v3554_v59 }
 0x2a8   :  { %v1257_v4 = vsel %vm1180_vm14, %v1230_v2, 0.0 }
 0x2bc   :  { %v1147_v11 = vpop.f32.mrf.mxu0  ;;  %v1162_v43 = vpop.f32.mrf.mxu2 }
 0x2bd   :  { %v3494_v36 = vadd.f32 %v3461_v6, %v1147_v11  ;;  %v3541_v1 = vadd.f32 %v3461_v6, %v1162_v43 }
 0x2bf   :  { %v1223_v25 = vmul.f32 %v3494_v36, %v3494_v36  ;;  %v1190_v40 = vsel %vm1180_vm14, %v3494_v36, 0.0  ;;  %v1228_v14 = vmul.f32 %v3541_v1, %v3541_v1  ;;  %v1200_v49 = vsel %vm1180_vm14, %v3541_v1, 0.0 }
 0x2c0   :  { %v1191_v29 = vadd.f32 %v1190_v40, %v1189_v38 }
 0x2c1   :  { %v1243_v48 = vsel %vm1180_vm14, %v1223_v25, 0.0  ;;  %v1253_v58 = vsel %vm1180_vm14, %v1228_v14, 0.0  ;;  %v1204_v25 = vsel %vm1180_vm14, %v3554_v59, 0.0 }
 0x2c2   :  { %v1244_v52 = vadd.f32 %v1243_v48, %v1242_v47  ;;  %v1193_v50 = vadd.f32 %v1192_v57, %v1191_v29 }
 0x2c4   :  { %v1246_v19 = vadd.f32 %v1245_v63, %v1244_v52  ;;  %v1195_v37 = vadd.f32 %v1194_v16, %v1193_v50 }
 0x2c6   :  { %v1248_v12 = vadd.f32 %v1247_v0, %v1246_v19  ;;  %v1197_v9 = vadd.f32 %v1196_v45, %v1195_v37 }
 0x2c8   :  { %v1250_v28 = vadd.f32 %v1249_v32, %v1248_v12  ;;  %v1199_v44 = vadd.f32 %v1198_v31, %v1197_v9 }
 0x2ca   :  { %v1252_v41 = vadd.f32 %v1251_v23, %v1250_v28  ;;  %v1201_v5 = vadd.f32 %v1200_v49, %v1199_v44  ;;  %v1405_v44 = vld [vmem:[#allocation3 + $0x8] sm:$0x3] }
 0x2cb   :  { %v1171_v34 = vpop.f32.mrf.mxu3 }
 0x2cc   :  { %v1254_v33 = vadd.f32 %v1253_v58, %v1252_v41  ;;  %v3565_v8 = vadd.f32 %v3461_v6, %v1171_v34  ;;  %v1606_v41 = vrot.slane %v1405_v44, 2 }
 0x2ce   :  { %v1231_v40 = vmul.f32 %v3565_v8, %v3565_v8  ;;  %v1206_v38 = vsel %vm1180_vm14, %v3565_v8, 0.0 }
 0x2d0   :  { %v1259_v47 = vsel %vm1180_vm14, %v1231_v40, 0.0 }
 0x2e4   :  { %v1165_v22 = vpop.f32.mrf.mxu2 }
 0x2e5   :  { %v3546_v11 = vadd.f32 %v3461_v6, %v1165_v22  ;;  %v1404_v22 = vld [vmem:[#allocation3] sm:$0xff] }
 0x2e6   :  { %v1605_v23 = vrot.slane %v1404_v22, 2  ;;  %v1492_v58 = vrot.slane %v1404_v22, 1  ;;  %1444 = vst.msk [vmem:[#allocation5] sm:$0xff] %vm1180_vm14, %v1404_v22 }
 0x2e7   :  { %v1229_v7 = vmul.f32 %v3546_v11, %v3546_v11  ;;  %v1202_v60 = vsel %vm1180_vm14, %v3546_v11, 0.0 }
 0x2e8   :  { %v1203_v39 = vadd.f32 %v1202_v60, %v1201_v5  ;;  %v1607_v5 = vsel %vm501_vm3, %v1605_v23, %v1606_v41 }
 0x2e9   :  { %v1255_v61 = vsel %vm1180_vm14, %v1229_v7, 0.0  ;;  %1653 = vrot.lane.b32.xlu2 %v1607_v5, %s2351_s17 }
 0x2ea   :  { %v1256_v18 = vadd.f32 %v1255_v61, %v1254_v33  ;;  %v1205_v42 = vadd.f32 %v1204_v25, %v1203_v39  ;;  %v1493_v61 = vrot.slane %v1405_v44, 1  ;;  %v3623_v33 = vld [vmem:[#allocation3 + $0xa0] sm:$0xff] }
 0x2eb   :  { %v1174_v10 = vpop.f32.mrf.mxu3  ;;  %v1516_v25 = vrot.slane %v3623_v33, 1  ;;  %1452 = vst.msk [vmem:[#allocation5 + $0x40] sm:$0xff] %vm1180_vm14, %v3623_v33 }
 0x2ec   :  { %v3570_v24 = vadd.f32 %v3461_v6, %v1174_v10  ;;  %v1258_v26 = vadd.f32 %v1257_v4, %v1256_v18  ;;  %v1207_v48 = vadd.f32 %v1206_v38, %v1205_v42  ;;  %v1494_v10 = vsel %vm387_vm2, %v1492_v58, %v1493_v61  ;;  %v3636_v42 = vld [vmem:[#allocation3 + $0xa8] sm:$0x3] }
 0x2ed   :  { %1540 = vrot.lane.b32.xlu1 %v1494_v10, %s2347_s13  ;;  %v1517_v4 = vrot.slane %v3636_v42, 1 }
 0x2ee   :  { %v1232_v21 = vmul.f32 %v3570_v24, %v3570_v24  ;;  %v1208_v29 = vsel %vm1180_vm14, %v3570_v24, 0.0  ;;  %v1260_v15 = vadd.f32 %v1259_v47, %v1258_v26  ;;  %v1442_v26 = vld [vmem:[#allocation3 + $0x130] sm:$0xff] }
 0x2ef   :  { %v1209_v63 = vadd.f32 %v1208_v29, %v1207_v48  ;;  %v1518_v40 = vsel %vm387_vm2, %v1516_v25, %v1517_v4  ;;  %v2072_v48 = vrot.slane %v1442_v26, 2  ;;  %v2002_v29 = vrot.slane %v1443_v30, 1 }
 0x2f0   :  { %v1261_v57 = vsel %vm1180_vm14, %v1232_v21, 0.0  ;;  %1556 = vrot.lane.b32.xlu0 %v1518_v40, %s2347_s13  ;;  %v2001_v21 = vrot.slane %v1442_v26, 1 }
 0x2f1   :  { %v1262_v19 = vadd.f32 %v1261_v57, %v1260_v15  ;;  %v2073_v15 = vrot.slane %v1443_v30, 2 }
 0x2f2   :  { %v2003_v57 = vsel %vm387_vm2, %v2001_v21, %v2002_v29 }
 0x2f5   :  { %v1177_v52 = vpop.f32.mrf.mxu3  ;;  %1961 = vrot.lane.b32.xlu1 %v1442_v26, %s2354_s2 }
 0x2f6   :  { %v3584_v50 = vadd.f32 %v3461_v6, %v1177_v52 }
 0x2f8   :  { %v1210_v51 = vsel %vm1180_vm14, %v3584_v50, 0.0  ;;  %v1233_v56 = vmul.f32 %v3584_v50, %v3584_v50  ;;  %2034 = vrot.lane.b32.xlu0 %v2003_v57, %s2355_s10 }
 0x2f9   :  { %v1211_v16 = vadd.f32 %v1210_v51, %v1209_v63  ;;  %v2074_v63 = vsel %vm501_vm3, %v2072_v48, %v2073_v15 }
 0x2fa   :  { %v1263_v43 = vsel %vm1180_vm14, %v1233_v56, 0.0  ;;  %2105 = vrot.lane.b32.xlu2 %v2074_v63, %s2356_s11 }
 0x2fb   :  { %v1212_v37 = vrot.slane %v1211_v16, 4  ;;  %v1264_v0 = vadd.f32 %v1263_v43, %v1262_v19  ;;  %v1276_v19 = vld [vmem:[%s4340_s3] sm:$0x1]  ;;  %s2357_s3 = smov 40  }
 0x2fd   :  { %v1213_v55 = vadd.f32 %v1212_v37, %v1211_v16  ;;  %v1265_v12 = vrot.slane %v1264_v0, 4 }
 0x2ff   :  { %v1214_v6 = vrot.slane %v1213_v55, 2  ;;  %v1266_v45 = vadd.f32 %v1265_v12, %v1264_v0  ;;  %v1289_v0 = vld [vmem:[%s4341_s4] sm:$0x1] }
 0x301   :  { %v1215_v9 = vadd.f32 %v1214_v6, %v1213_v55  ;;  %v1267_v32 = vrot.slane %v1266_v45, 2 }
 0x303   :  { %v1216_v62 = vrot.slane %v1215_v9, 1  ;;  %v1268_v34 = vadd.f32 %v1267_v32, %v1266_v45 }
 0x305   :  { %v1217_v28 = vadd.f32 %v1216_v62, %v1215_v9  ;;  %v1269_v31 = vrot.slane %v1268_v34, 1 }
 0x307   :  { %v1270_v14 = vadd.f32 %v1269_v31, %v1268_v34  ;;  %v1271_v7 = vmul.f32 0.0078125, %v1217_v28 }
 0x309   :  { %v1272_v49 = vmul.f32 0.0078125, %v1270_v14  ;;  %v1273_v60 = vmul.f32 %v1271_v7, %v1271_v7 }
 0x30b   :  { %v1274_v39 = vsub.f32 %v1272_v49, %v1273_v60 }
 0x30d   :  { %v1275_v2 = vmax.f32 %v1274_v39, 0.0 }
 0x30f   :  { %v1277_v18 = vadd.f32 1e-05, %v1275_v2 }
 0x311   :  { %2340 = vrsqrt.f32 %v1277_v18  ;;  %vm1284_vm1 = vweird.f32 %v1277_v18 }
 0x317   :  { %v2341_v38 = vpop.eup %2340 }
 0x318   :  { %v1279_v47 = vmul.f32 %v2341_v38, %v1277_v18  ;;  %vm1285_vm0 = vweird.f32 %v2341_v38 }
 0x319   :  { %vm1286_vm4 = vmor %vm1284_vm1, %vm1285_vm0 }
 0x31a   :  { %v1280_v52 = vmul.f32 %v2341_v38, %v1279_v47 }
 0x31c   :  { %v1281_v51 = vmul.f32 0.5, %v1280_v52 }
 0x31e   :  { %v1282_v56 = vsub.f32 1.5, %v1281_v51 }
 0x320   :  { %v1283_v16 = vmul.f32 %v2341_v38, %v1282_v56 }
 0x322   :  { %v1287_v43 = vsel %vm1286_vm4, %v2341_v38, %v1283_v16 }
 0x323   :  { %v1288_v37 = vmul.f32 %v1287_v43, %v1276_v19 }
 0x325   :  { %v1290_v55 = vmul.f32 %v1288_v37, %v1271_v7  ;;  %v3657_v12 = vperm.slane %v1288_v37, 0 }
 0x327   :  { %v1291_v6 = vsub.f32 %v1289_v0, %v1290_v55  ;;  %v1310_v45 = vmul.f32 %v3657_v12, %v3584_v50  ;;  %v1309_v32 = vmul.f32 %v3657_v12, %v3570_v24  ;;  %v1297_v62 = vmul.f32 %v3657_v12, %v3470_v20 }
 0x328   :  { %v1296_v34 = vmul.f32 %v3657_v12, %v3464_v27  ;;  %v1300_v28 = vmul.f32 %v3657_v12, %v3494_v36  ;;  %v1299_v31 = vmul.f32 %v3657_v12, %v3484_v54  ;;  %v1295_v50 = vmul.f32 %v3657_v12, %v3467_v46 }
 0x329   :  { %v3661_v9 = vperm.slane %v1291_v6, 0  ;;  %v1303_v36 = vmul.f32 %v3657_v12, %v3525_v53  ;;  %v1305_v54 = vmul.f32 %v3657_v12, %v3541_v1  ;;  %v1298_v2 = vmul.f32 %v3657_v12, %v3475_v3 }
 0x32a   :  { %v1306_v25 = vmul.f32 %v3657_v12, %v3546_v11  ;;  %v1308_v26 = vmul.f32 %v3657_v12, %v3565_v8  ;;  %v1301_v30 = vmul.f32 %v3657_v12, %v3508_v17  ;;  %v1304_v57 = vmul.f32 %v3657_v12, %v3533_v13 }
 0x32b   :  { %v1329_v22 = vadd.f32 %v3661_v9, %v1310_v45  ;;  %v1328_v44 = vadd.f32 %v3661_v9, %v1309_v32  ;;  %v1316_v24 = vadd.f32 %v3661_v9, %v1297_v62  ;;  %v1315_v20 = vadd.f32 %v3661_v9, %v1296_v34 }
 0x32c   :  { %v1319_v23 = vadd.f32 %v3661_v9, %v1300_v28  ;;  %v1318_v27 = vadd.f32 %v3661_v9, %v1299_v31  ;;  %v1314_v41 = vadd.f32 %v3661_v9, %v1295_v50  ;;  %v1322_v60 = vadd.f32 %v3661_v9, %v1303_v36 }
 0x32d   :  { %v1345_v14 = vmax.f32 %v1329_v22, 0.0  ;;  %v1344_v46 = vmax.f32 %v1328_v44, 0.0  ;;  %v1332_v7 = vmax.f32 %v1316_v24, 0.0  ;;  %v1331_v49 = vmax.f32 %v1315_v20, 0.0 }
 0x32e   :  { %v1335_v5 = vmax.f32 %v1319_v23, 0.0  ;;  %v1324_v58 = vadd.f32 %v3661_v9, %v1305_v54  ;;  %v1334_v61 = vmax.f32 %v1318_v27, 0.0  ;;  %v1330_v53 = vmax.f32 %v1314_v41, 0.0 }
 0x32f   :  { %1403 = vst.msk [vmem:[#allocation3 + $0x121] sm:$0xff] %vm1180_vm14, %v1345_v14  ;;  %v1338_v1 = vmax.f32 %v1322_v60, 0.0  ;;  %v1317_v3 = vadd.f32 %v3661_v9, %v1298_v2  ;;  %v1325_v47 = vadd.f32 %v3661_v9, %v1306_v25  ;;  %v1327_v52 = vadd.f32 %v3661_v9, %v1308_v26 }
 0x330   :  { %1402 = vst.msk [vmem:[#allocation3 + $0x111] sm:$0xff] %vm1180_vm14, %v1344_v46  ;;  %v1340_v39 = vmax.f32 %v1324_v58, 0.0  ;;  %v1320_v51 = vadd.f32 %v3661_v9, %v1301_v30  ;;  %v1307_v56 = vmul.f32 %v3657_v12, %v3554_v59  ;;  %v1323_v43 = vadd.f32 %v3661_v9, %v1304_v57 }
 0x331   :  { %1390 = vst.msk [vmem:[#allocation3 + $0x31] sm:$0xff] %vm1180_vm14, %v1332_v7  ;;  %v1333_v16 = vmax.f32 %v1317_v3, 0.0  ;;  %v1302_v37 = vmul.f32 %v3657_v12, %v3517_v35  ;;  %v1341_v0 = vmax.f32 %v1325_v47, 0.0  ;;  %v1343_v32 = vmax.f32 %v1327_v52, 0.0 }
 0x332   :  { %1389 = vst.msk [vmem:[#allocation3 + $0x21] sm:$0xff] %vm1180_vm14, %v1331_v49  ;;  %v1326_v55 = vadd.f32 %v3661_v9, %v1307_v56  ;;  %v1336_v28 = vmax.f32 %v1320_v51, 0.0 }
 0x333   :  { %1393 = vst.msk [vmem:[#allocation3 + $0x61] sm:$0xff] %vm1180_vm14, %v1335_v5  ;;  %v1321_v62 = vadd.f32 %v3661_v9, %v1302_v37  ;;  %v1339_v9 = vmax.f32 %v1323_v43, 0.0 }
 0x334   :  { %1392 = vst.msk [vmem:[#allocation3 + $0x51] sm:$0xff] %vm1180_vm14, %v1334_v61  ;;  %v1342_v50 = vmax.f32 %v1326_v55, 0.0 }
 0x335   :  { %1388 = vst.msk [vmem:[#allocation3 + $0x11] sm:$0xff] %vm1180_vm14, %v1330_v53  ;;  %v1337_v24 = vmax.f32 %v1321_v62, 0.0 }
 0x336   :  { %v3695_v10 = vld [vmem:[#allocation3 + $0x120] sm:$0xff]  ;;  %1396 = vst.msk [vmem:[#allocation3 + $0xb1] sm:$0xff] %vm1180_vm14, %v1338_v1 }
 0x337   :  { %1750 = vrot.lane.b32.xlu0 %v3695_v10, %s2353_s19  ;;  %v3702_v18 = vld [vmem:[#allocation3 + $0x110] sm:$0xff]  ;;  %1398 = vst.msk [vmem:[#allocation3 + $0xd1] sm:$0xff] %vm1180_vm14, %v1340_v39  ;;  %v1439_v37 = vld [vmem:[#allocation3 + $0x118] sm:$0x3] }
 0x338   :  { %1748 = vrot.lane.b32.xlu2 %v3702_v18, %s2353_s19  ;;  %1459 = vst.msk [vmem:[#allocation5 + $0x78] sm:$0xff] %vm1180_vm14, %v3702_v18  ;;  %v3711_v4 = vld [vmem:[#allocation3 + $0x30] sm:$0xff]  ;;  %v3713_v40 = vld [vmem:[#allocation3 + $0x38] sm:$0x3]  ;;  %v1538_v62 = vrot.slane %v1439_v37, 1 }
 0x339   :  { %v1501_v38 = vrot.slane %v3711_v4, 1  ;;  %v1502_v21 = vrot.slane %v3713_v40, 1  ;;  %1447 = vst.msk [vmem:[#allocation5 + $0x18] sm:$0xff] %vm1180_vm14, %v3711_v4  ;;  %v3722_v11 = vld [vmem:[#allocation3 + $0x20] sm:$0xff]  ;;  %v3724_v48 = vld [vmem:[#allocation3 + $0x28] sm:$0x3] }
 0x33a   :  { %v1498_v29 = vrot.slane %v3722_v11, 1  ;;  %v1499_v8 = vrot.slane %v3724_v48, 1  ;;  %1446 = vst.msk [vmem:[#allocation5 + $0x10] sm:$0xff] %vm1180_vm14, %v3722_v11  ;;  %v3733_v15 = vld [vmem:[#allocation3 + $0x60] sm:$0xff]  ;;  %v3750_v19 = vld [vmem:[#allocation3 + $0x68] sm:$0x3] }
 0x33b   :  { %v3739_v63 = vsel %vm387_vm2, %v1501_v38, %v1502_v21  ;;  %1450 = vst.msk [vmem:[#allocation5 + $0x30] sm:$0xff] %vm1180_vm14, %v3733_v15  ;;  %v3743_v17 = vld [vmem:[#allocation3 + $0x50] sm:$0xff]  ;;  %v1510_v35 = vrot.slane %v3733_v15, 1  ;;  %v1511_v12 = vrot.slane %v3750_v19, 1  ;;  %v3776_v34 = vld [vmem:[#allocation3 + $0x58] sm:$0x3] }
 0x33c   :  { %1546 = vrot.lane.b32.xlu1 %v3739_v63, %s2347_s13  ;;  %1449 = vst.msk [vmem:[#allocation5 + $0x28] sm:$0xff] %vm1180_vm14, %v3743_v17  ;;  %v3754_v13 = vld [vmem:[#allocation3 + $0x10] sm:$0xff]  ;;  %v3765_v6 = vsel %vm387_vm2, %v1498_v29, %v1499_v8  ;;  %v3782_v31 = vld [vmem:[#allocation3 + $0x18] sm:$0x3]  ;;  %v1507_v22 = vrot.slane %v3743_v17, 1  ;;  %v1508_v44 = vrot.slane %v3776_v34, 1 }
 0x33d   :  { %1445 = vst.msk [vmem:[#allocation5 + $0x8] sm:$0xff] %vm1180_vm14, %v3754_v13  ;;  %v3761_v59 = vld [vmem:[#allocation3 + $0xb0] sm:$0xff]  ;;  %v3790_v20 = vsel %vm387_vm2, %v1510_v35, %v1511_v12  ;;  %v1495_v23 = vrot.slane %v3754_v13, 1  ;;  %v1496_v27 = vrot.slane %v3782_v31, 1  ;;  %v3797_v36 = vld [vmem:[#allocation3 + $0xb8] sm:$0x3] }
 0x33e   :  { %1453 = vst.msk [vmem:[#allocation5 + $0x48] sm:$0xff] %vm1180_vm14, %v3761_v59  ;;  %v3769_v45 = vld [vmem:[#allocation3 + $0xd0] sm:$0xff]  ;;  %v3802_v54 = vsel %vm387_vm2, %v1507_v22, %v1508_v44  ;;  %v1519_v46 = vrot.slane %v3761_v59, 1  ;;  %v1520_v7 = vrot.slane %v3797_v36, 1  ;;  %v3812_v41 = vld [vmem:[#allocation3 + $0xd8] sm:$0x3] }
 0x33f   :  { %1544 = vrot.lane.b32.xlu0 %v3765_v6, %s2347_s13  ;;  %1455 = vst.msk [vmem:[#allocation5 + $0x58] sm:$0xff] %vm1180_vm14, %v3769_v45  ;;  %v3808_v14 = vsel %vm387_vm2, %v1495_v23, %v1496_v27  ;;  %v1525_v61 = vrot.slane %v3769_v45, 1  ;;  %v1526_v53 = vrot.slane %v3812_v41, 1  ;;  %v1608_v12 = vrot.slane %v3754_v13, 2 }
 0x340   :  { %1959 = vrot.lane.b32.xlu2 %v3695_v10, %s2354_s2  ;;  %1391 = vst.msk [vmem:[#allocation3 + $0x41] sm:$0xff] %vm1180_vm14, %v1333_v16  ;;  %v3833_v39 = vsel %vm387_vm2, %v1519_v46, %v1520_v7  ;;  %v1612_v23 = vrot.slane %v3724_v48, 2 }
 0x341   :  { %1399 = vst.msk [vmem:[#allocation3 + $0xe1] sm:$0xff] %vm1180_vm14, %v1341_v0  ;;  %v3851_v21 = vsel %vm387_vm2, %v1525_v61, %v1526_v53 }
 0x342   :  { %1401 = vst.msk [vmem:[#allocation3 + $0x101] sm:$0xff] %vm1180_vm14, %v1343_v32  ;;  %v1537_v32 = vrot.slane %v3702_v18, 1 }
 0x343   :  { %1394 = vst.msk [vmem:[#allocation3 + $0x71] sm:$0xff] %vm1180_vm14, %v1336_v28  ;;  %v1609_v28 = vrot.slane %v3782_v31, 2  ;;  %v1611_v31 = vrot.slane %v3722_v11, 2 }
 0x344   :  { %1552 = vrot.lane.b32.xlu1 %v3790_v20, %s2347_s13  ;;  %1397 = vst.msk [vmem:[#allocation3 + $0xc1] sm:$0xff] %vm1180_vm14, %v1339_v9  ;;  %v3888_v9 = vsel %vm387_vm2, %v1537_v32, %v1538_v62  ;;  %v1441_v32 = vld [vmem:[#allocation3 + $0x128] sm:$0x3] }
 0x345   :  { %1400 = vst.msk [vmem:[#allocation3 + $0xf1] sm:$0xff] %vm1180_vm14, %v1342_v50  ;;  %v3895_v44 = vsel %vm501_vm3, %v1608_v12, %v1609_v28  ;;  %v3908_v61 = vsel %vm501_vm3, %v1611_v31, %v1612_v23  ;;  %v1791_v12 = vrot.slane %v1441_v32, 1  ;;  %v1651_v28 = vrot.slane %v1439_v37, 2 }
 0x346   :  { %1395 = vst.msk [vmem:[#allocation3 + $0x81] sm:$0xff] %vm1180_vm14, %v1337_v24  ;;  %v1861_v31 = vrot.slane %v3695_v10, 2  ;;  %v1862_v23 = vrot.slane %v1441_v32, 2 }
 0x347   :  { %1550 = vrot.lane.b32.xlu0 %v3802_v54, %s2347_s13  ;;  %v3814_v49 = vld [vmem:[#allocation3 + $0x40] sm:$0xff]  ;;  %v1413_v60 = vld [vmem:[#allocation3 + $0x48] sm:$0x3] }
 0x348   :  { %1542 = vrot.lane.b32.xlu2 %v3808_v14, %s2347_s13  ;;  %1448 = vst.msk [vmem:[#allocation5 + $0x20] sm:$0xff] %vm1180_vm14, %v3814_v49  ;;  %v3820_v5 = vld [vmem:[#allocation3 + $0xe0] sm:$0xff]  ;;  %v1504_v2 = vrot.slane %v3814_v49, 1  ;;  %v1505_v25 = vrot.slane %v1413_v60, 1  ;;  %v3842_v26 = vld [vmem:[#allocation3 + $0xe8] sm:$0x3]  ;;  %v1863_v37 = vsel %vm501_vm3, %v1861_v31, %v1862_v23 }
 0x349   :  { %1456 = vst.msk [vmem:[#allocation5 + $0x60] sm:$0xff] %vm1180_vm14, %v3820_v5  ;;  %v3824_v58 = vld [vmem:[#allocation3 + $0x100] sm:$0xff]  ;;  %v1528_v30 = vrot.slane %v3820_v5, 1  ;;  %v1529_v29 = vrot.slane %v3842_v26, 1  ;;  %v1437_v8 = vld [vmem:[#allocation3 + $0x108] sm:$0x3] }
 0x34a   :  { %1458 = vst.msk [vmem:[#allocation5 + $0x70] sm:$0xff] %vm1180_vm14, %v3824_v58  ;;  %v3830_v1 = vld [vmem:[#allocation3 + $0x70] sm:$0xff]  ;;  %v3856_v47 = vsel %vm387_vm2, %v1504_v2, %v1505_v25  ;;  %v3862_v52 = vld [vmem:[#allocation3 + $0x78] sm:$0x3]  ;;  %v1534_v57 = vrot.slane %v3824_v58, 1  ;;  %v1535_v51 = vrot.slane %v1437_v8, 1 }
 0x34b   :  { %1451 = vst.msk [vmem:[#allocation5 + $0x38] sm:$0xff] %vm1180_vm14, %v3830_v1  ;;  %v3838_v3 = vld [vmem:[#allocation3 + $0xc0] sm:$0xff]  ;;  %v3866_v56 = vsel %vm387_vm2, %v1528_v30, %v1529_v29  ;;  %v1513_v16 = vrot.slane %v3830_v1, 1  ;;  %v1514_v43 = vrot.slane %v3862_v52, 1  ;;  %v3883_v35 = vld [vmem:[#allocation3 + $0xc8] sm:$0x3] }
 0x34c   :  { %1558 = vrot.lane.b32.xlu1 %v3833_v39, %s2347_s13  ;;  %1454 = vst.msk [vmem:[#allocation5 + $0x50] sm:$0xff] %vm1180_vm14, %v3838_v3  ;;  %v3846_v38 = vld [vmem:[#allocation3 + $0xf0] sm:$0xff]  ;;  %v3873_v0 = vsel %vm387_vm2, %v1534_v57, %v1535_v51  ;;  %v1522_v50 = vrot.slane %v3838_v3, 1  ;;  %v1523_v22 = vrot.slane %v3883_v35, 1  ;;  %v1435_v27 = vld [vmem:[#allocation3 + $0xf8] sm:$0x3] }
 0x34d   :  { %1457 = vst.msk [vmem:[#allocation5 + $0x68] sm:$0xff] %vm1180_vm14, %v3846_v38  ;;  %v3878_v55 = vsel %vm387_vm2, %v1513_v16, %v1514_v43  ;;  %v1617_v46 = vrot.slane %v3814_v49, 2  ;;  %v1618_v7 = vrot.slane %v1413_v60, 2  ;;  %v1531_v53 = vrot.slane %v3846_v38, 1 }
 0x34e   :  { %v3900_v24 = vsel %vm387_vm2, %v1522_v50, %v1523_v22  ;;  %v1532_v2 = vrot.slane %v1435_v27, 1  ;;  %v1620_v60 = vrot.slane %v3743_v17, 2  ;;  %v1621_v30 = vrot.slane %v3776_v34, 2 }
 0x34f   :  { %1562 = vrot.lane.b32.xlu0 %v3851_v21, %s2347_s13  ;;  %v3914_v25 = vsel %vm501_vm3, %v1617_v46, %v1618_v7  ;;  %v1647_v29 = vrot.slane %v3824_v58, 2  ;;  %v1648_v57 = vrot.slane %v1437_v8, 2  ;;  %v1614_v16 = vrot.slane %v3711_v4, 2  ;;  %v1654_v46 = vpop.permute.xlu2 %1653 }
 0x350   :  { %1548 = vrot.lane.b32.xlu2 %v3856_v47, %s2347_s13  ;;  %v3919_v48 = vsel %vm387_vm2, %v1531_v53, %v1532_v2  ;;  %v3927_v51 = vsel %vm501_vm3, %v1620_v60, %v1621_v30  ;;  %v1615_v43 = vrot.slane %v3713_v40, 2  ;;  %v1790_v34 = vrot.slane %v3695_v10, 1 }
 0x351   :  { %v3934_v62 = vsel %vm501_vm3, %v1647_v29, %v1648_v57  ;;  %v1650_v40 = vrot.slane %v3702_v18, 2  ;;  %v1644_v7 = vrot.slane %v3846_v38, 2  ;;  %v1645_v53 = vrot.slane %v1435_v27, 2 }
 0x352   :  { %v3940_v8 = vsel %vm501_vm3, %v1614_v16, %v1615_v43  ;;  %v1792_v50 = vsel %vm387_vm2, %v1790_v34, %v1791_v12  ;;  %v1641_v27 = vrot.slane %v3820_v5, 2  ;;  %v1642_v29 = vrot.slane %v3842_v26, 2 }
 0x353   :  { %v1652_v22 = vsel %vm501_vm3, %v1650_v40, %v1651_v28  ;;  %v1646_v10 = vsel %vm501_vm3, %v1644_v7, %v1645_v53  ;;  %v1638_v26 = vrot.slane %v3769_v45, 2  ;;  %v1639_v43 = vrot.slane %v3812_v41, 2 }
 0x354   :  { %1564 = vrot.lane.b32.xlu1 %v3866_v56, %s2347_s13  ;;  %v3973_v57 = vsel %vm501_vm3, %v1641_v27, %v1642_v29  ;;  %v1636_v31 = vrot.slane %v3883_v35, 2  ;;  %v1632_v7 = vrot.slane %v3761_v59, 2  ;;  %v1633_v53 = vrot.slane %v3797_v36, 2 }
 0x355   :  { %v3993_v32 = vsel %vm501_vm3, %v1638_v26, %v1639_v43 }
 0x357   :  { %1568 = vrot.lane.b32.xlu0 %v3873_v0, %s2347_s13  ;;  %v3965_v30 = vpop.permute.xlu2 %2105 }
 0x358   :  { %1554 = vrot.lane.b32.xlu2 %v3878_v55, %s2347_s13 }
 0x35c   :  { %1570 = vrot.lane.b32.xlu1 %v3888_v9, %s2347_s13 }
 0x35f   :  { %1655 = vrot.lane.b32.xlu0 %v3895_v44, %s2351_s17  ;;  %v1541_v2 = vpop.permute.xlu1 %1540 }
 0x360   :  { %1560 = vrot.lane.b32.xlu2 %v3900_v24, %s2347_s13  ;;  %1589 = vst.msk [vmem:[#allocation5] sm:$0xff] %vm1588_vm5, %v1541_v2 }
 0x361   :  { %1702 = vst.msk [vmem:[#allocation5] sm:$0xff] %vm1701_vm6, %v1654_v46 }
 0x362   :  { %v1557_v60 = vpop.permute.xlu0 %1556 }
 0x363   :  { %1597 = vst.msk [vmem:[#allocation5 + $0x40] sm:$0xff] %vm1588_vm5, %v1557_v60 }
 0x364   :  { %1657 = vrot.lane.b32.xlu1 %v3908_v61, %s2351_s17 }
 0x367   :  { %1661 = vrot.lane.b32.xlu0 %v3914_v25, %s2351_s17  ;;  %v4002_v12 = vpop.permute.xlu1 %1961 }
 0x368   :  { %1566 = vrot.lane.b32.xlu2 %v3919_v48, %s2347_s13 }
 0x36a   :  { %v3997_v34 = vpop.permute.xlu0 %2034 }
 0x36c   :  { %1663 = vrot.lane.b32.xlu1 %v3927_v51, %s2351_s17 }
 0x36f   :  { %1681 = vrot.lane.b32.xlu0 %v3934_v62, %s2351_s17 }
 0x370   :  { %1659 = vrot.lane.b32.xlu2 %v3940_v8, %s2351_s17 }
 0x374   :  { %1823 = vrot.lane.b32.xlu1 %v1792_v50, %s2350_s16 }
 0x377   :  { %1892 = vrot.lane.b32.xlu0 %v1652_v22, %s2357_s3 }
 0x378   :  { %1683 = vrot.lane.b32.xlu2 %v1652_v22, %s2351_s17 }
 0x37c   :  { %1821 = vrot.lane.b32.xlu1 %v3888_v9, %s2350_s16 }
 0x37f   :  { %1746 = vrot.lane.b32.xlu0 %v3824_v58, %s2353_s19 }
 0x380   :  { %1894 = vrot.lane.b32.xlu2 %v1863_v37, %s2357_s3 }
 0x384   :  { %1679 = vrot.lane.b32.xlu1 %v1646_v10, %s2351_s17 }
 0x387   :  { %2103 = vrot.lane.b32.xlu0 %v1863_v37, %s2356_s11 }
 0x388   :  { %1819 = vrot.lane.b32.xlu2 %v3873_v0, %s2350_s16 }
 0x38c   :  { %2032 = vrot.lane.b32.xlu1 %v1792_v50, %s2355_s10 }
 0x38f   :  { %1957 = vrot.lane.b32.xlu0 %v3702_v18, %s2354_s2 }
 0x390   :  { %1677 = vrot.lane.b32.xlu2 %v3973_v57, %s2351_s17 }
 0x392   :  { %v3977_v16 = vpop.permute.xlu2 %1748 }
 0x394   :  { %1890 = vrot.lane.b32.xlu1 %v3934_v62, %s2357_s3 }
 0x397   :  { %1817 = vrot.lane.b32.xlu0 %v3919_v48, %s2350_s16 }
 0x398   :  { %2030 = vrot.lane.b32.xlu2 %v3888_v9, %s2355_s10 }
 0x39a   :  { %v3986_v18 = vpop.permute.xlu2 %1959 }
 0x39c   :  { %1744 = vrot.lane.b32.xlu1 %v3846_v38, %s2353_s19 }
 0x39f   :  { %1675 = vrot.lane.b32.xlu0 %v3993_v32, %s2351_s17 }
 0x3a0   :  { %1888 = vrot.lane.b32.xlu2 %v1646_v10, %s2357_s3 }
 0x3a2   :  { %v1543_v9 = vpop.permute.xlu2 %1542 }
 0x3a3   :  { %1590 = vst.msk [vmem:[#allocation5 + $0x8] sm:$0xff] %vm1588_vm5, %v1543_v9 }
 0x3a4   :  { %2101 = vrot.lane.b32.xlu1 %v1652_v22, %s2356_s11 }
 0x3a7   :  { %2028 = vrot.lane.b32.xlu0 %v3873_v0, %s2355_s10 }
 0x3a8   :  { %1742 = vrot.lane.b32.xlu2 %v3820_v5, %s2353_s19 }
 0x3a9   :  { %v1751_v41 = vpop.permute.xlu0 %1750 }
 0x3aa   :  { %v1549_v40 = vpop.permute.xlu2 %1548 }
 0x3ab   :  { %1593 = vst.msk [vmem:[#allocation5 + $0x20] sm:$0xff] %vm1588_vm5, %v1549_v40 }
 0x3ac   :  { %1955 = vrot.lane.b32.xlu1 %v3824_v58, %s2354_s2  ;;  %v1635_v58 = vrot.slane %v3838_v3, 2 }
 0x3ae   :  { %v1547_v28 = vpop.permute.xlu1 %1546  ;;  %v4030_v46 = vsel %vm501_vm3, %v1635_v58, %v1636_v31  ;;  %v1623_v31 = vrot.slane %v3733_v15, 2 }
 0x3af   :  { %1592 = vst.msk [vmem:[#allocation5 + $0x18] sm:$0xff] %vm1588_vm5, %v1547_v28  ;;  %1886 = vrot.lane.b32.xlu0 %v3973_v57, %s2357_s3 }
 0x3b0   :  { %2099 = vrot.lane.b32.xlu2 %v3934_v62, %s2356_s11 }
 0x3b1   :  { %v1545_v0 = vpop.permute.xlu0 %1544 }
 0x3b2   :  { %v1555_v50 = vpop.permute.xlu2 %1554  ;;  %1591 = vst.msk [vmem:[#allocation5 + $0x10] sm:$0xff] %vm1588_vm5, %v1545_v0 }
 0x3b3   :  { %1596 = vst.msk [vmem:[#allocation5 + $0x38] sm:$0xff] %vm1588_vm5, %v1555_v50 }
 0x3b4   :  { %1815 = vrot.lane.b32.xlu1 %v3866_v56, %s2350_s16 }
 0x3b6   :  { %v1553_v22 = vpop.permute.xlu1 %1552 }
 0x3b7   :  { %1595 = vst.msk [vmem:[#allocation5 + $0x30] sm:$0xff] %vm1588_vm5, %v1553_v22  ;;  %1740 = vrot.lane.b32.xlu0 %v3769_v45, %s2353_s19 }
 0x3b8   :  { %1953 = vrot.lane.b32.xlu2 %v3846_v38, %s2354_s2 }
 0x3b9   :  { %v1551_v62 = vpop.permute.xlu0 %1550 }
 0x3ba   :  { %v1561_v23 = vpop.permute.xlu2 %1560  ;;  %1594 = vst.msk [vmem:[#allocation5 + $0x28] sm:$0xff] %vm1588_vm5, %v1551_v62  ;;  %v1624_v62 = vrot.slane %v3750_v19, 2 }
 0x3bb   :  { %1599 = vst.msk [vmem:[#allocation5 + $0x50] sm:$0xff] %vm1588_vm5, %v1561_v23  ;;  %v1422_v23 = vld [vmem:[#allocation3 + $0x90] sm:$0xff] }
 0x3bc   :  { %1673 = vrot.lane.b32.xlu1 %v4030_v46, %s2351_s17  ;;  %v1998_v19 = vrot.slane %v1422_v23, 1 }
 0x3be   :  { %v1559_v37 = vpop.permute.xlu1 %1558 }
 0x3bf   :  { %1598 = vst.msk [vmem:[#allocation5 + $0x48] sm:$0xff] %vm1588_vm5, %v1559_v37  ;;  %2097 = vrot.lane.b32.xlu0 %v1646_v10, %s2356_s11  ;;  %v1634_v10 = vsel %vm501_vm3, %v1632_v7, %v1633_v53 }
 0x3c0   :  { %1813 = vrot.lane.b32.xlu2 %v3851_v21, %s2350_s16 }
 0x3c1   :  { %v1563_v38 = vpop.permute.xlu0 %1562 }
 0x3c2   :  { %v1567_v35 = vpop.permute.xlu2 %1566  ;;  %1600 = vst.msk [vmem:[#allocation5 + $0x58] sm:$0xff] %vm1588_vm5, %v1563_v38 }
 0x3c3   :  { %1602 = vst.msk [vmem:[#allocation5 + $0x68] sm:$0xff] %vm1588_vm5, %v1567_v35  ;;  %v4126_v35 = vsel %vm501_vm3, %v1623_v31, %v1624_v62 }
 0x3c4   :  { %2026 = vrot.lane.b32.xlu1 %v3919_v48, %s2355_s10  ;;  %v1630_v48 = vrot.slane %v3636_v42, 2 }
 0x3c6   :  { %v1565_v2 = vpop.permute.xlu1 %1564 }
 0x3c7   :  { %1601 = vst.msk [vmem:[#allocation5 + $0x60] sm:$0xff] %vm1588_vm5, %v1565_v2  ;;  %1951 = vrot.lane.b32.xlu0 %v3820_v5, %s2354_s2  ;;  %v1629_v5 = vrot.slane %v3623_v33, 2 }
 0x3c8   :  { %1671 = vrot.lane.b32.xlu2 %v1634_v10, %s2351_s17 }
 0x3c9   :  { %v1569_v60 = vpop.permute.xlu0 %1568  ;;  %v1631_v43 = vsel %vm501_vm3, %v1629_v5, %v1630_v48 }
 0x3ca   :  { %v1660_v27 = vpop.permute.xlu2 %1659  ;;  %1603 = vst.msk [vmem:[#allocation5 + $0x70] sm:$0xff] %vm1588_vm5, %v1569_v60 }
 0x3cb   :  { %1705 = vst.msk [vmem:[#allocation5 + $0x18] sm:$0xff] %vm1701_vm6, %v1660_v27 }
 0x3cc   :  { %1884 = vrot.lane.b32.xlu1 %v3993_v32, %s2357_s3 }
 0x3ce   :  { %v1571_v36 = vpop.permute.xlu1 %1570 }
 0x3cf   :  { %1604 = vst.msk [vmem:[#allocation5 + $0x78] sm:$0xff] %vm1588_vm5, %v1571_v36  ;;  %1811 = vrot.lane.b32.xlu0 %v3900_v24, %s2350_s16 }
 0x3d0   :  { %2024 = vrot.lane.b32.xlu2 %v3866_v56, %s2355_s10 }
 0x3d1   :  { %v1656_v29 = vpop.permute.xlu0 %1655 }
 0x3d2   :  { %v1684_v26 = vpop.permute.xlu2 %1683  ;;  %1703 = vst.msk [vmem:[#allocation5 + $0x8] sm:$0xff] %vm1701_vm6, %v1656_v29  ;;  %v2069_v29 = vrot.slane %v1422_v23, 2 }
 0x3d3   :  { %1717 = vst.msk [vmem:[#allocation5 + $0x78] sm:$0xff] %vm1701_vm6, %v1684_v26 }
 0x3d4   :  { %1738 = vrot.lane.b32.xlu1 %v3838_v3, %s2353_s19  ;;  %1784 = vst.msk [vmem:[#allocation5 + $0x78] sm:$0xff] %vm1768_vm7, %v1751_v41 }
 0x3d6   :  { %v1658_v9 = vpop.permute.xlu1 %1657 }
 0x3d7   :  { %1704 = vst.msk [vmem:[#allocation5 + $0x10] sm:$0xff] %vm1701_vm6, %v1658_v9  ;;  %1669 = vrot.lane.b32.xlu0 %v1631_v43, %s2351_s17 }
 0x3d8   :  { %1882 = vrot.lane.b32.xlu2 %v4030_v46, %s2357_s3 }
 0x3d9   :  { %v1662_v33 = vpop.permute.xlu0 %1661 }
 0x3da   :  { %v1895_v42 = vpop.permute.xlu2 %1894  ;;  %1706 = vst.msk [vmem:[#allocation5 + $0x20] sm:$0xff] %vm1701_vm6, %v1662_v33 }
 0x3dc   :  { %2095 = vrot.lane.b32.xlu1 %v3973_v57, %s2356_s11 }
 0x3de   :  { %v1664_v56 = vpop.permute.xlu1 %1663 }
 0x3df   :  { %1707 = vst.msk [vmem:[#allocation5 + $0x28] sm:$0xff] %vm1701_vm6, %v1664_v56  ;;  %2022 = vrot.lane.b32.xlu0 %v3851_v21, %s2355_s10 }
 0x3e0   :  { %1736 = vrot.lane.b32.xlu2 %v3761_v59, %s2353_s19 }
 0x3e1   :  { %v1682_v41 = vpop.permute.xlu0 %1681 }
 0x3e2   :  { %v1820_v40 = vpop.permute.xlu2 %1819  ;;  %1716 = vst.msk [vmem:[#allocation5 + $0x70] sm:$0xff] %vm1701_vm6, %v1682_v41 }
 0x3e3   :  { %1783 = vst.msk [vmem:[#allocation5 + $0x70] sm:$0xff] %vm1768_vm7, %v3977_v16  ;;  %v1420_v16 = vld [vmem:[#allocation3 + $0x80] sm:$0xff] }
 0x3e4   :  { %1949 = vrot.lane.b32.xlu1 %v3769_v45, %s2354_s2  ;;  %v1787_v0 = vrot.slane %v1420_v16, 1  ;;  %v1858_v38 = vrot.slane %v1420_v16, 2 }
 0x3e6   :  { %v1824_v57 = vpop.permute.xlu1 %1823 }
 0x3e7   :  { %1857 = vst.msk [vmem:[#allocation5 + $0x78] sm:$0xff] %vm1841_vm8, %v1824_v57  ;;  %1880 = vrot.lane.b32.xlu0 %v1634_v10, %s2357_s3 }
 0x3e8   :  { %1928 = vst.msk [vmem:[#allocation5 + $0x78] sm:$0xff] %vm1912_vm9, %v1895_v42  ;;  %2093 = vrot.lane.b32.xlu2 %v3993_v32, %s2356_s11  ;;  %v1626_v32 = vrot.slane %v3830_v1, 2 }
 0x3e9   :  { %1995 = vst.msk [vmem:[#allocation5 + $0x78] sm:$0xff] %vm1979_vm10, %v4002_v12  ;;  %v1893_v59 = vpop.permute.xlu0 %1892  ;;  %v1627_v12 = vrot.slane %v3862_v52, 2 }
 0x3ea   :  { %2068 = vst.msk [vmem:[#allocation5 + $0x78] sm:$0xff] %vm2052_vm11, %v3997_v34  ;;  %v1678_v45 = vpop.permute.xlu2 %1677 }
 0x3eb   :  { %2139 = vst.msk [vmem:[#allocation5 + $0x78] sm:$0xff] %vm2123_vm12, %v3965_v30  ;;  %v1421_v30 = vld [vmem:[#allocation3 + $0x88] sm:$0x3]  ;;  %v4108_v50 = vsel %vm501_vm3, %v1626_v32, %v1627_v12 }
 0x3ec   :  { %1714 = vst.msk [vmem:[#allocation5 + $0x60] sm:$0xff] %vm1701_vm6, %v1678_v45  ;;  %1809 = vrot.lane.b32.xlu1 %v3833_v39, %s2350_s16  ;;  %v1788_v52 = vrot.slane %v1421_v30, 1  ;;  %v1859_v7 = vrot.slane %v1421_v30, 2 }
 0x3ee   :  { %v1822_v21 = vpop.permute.xlu1 %1821  ;;  %v1860_v10 = vsel %vm501_vm3, %v1858_v38, %v1859_v7 }
 0x3ef   :  { %1856 = vst.msk [vmem:[#allocation5 + $0x70] sm:$0xff] %vm1841_vm8, %v1822_v21  ;;  %1734 = vrot.lane.b32.xlu0 %v1420_v16, %s2353_s19 }
 0x3f0   :  { %1927 = vst.msk [vmem:[#allocation5 + $0x70] sm:$0xff] %vm1912_vm9, %v1893_v59  ;;  %1947 = vrot.lane.b32.xlu2 %v3838_v3, %s2354_s2  ;;  %v1789_v3 = vsel %vm387_vm2, %v1787_v0, %v1788_v52 }
 0x3f1   :  { %1994 = vst.msk [vmem:[#allocation5 + $0x70] sm:$0xff] %vm1979_vm10, %v3986_v18  ;;  %v1747_v39 = vpop.permute.xlu0 %1746 }
 0x3f2   :  { %v2031_v34 = vpop.permute.xlu2 %2030  ;;  %v2156_v28 = vld [vmem:[#allocation5 + $0x78] sm:$0xff] }
 0x3f3   :  { %2296 = vmatpush.xpose.msk.msra.mxu1 %vm2163_vm13, %v2156_v28 }
 0x3f4   :  { %1667 = vrot.lane.b32.xlu1 %v4108_v50, %s2351_s17 }
 0x3f6   :  { %v1680_v22 = vpop.permute.xlu1 %1679 }
 0x3f7   :  { %1715 = vst.msk [vmem:[#allocation5 + $0x68] sm:$0xff] %vm1701_vm6, %v1680_v22  ;;  %2091 = vrot.lane.b32.xlu0 %v4030_v46, %s2356_s11  ;;  %v1423_v46 = vld [vmem:[#allocation3 + $0x98] sm:$0x3] }
 0x3f8   :  { %1782 = vst.msk [vmem:[#allocation5 + $0x68] sm:$0xff] %vm1768_vm7, %v1747_v39  ;;  %1807 = vrot.lane.b32.xlu2 %v1789_v3, %s2350_s16  ;;  %v2070_v26 = vrot.slane %v1423_v46, 2 }
 0x3f9   :  { %1855 = vst.msk [vmem:[#allocation5 + $0x68] sm:$0xff] %vm1841_vm8, %v1820_v40  ;;  %v2104_v18 = vpop.permute.xlu0 %2103 }
 0x3fa   :  { %v1889_v58 = vpop.permute.xlu2 %1888  ;;  %v2071_v33 = vsel %vm501_vm3, %v2069_v29, %v2070_v26 }
 0x3fc   :  { %2020 = vrot.lane.b32.xlu1 %v3900_v24, %s2355_s10  ;;  %v1999_v24 = vrot.slane %v1423_v46, 1 }
 0x3fe   :  { %v2033_v37 = vpop.permute.xlu1 %2032  ;;  %v2000_v60 = vsel %vm387_vm2, %v1998_v19, %v1999_v24 }
 0x3ff   :  { %2067 = vst.msk [vmem:[#allocation5 + $0x70] sm:$0xff] %vm2052_vm11, %v2033_v37  ;;  %1945 = vrot.lane.b32.xlu0 %v1422_v23, %s2354_s2 }
 0x400   :  { %2138 = vst.msk [vmem:[#allocation5 + $0x70] sm:$0xff] %vm2123_vm12, %v2104_v18  ;;  %1665 = vrot.lane.b32.xlu2 %v4126_v35, %s2351_s17 }
 0x401   :  { %v1958_v53 = vpop.permute.xlu0 %1957 }
 0x402   :  { %v1743_v2 = vpop.permute.xlu2 %1742 }
 0x404   :  { %1878 = vrot.lane.b32.xlu1 %v1860_v10, %s2357_s3 }
 0x406   :  { %v1891_v27 = vpop.permute.xlu1 %1890 }
 0x407   :  { %1926 = vst.msk [vmem:[#allocation5 + $0x68] sm:$0xff] %vm1912_vm9, %v1891_v27  ;;  %v2155_v36 = vld [vmem:[#allocation5 + $0x70] sm:$0xff]  ;;  %1805 = vrot.lane.b32.xlu0 %v3878_v55, %s2350_s16 }
 0x408   :  { %1993 = vst.msk [vmem:[#allocation5 + $0x68] sm:$0xff] %vm1979_vm10, %v1958_v53  ;;  %2297 = vmatpush.xpose.msk.msra.mxu1 %vm2163_vm13, %v2155_v36  ;;  %2018 = vrot.lane.b32.xlu2 %v2000_v60, %s2355_s10 }
 0x409   :  { %2066 = vst.msk [vmem:[#allocation5 + $0x68] sm:$0xff] %vm2052_vm11, %v2031_v34  ;;  %v1818_v5 = vpop.permute.xlu0 %1817 }
 0x40a   :  { %v2100_v48 = vpop.permute.xlu2 %2099 }
 0x40c   :  { %1732 = vrot.lane.b32.xlu1 %v3830_v1, %s2353_s19 }
 0x40e   :  { %v1745_v43 = vpop.permute.xlu1 %1744 }
 0x40f   :  { %1781 = vst.msk [vmem:[#allocation5 + $0x60] sm:$0xff] %vm1768_vm7, %v1745_v43  ;;  %1943 = vrot.lane.b32.xlu0 %v1420_v16, %s2354_s2 }
 0x410   :  { %1854 = vst.msk [vmem:[#allocation5 + $0x60] sm:$0xff] %vm1841_vm8, %v1818_v5  ;;  %1876 = vrot.lane.b32.xlu2 %v4108_v50, %s2357_s3 }
 0x411   :  { %1925 = vst.msk [vmem:[#allocation5 + $0x60] sm:$0xff] %vm1912_vm9, %v1889_v58  ;;  %v1676_v9 = vpop.permute.xlu0 %1675 }
 0x412   :  { %v1954_v42 = vpop.permute.xlu2 %1953  ;;  %1713 = vst.msk [vmem:[#allocation5 + $0x58] sm:$0xff] %vm1701_vm6, %v1676_v9 }
 0x413   :  { %1780 = vst.msk [vmem:[#allocation5 + $0x58] sm:$0xff] %vm1768_vm7, %v1743_v2 }
 0x414   :  { %2089 = vrot.lane.b32.xlu1 %v2071_v33, %s2356_s11 }
 0x416   :  { %v2102_v56 = vpop.permute.xlu1 %2101 }
 0x417   :  { %2137 = vst.msk [vmem:[#allocation5 + $0x68] sm:$0xff] %vm2123_vm12, %v2102_v56  ;;  %1803 = vrot.lane.b32.xlu0 %v3790_v20, %s2350_s16 }
 0x418   :  { %2016 = vrot.lane.b32.xlu2 %v1789_v3, %s2355_s10 }
 0x419   :  { %v2029_v41 = vpop.permute.xlu0 %2028 }
 0x41a   :  { %v1814_v40 = vpop.permute.xlu2 %1813 }
 0x41c   :  { %1730 = vrot.lane.b32.xlu1 %v3733_v15, %s2353_s19 }
 0x41e   :  { %v1956_v57 = vpop.permute.xlu1 %1955  ;;  %v2154_v59 = vld [vmem:[#allocation5 + $0x68] sm:$0xff] }
 0x41f   :  { %1992 = vst.msk [vmem:[#allocation5 + $0x60] sm:$0xff] %vm1979_vm10, %v1956_v57  ;;  %2298 = vmatpush.xpose.msk.msra.mxu1 %vm2163_vm13, %v2154_v59  ;;  %1941 = vrot.lane.b32.xlu0 %v3830_v1, %s2354_s2 }
 0x420   :  { %2065 = vst.msk [vmem:[#allocation5 + $0x60] sm:$0xff] %vm2052_vm11, %v2029_v41  ;;  %1874 = vrot.lane.b32.xlu2 %v4126_v35, %s2357_s3 }
 0x421   :  { %2136 = vst.msk [vmem:[#allocation5 + $0x60] sm:$0xff] %vm2123_vm12, %v2100_v48  ;;  %v1887_v45 = vpop.permute.xlu0 %1886 }
 0x422   :  { %v1672_v21 = vpop.permute.xlu2 %1671 }
 0x423   :  { %1711 = vst.msk [vmem:[#allocation5 + $0x48] sm:$0xff] %vm1701_vm6, %v1672_v21 }
 0x424   :  { %2087 = vrot.lane.b32.xlu1 %v1860_v10, %s2356_s11 }
 0x426   :  { %v1816_v16 = vpop.permute.xlu1 %1815 }
 0x427   :  { %1853 = vst.msk [vmem:[#allocation5 + $0x58] sm:$0xff] %vm1841_vm8, %v1816_v16  ;;  %1801 = vrot.lane.b32.xlu0 %v3802_v54, %s2350_s16 }
 0x428   :  { %1924 = vst.msk [vmem:[#allocation5 + $0x58] sm:$0xff] %vm1912_vm9, %v1887_v45  ;;  %2014 = vrot.lane.b32.xlu2 %v3878_v55, %s2355_s10  ;;  %v2153_v1 = vld [vmem:[#allocation5 + $0x60] sm:$0xff] }
 0x429   :  { %1991 = vst.msk [vmem:[#allocation5 + $0x58] sm:$0xff] %vm1979_vm10, %v1954_v42  ;;  %2299 = vmatpush.xpose.msk.msra.mxu1 %vm2163_vm13, %v2153_v1  ;;  %v1741_v32 = vpop.permute.xlu0 %1740 }
 0x42a   :  { %v2025_v12 = vpop.permute.xlu2 %2024 }
 0x42c   :  { %1728 = vrot.lane.b32.xlu1 %v3743_v17, %s2353_s19 }
 0x42e   :  { %v1674_v30 = vpop.permute.xlu1 %1673 }
 0x42f   :  { %1712 = vst.msk [vmem:[#allocation5 + $0x50] sm:$0xff] %vm1701_vm6, %v1674_v30  ;;  %1939 = vrot.lane.b32.xlu0 %v3733_v15, %s2354_s2 }
 0x430   :  { %1779 = vst.msk [vmem:[#allocation5 + $0x50] sm:$0xff] %vm1768_vm7, %v1741_v32  ;;  %1872 = vrot.lane.b32.xlu2 %v3927_v51, %s2357_s3 }
 0x431   :  { %1852 = vst.msk [vmem:[#allocation5 + $0x50] sm:$0xff] %vm1841_vm8, %v1814_v40  ;;  %v2098_v55 = vpop.permute.xlu0 %2097 }
 0x432   :  { %v1883_v39 = vpop.permute.xlu2 %1882 }
 0x434   :  { %2085 = vrot.lane.b32.xlu1 %v4108_v50, %s2356_s11 }
 0x436   :  { %v2027_v34 = vpop.permute.xlu1 %2026 }
 0x437   :  { %2064 = vst.msk [vmem:[#allocation5 + $0x58] sm:$0xff] %vm2052_vm11, %v2027_v34  ;;  %1799 = vrot.lane.b32.xlu0 %v3856_v47, %s2350_s16 }
 0x438   :  { %2135 = vst.msk [vmem:[#allocation5 + $0x58] sm:$0xff] %vm2123_vm12, %v2098_v55  ;;  %2012 = vrot.lane.b32.xlu2 %v3790_v20, %s2355_s10 }
 0x439   :  { %v1952_v15 = vpop.permute.xlu0 %1951 }
 0x43a   :  { %v1737_v28 = vpop.permute.xlu2 %1736 }
 0x43c   :  { %1726 = vrot.lane.b32.xlu1 %v3814_v49, %s2353_s19 }
 0x43e   :  { %v1885_v0 = vpop.permute.xlu1 %1884 }
 0x43f   :  { %1923 = vst.msk [vmem:[#allocation5 + $0x50] sm:$0xff] %vm1912_vm9, %v1885_v0  ;;  %v2152_v50 = vld [vmem:[#allocation5 + $0x58] sm:$0xff]  ;;  %1937 = vrot.lane.b32.xlu0 %v3743_v17, %s2354_s2 }
 0x440   :  { %1990 = vst.msk [vmem:[#allocation5 + $0x50] sm:$0xff] %vm1979_vm10, %v1952_v15  ;;  %2300 = vmatpush.xpose.msk.msra.mxu1 %vm2163_vm13, %v2152_v50  ;;  %1870 = vrot.lane.b32.xlu2 %v3914_v25, %s2357_s3 }
 0x441   :  { %2063 = vst.msk [vmem:[#allocation5 + $0x50] sm:$0xff] %vm2052_vm11, %v2025_v12  ;;  %v1812_v20 = vpop.permute.xlu0 %1811 }
 0x442   :  { %v2094_v52 = vpop.permute.xlu2 %2093 }
 0x444   :  { %2083 = vrot.lane.b32.xlu1 %v4126_v35, %s2356_s11 }
 0x446   :  { %v1739_v22 = vpop.permute.xlu1 %1738 }
 0x447   :  { %1778 = vst.msk [vmem:[#allocation5 + $0x48] sm:$0xff] %vm1768_vm7, %v1739_v22  ;;  %1797 = vrot.lane.b32.xlu0 %v3739_v63, %s2350_s16 }
 0x448   :  { %1851 = vst.msk [vmem:[#allocation5 + $0x48] sm:$0xff] %vm1841_vm8, %v1812_v20  ;;  %2010 = vrot.lane.b32.xlu2 %v3802_v54, %s2355_s10  ;;  %v2157_v20 = vld [vmem:[%s4342_s6] sm:$0xff] }
 0x449   :  { %1922 = vst.msk [vmem:[#allocation5 + $0x48] sm:$0xff] %vm1912_vm9, %v1883_v39  ;;  %v1670_v17 = vpop.permute.xlu0 %1669 }
 0x44a   :  { %v1948_v3 = vpop.permute.xlu2 %1947  ;;  %1710 = vst.msk [vmem:[#allocation5 + $0x40] sm:$0xff] %vm1701_vm6, %v1670_v17 }
 0x44b   :  { %1777 = vst.msk [vmem:[#allocation5 + $0x40] sm:$0xff] %vm1768_vm7, %v1737_v28 }
 0x44c   :  { %1724 = vrot.lane.b32.xlu1 %v3711_v4, %s2353_s19 }
 0x44e   :  { %v2096_v18 = vpop.permute.xlu1 %2095 }
 0x44f   :  { %2134 = vst.msk [vmem:[#allocation5 + $0x50] sm:$0xff] %vm2123_vm12, %v2096_v18  ;;  %1935 = vrot.lane.b32.xlu0 %v3814_v49, %s2354_s2 }
 0x450   :  { %1868 = vrot.lane.b32.xlu2 %v3940_v8, %s2357_s3 }
 0x451   :  { %v2023_v54 = vpop.permute.xlu0 %2022 }
 0x452   :  { %v1808_v58 = vpop.permute.xlu2 %1807 }
 0x454   :  { %2081 = vrot.lane.b32.xlu1 %v3927_v51, %s2356_s11 }
 0x456   :  { %v1950_v31 = vpop.permute.xlu1 %1949  ;;  %v2151_v62 = vld [vmem:[#allocation5 + $0x50] sm:$0xff] }
 0x457   :  { %1989 = vst.msk [vmem:[#allocation5 + $0x48] sm:$0xff] %vm1979_vm10, %v1950_v31  ;;  %2301 = vmatpush.xpose.msk.msra.mxu1 %vm2163_vm13, %v2151_v62  ;;  %1795 = vrot.lane.b32.xlu0 %v3765_v6, %s2350_s16 }
 0x458   :  { %2062 = vst.msk [vmem:[#allocation5 + $0x48] sm:$0xff] %vm2052_vm11, %v2023_v54  ;;  %2008 = vrot.lane.b32.xlu2 %v3856_v47, %s2355_s10 }
 0x459   :  { %2133 = vst.msk [vmem:[#allocation5 + $0x48] sm:$0xff] %vm2123_vm12, %v2094_v52  ;;  %v1881_v49 = vpop.permute.xlu0 %1880  ;;  %v2358_v52 = vmov 0  }
 0x45a   :  { %v1666_v23 = vpop.permute.xlu2 %1665  ;;  %2338 = vset.pattern.permute.xlu0 %v2358_v52 }
 0x45b   :  { %1708 = vst.msk [vmem:[#allocation5 + $0x30] sm:$0xff] %vm1701_vm6, %v1666_v23  ;;  %v2140_v23 = vld [vmem:[%s4343_s5] sm:$0xff] }
 0x45c   :  { %1722 = vrot.lane.b32.xlu1 %v3722_v11, %s2353_s19 }
 0x45e   :  { %v1810_v51 = vpop.permute.xlu1 %1809 }
 0x45f   :  { %1850 = vst.msk [vmem:[#allocation5 + $0x40] sm:$0xff] %vm1841_vm8, %v1810_v51  ;;  %1933 = vrot.lane.b32.xlu0 %v3711_v4, %s2354_s2 }
 0x460   :  { %1921 = vst.msk [vmem:[#allocation5 + $0x40] sm:$0xff] %vm1912_vm9, %v1881_v49  ;;  %1866 = vrot.lane.b32.xlu2 %v3908_v61, %s2357_s3  ;;  %v2150_v47 = vld [vmem:[#allocation5 + $0x48] sm:$0xff] }
 0x461   :  { %1988 = vst.msk [vmem:[#allocation5 + $0x40] sm:$0xff] %vm1979_vm10, %v1948_v3  ;;  %2302 = vmatpush.xpose.msk.msra.mxu1 %vm2163_vm13, %v2150_v47  ;;  %v1735_v37 = vpop.permute.xlu0 %1734 }
 0x462   :  { %v2019_v46 = vpop.permute.xlu2 %2018 }
 0x464   :  { %2079 = vrot.lane.b32.xlu1 %v3914_v25, %s2356_s11 }
 0x466   :  { %v1668_v38 = vpop.permute.xlu1 %1667 }
 0x467   :  { %1709 = vst.msk [vmem:[#allocation5 + $0x38] sm:$0xff] %vm1701_vm6, %v1668_v38  ;;  %1793 = vrot.lane.b32.xlu0 %v3808_v14, %s2350_s16 }
 0x468   :  { %1776 = vst.msk [vmem:[#allocation5 + $0x38] sm:$0xff] %vm1768_vm7, %v1735_v37  ;;  %2006 = vrot.lane.b32.xlu2 %v3739_v63, %s2355_s10 }
 0x469   :  { %1849 = vst.msk [vmem:[#allocation5 + $0x38] sm:$0xff] %vm1841_vm8, %v1808_v58  ;;  %v2092_v4 = vpop.permute.xlu0 %2091 }
 0x46a   :  { %v1877_v35 = vpop.permute.xlu2 %1876 }
 0x46c   :  { %1720 = vrot.lane.b32.xlu1 %v3754_v13, %s2353_s19 }
 0x46e   :  { %v2021_v7 = vpop.permute.xlu1 %2020 }
 0x46f   :  { %2061 = vst.msk [vmem:[#allocation5 + $0x40] sm:$0xff] %vm2052_vm11, %v2021_v7  ;;  %1931 = vrot.lane.b32.xlu0 %v3722_v11, %s2354_s2 }
 0x470   :  { %2132 = vst.msk [vmem:[#allocation5 + $0x40] sm:$0xff] %vm2123_vm12, %v2092_v4  ;;  %1864 = vrot.lane.b32.xlu2 %v3895_v44, %s2357_s3 }
 0x471   :  { %v1946_v14 = vpop.permute.xlu0 %1945 }
 0x472   :  { %v2017_v63 = vpop.permute.xlu2 %2016 }
 0x474   :  { %2077 = vrot.lane.b32.xlu1 %v3940_v8, %s2356_s11 }
 0x476   :  { %v1879_v25 = vpop.permute.xlu1 %1878 }
 0x477   :  { %1920 = vst.msk [vmem:[#allocation5 + $0x38] sm:$0xff] %vm1912_vm9, %v1879_v25  ;;  %v2149_v13 = vld [vmem:[#allocation5 + $0x40] sm:$0xff]  ;;  %2160 = vperm.xlu0 %2338, %v2157_v20  }
 0x478   :  { %1987 = vst.msk [vmem:[#allocation5 + $0x38] sm:$0xff] %vm1979_vm10, %v1946_v14  ;;  %2303 = vmatpush.xpose.msk.msra.mxu1 %vm2163_vm13, %v2149_v13  ;;  %2075 = vrot.lane.b32.xlu2 %v3908_v61, %s2356_s11 }
 0x479   :  { %2060 = vst.msk [vmem:[#allocation5 + $0x38] sm:$0xff] %vm2052_vm11, %v2019_v46  ;;  %v1806_v11 = vpop.permute.xlu0 %1805 }
 0x47a   :  { %v1875_v44 = vpop.permute.xlu2 %1874 }
 0x47c   :  { %2004 = vrot.lane.b32.xlu1 %v3765_v6, %s2355_s10 }
 0x47e   :  { %v1733_v19 = vpop.permute.xlu1 %1732 }
 0x47f   :  { %1775 = vst.msk [vmem:[#allocation5 + $0x30] sm:$0xff] %vm1768_vm7, %v1733_v19 }
 0x480   :  { %1848 = vst.msk [vmem:[#allocation5 + $0x30] sm:$0xff] %vm1841_vm8, %v1806_v11 }
 0x481   :  { %1919 = vst.msk [vmem:[#allocation5 + $0x30] sm:$0xff] %vm1912_vm9, %v1877_v35  ;;  %v1944_v8 = vpop.permute.xlu0 %1943 }
 0x482   :  { %v2015_v53 = vpop.permute.xlu2 %2014  ;;  %1986 = vst.msk [vmem:[#allocation5 + $0x30] sm:$0xff] %vm1979_vm10, %v1944_v8 }
 0x483   :  { %2059 = vst.msk [vmem:[#allocation5 + $0x30] sm:$0xff] %vm2052_vm11, %v2017_v63 }
 0x486   :  { %v2090_v61 = vpop.permute.xlu1 %2089 }
 0x487   :  { %2131 = vst.msk [vmem:[#allocation5 + $0x38] sm:$0xff] %vm2123_vm12, %v2090_v61 }
 0x489   :  { %v1804_v24 = vpop.permute.xlu0 %1803 }
 0x48a   :  { %v1873_v2 = vpop.permute.xlu2 %1872 }
 0x48e   :  { %v1731_v10 = vpop.permute.xlu1 %1730  ;;  %v2148_v6 = vld [vmem:[#allocation5 + $0x38] sm:$0xff] }
 0x48f   :  { %1774 = vst.msk [vmem:[#allocation5 + $0x28] sm:$0xff] %vm1768_vm7, %v1731_v10  ;;  %2304 = vmatpush.xpose.msk.msra.mxu1 %vm2163_vm13, %v2148_v6 }
 0x490   :  { %1847 = vst.msk [vmem:[#allocation5 + $0x28] sm:$0xff] %vm1841_vm8, %v1804_v24  ;;  %v2245_v24 = vld [vmem:[%s4344_s7] sm:$0xff] }
 0x491   :  { %1918 = vst.msk [vmem:[#allocation5 + $0x28] sm:$0xff] %vm1912_vm9, %v1875_v44  ;;  %v1942_v60 = vpop.permute.xlu0 %1941 }
 0x492   :  { %1985 = vst.msk [vmem:[#allocation5 + $0x28] sm:$0xff] %vm1979_vm10, %v1942_v60  ;;  %v2013_v27 = vpop.permute.xlu2 %2012  ;;  %v2258_v60 = vld [vmem:[%s4345_s8] sm:$0xff] }
 0x493   :  { %2058 = vst.msk [vmem:[#allocation5 + $0x28] sm:$0xff] %vm2052_vm11, %v2015_v53 }
 0x496   :  { %v2088_v36 = vpop.permute.xlu1 %2087 }
 0x497   :  { %2130 = vst.msk [vmem:[#allocation5 + $0x30] sm:$0xff] %vm2123_vm12, %v2088_v36 }
 0x499   :  { %v1802_v5 = vpop.permute.xlu0 %1801 }
 0x49a   :  { %v1871_v26 = vpop.permute.xlu2 %1870 }
 0x49e   :  { %v1729_v48 = vpop.permute.xlu1 %1728  ;;  %v2147_v29 = vld [vmem:[#allocation5 + $0x30] sm:$0xff] }
 0x49f   :  { %1773 = vst.msk [vmem:[#allocation5 + $0x20] sm:$0xff] %vm1768_vm7, %v1729_v48  ;;  %2305 = vmatpush.xpose.msk.msra.mxu1 %vm2163_vm13, %v2147_v29 }
 0x4a0   :  { %1846 = vst.msk [vmem:[#allocation5 + $0x20] sm:$0xff] %vm1841_vm8, %v1802_v5 }
 0x4a1   :  { %1917 = vst.msk [vmem:[#allocation5 + $0x20] sm:$0xff] %vm1912_vm9, %v1873_v2  ;;  %v1940_v43 = vpop.permute.xlu0 %1939 }
 0x4a2   :  { %1984 = vst.msk [vmem:[#allocation5 + $0x20] sm:$0xff] %vm1979_vm10, %v1940_v43  ;;  %v2011_v42 = vpop.permute.xlu2 %2010 }
 0x4a3   :  { %2057 = vst.msk [vmem:[#allocation5 + $0x20] sm:$0xff] %vm2052_vm11, %v2013_v27 }
 0x4a6   :  { %v2086_v9 = vpop.permute.xlu1 %2085 }
 0x4a7   :  { %2129 = vst.msk [vmem:[#allocation5 + $0x28] sm:$0xff] %vm2123_vm12, %v2086_v9 }
 0x4a9   :  { %v1800_v33 = vpop.permute.xlu0 %1799 }
 0x4aa   :  { %v1869_v57 = vpop.permute.xlu2 %1868 }
 0x4ae   :  { %v1727_v56 = vpop.permute.xlu1 %1726  ;;  %v2146_v41 = vld [vmem:[#allocation5 + $0x28] sm:$0xff] }
 0x4af   :  { %1772 = vst.msk [vmem:[#allocation5 + $0x18] sm:$0xff] %vm1768_vm7, %v1727_v56  ;;  %2306 = vmatpush.xpose.msk.msra.mxu1 %vm2163_vm13, %v2146_v41 }
 0x4b0   :  { %1845 = vst.msk [vmem:[#allocation5 + $0x18] sm:$0xff] %vm1841_vm8, %v1800_v33 }
 0x4b1   :  { %1916 = vst.msk [vmem:[#allocation5 + $0x18] sm:$0xff] %vm1912_vm9, %v1871_v26  ;;  %v1938_v40 = vpop.permute.xlu0 %1937 }
 0x4b2   :  { %1983 = vst.msk [vmem:[#allocation5 + $0x18] sm:$0xff] %vm1979_vm10, %v1938_v40  ;;  %v2009_v21 = vpop.permute.xlu2 %2008 }
 0x4b3   :  { %2056 = vst.msk [vmem:[#allocation5 + $0x18] sm:$0xff] %vm2052_vm11, %v2011_v42 }
 0x4b6   :  { %v2084_v59 = vpop.permute.xlu1 %2083 }
 0x4b7   :  { %2128 = vst.msk [vmem:[#allocation5 + $0x20] sm:$0xff] %vm2123_vm12, %v2084_v59 }
 0x4b9   :  { %v1798_v45 = vpop.permute.xlu0 %1797 }
 0x4ba   :  { %v1867_v30 = vpop.permute.xlu2 %1866 }
 0x4be   :  { %v1725_v16 = vpop.permute.xlu1 %1724  ;;  %v2145_v1 = vld [vmem:[#allocation5 + $0x20] sm:$0xff] }
 0x4bf   :  { %1771 = vst.msk [vmem:[#allocation5 + $0x10] sm:$0xff] %vm1768_vm7, %v1725_v16  ;;  %2307 = vmatpush.xpose.msk.msra.mxu1 %vm2163_vm13, %v2145_v1 }
 0x4c0   :  { %1844 = vst.msk [vmem:[#allocation5 + $0x10] sm:$0xff] %vm1841_vm8, %v1798_v45 }
 0x4c1   :  { %1915 = vst.msk [vmem:[#allocation5 + $0x10] sm:$0xff] %vm1912_vm9, %v1869_v57  ;;  %v1936_v32 = vpop.permute.xlu0 %1935 }
 0x4c2   :  { %1982 = vst.msk [vmem:[#allocation5 + $0x10] sm:$0xff] %vm1979_vm10, %v1936_v32  ;;  %v2007_v28 = vpop.permute.xlu2 %2006 }
 0x4c3   :  { %2055 = vst.msk [vmem:[#allocation5 + $0x10] sm:$0xff] %vm2052_vm11, %v2009_v21 }
 0x4c6   :  { %v2082_v12 = vpop.permute.xlu1 %2081 }
 0x4c7   :  { %2127 = vst.msk [vmem:[#allocation5 + $0x18] sm:$0xff] %vm2123_vm12, %v2082_v12 }
 0x4c9   :  { %v1796_v55 = vpop.permute.xlu0 %1795 }
 0x4ca   :  { %v1865_v3 = vpop.permute.xlu2 %1864 }
 0x4ce   :  { %v1723_v39 = vpop.permute.xlu1 %1722  ;;  %v2144_v34 = vld [vmem:[#allocation5 + $0x18] sm:$0xff] }
 0x4cf   :  { %1770 = vst.msk [vmem:[#allocation5 + $0x8] sm:$0xff] %vm1768_vm7, %v1723_v39  ;;  %2308 = vmatpush.xpose.msk.msra.mxu1 %vm2163_vm13, %v2144_v34 }
 0x4d0   :  { %1843 = vst.msk [vmem:[#allocation5 + $0x8] sm:$0xff] %vm1841_vm8, %v1796_v55 }
 0x4d1   :  { %1914 = vst.msk [vmem:[#allocation5 + $0x8] sm:$0xff] %vm1912_vm9, %v1867_v30  ;;  %v1934_v15 = vpop.permute.xlu0 %1933 }
 0x4d2   :  { %1981 = vst.msk [vmem:[#allocation5 + $0x8] sm:$0xff] %vm1979_vm10, %v1934_v15  ;;  %v2076_v62 = vpop.permute.xlu2 %2075 }
 0x4d3   :  { %2054 = vst.msk [vmem:[#allocation5 + $0x8] sm:$0xff] %vm2052_vm11, %v2007_v28 }
 0x4d6   :  { %v2080_v0 = vpop.permute.xlu1 %2079 }
 0x4d7   :  { %2126 = vst.msk [vmem:[#allocation5 + $0x10] sm:$0xff] %vm2123_vm12, %v2080_v0 }
 0x4d9   :  { %v1794_v50 = vpop.permute.xlu0 %1793 }
 0x4de   :  { %v1721_v22 = vpop.permute.xlu1 %1720  ;;  %v2143_v17 = vld [vmem:[#allocation5 + $0x10] sm:$0xff] }
 0x4df   :  { %1769 = vst.msk [vmem:[#allocation5] sm:$0xff] %vm1768_vm7, %v1721_v22  ;;  %2309 = vmatpush.xpose.msk.msra.mxu1 %vm2163_vm13, %v2143_v17 }
 0x4e0   :  { %1842 = vst.msk [vmem:[#allocation5] sm:$0xff] %vm1841_vm8, %v1794_v50 }
 0x4e1   :  { %1913 = vst.msk [vmem:[#allocation5] sm:$0xff] %vm1912_vm9, %v1865_v3  ;;  %v1932_v18 = vpop.permute.xlu0 %1931 }
 0x4e2   :  { %1980 = vst.msk [vmem:[#allocation5] sm:$0xff] %vm1979_vm10, %v1932_v18 }
 0x4e6   :  { %v2078_v54 = vpop.permute.xlu1 %2077 }
 0x4e7   :  { %2125 = vst.msk [vmem:[#allocation5 + $0x8] sm:$0xff] %vm2123_vm12, %v2078_v54 }
 0x4e9   :  { %v2161_v51 = vpop.permute.xlu0 %2160 }
 0x4ee   :  { %v2005_v58 = vpop.permute.xlu1 %2004  ;;  %v2142_v31 = vld [vmem:[#allocation5 + $0x8] sm:$0xff] }
 0x4ef   :  { %2053 = vst.msk [vmem:[#allocation5] sm:$0xff] %vm2052_vm11, %v2005_v58  ;;  %2310 = vmatpush.xpose.msk.msra.mxu1 %vm2163_vm13, %v2142_v31 }
 0x4f0   :  { %2124 = vst.msk [vmem:[#allocation5] sm:$0xff] %vm2123_vm12, %v2076_v62 }
 0x4f7   :  { %v2141_v49 = vld [vmem:[#allocation5] sm:$0xff] }
 0x4f8   :  { %2311 = vmatpush.xpose.msk.msra.mxu1 %vm2163_vm13, %v2141_v49 }
 0x4fb   :  { %2312 = vmatmul.msk.f32.vlgmr.msra.gmra.mxu1 %vm2163_vm13, %v2140_v23 }
 0x578   :  { %v2232_v47 = vpop.f32.mrf.mxu1 }
 0x579   :  { %v2233_v37 = vadd.f32 %v2232_v47, %v2161_v51 }
 0x57b   :  { %2235 = vadd.xlane.f32.xlu1 %v2233_v37  ;;  %v2237_v46 = vmul.f32 %v2233_v37, %v2233_v37 }
 0x57d   :  { %2238 = vadd.xlane.f32.xlu2 %v2237_v46 }
 0x5ee   :  { %v2236_v38 = vpop.xlane.xlu1 %2235 }
 0x5ef   :  { %v2240_v4 = vmul.f32 0.0078125, %v2236_v38 }
 0x5f0   :  { %v2239_v35 = vpop.xlane.xlu2 %2238 }
 0x5f1   :  { %v2242_v7 = vmul.f32 %v2240_v4, %v2240_v4  ;;  %v2241_v14 = vmul.f32 0.0078125, %v2239_v35 }
 0x5f3   :  { %v2243_v63 = vsub.f32 %v2241_v14, %v2242_v7 }
 0x5f5   :  { %v2244_v25 = vmax.f32 %v2243_v63, 0.0 }
 0x5f7   :  { %v2246_v13 = vadd.f32 1e-05, %v2244_v25 }
 0x5f9   :  { %2342 = vrsqrt.f32 %v2246_v13  ;;  %vm2253_vm3 = vweird.f32 %v2246_v13 }
 0x5ff   :  { %v2343_v11 = vpop.eup %2342 }
 0x600   :  { %v2248_v44 = vmul.f32 %v2343_v11, %v2246_v13  ;;  %vm2254_vm2 = vweird.f32 %v2343_v11 }
 0x601   :  { %vm2255_vm14 = vmor %vm2253_vm3, %vm2254_vm2 }
 0x602   :  { %v2249_v19 = vmul.f32 %v2343_v11, %v2248_v44 }
 0x604   :  { %v2250_v8 = vmul.f32 0.5, %v2249_v19 }
 0x606   :  { %v2251_v53 = vsub.f32 1.5, %v2250_v8 }
 0x608   :  { %v2252_v61 = vmul.f32 %v2343_v11, %v2251_v53 }
 0x60a   :  { %v2256_v2 = vsel %vm2255_vm14, %v2343_v11, %v2252_v61 }
 0x60b   :  { %v2257_v10 = vmul.f32 %v2256_v2, %v2245_v24 }
 0x60d   :  { %2263 = vperm.xlu0 %2338, %v2257_v10   ;;  %v2259_v6 = vmul.f32 %v2257_v10, %v2240_v4 }
 0x60f   :  { %v2260_v27 = vsub.f32 %v2258_v60, %v2259_v6 }
 0x615   :  { %2269 = vperm.xlu0 %2338, %v2260_v27  }
 0x67f   :  { %v2264_v36 = vpop.permute.xlu0 %2263 }
 0x680   :  { %v2266_v5 = vmul.f32 %v2264_v36, %v2233_v37 }
 0x687   :  { %v2270_v48 = vpop.permute.xlu0 %2269 }
 0x688   :  { %v2272_v29 = vadd.f32 %v2270_v48, %v2266_v5 }
 0x68a   :  { %v2273_v26 = vmax.f32 %v2272_v29, 0.0 }
 0x68c   :  { %2274 = vst [vmem:[%s4346_s9] sm:$0xff] %v2273_v26 }

</bundles_post_ra>
